<compile_context>
chip_gen: v7x
topology: tpu7x:2x2x1
jax: 0.10.0
libtpu: 0.0.40
codegen_flags: <defaults>
</compile_context>

<pallas_src>
import jax
import jax.numpy as jnp
from jax.experimental import pallas as pl
from jax.experimental.pallas import tpu as pltpu


def _round_up(x: int, m: int) -> int:
    return ((x + m - 1) // m) * m


def _round_down(x: int, m: int) -> int:
    return (x // m) * m


def _transpose_tile_kernel(x_ref, o_ref):
    # x_ref: (tC, tT) VMEM tile  ->  o_ref: (tT, tC).
    # Batch dim is Squeezed, so .T is a plain 2-D transpose (XLU).
    o_ref[...] = x_ref[...].T


def transpose_last(x, deconstruct_idx=None, *, tile_c=512, tile_t=512):
    """Pallas equivalent of TransposeLast.forward.

    x: array of shape [B, C, T] (or an indexable container if
       deconstruct_idx is given).
    Returns array of shape [B, T, C] with the same dtype.
    """
    if deconstruct_idx is not None:
        # Glue: mirrors `x = x[self.deconstruct_idx]` in the PyTorch module.
        x = x[deconstruct_idx]

    B, C, T = x.shape
    itemsize = jnp.dtype(x.dtype).itemsize

    # Fast path: for narrow channel/time dims (lane-padding to 128 would blow
    # up bandwidth by 128/min(C,T)) or tiny tensors (grid overhead dominates),
    # XLA's native transpose / consumer fusion is strictly better.
    if C < 128 or T < 128 or (B * C * T * itemsize) < (1 << 20):
        return jnp.swapaxes(x, -2, -1)

    # Each of C and T sits on the lane (128) axis in one orientation and the
    # sublane axis in the other, so keep tile dims multiples of 128; 128 also
    # covers every dtype's sublane-packing multiple (8 / 16 / 32).
    budget = tile_c * tile_t           # elements per tile (~1 MiB f32 default)
    Cr = _round_up(C, 128)
    Tr = _round_up(T, 128)
    tC = min(tile_c, Cr)
    tT = min(tile_t, Tr)
    # If one axis clamps small, grow the other (within the same VMEM budget)
    # so both the read-row (tT*itemsize) and write-row (tC*itemsize) DMA runs
    # stay long.
    if tT < tile_t and tC < Cr:
        tC = min(Cr, max(tC, _round_down(budget // tT, 128)))
    elif tC < tile_c and tT < Tr:
        tT = min(Tr, max(tT, _round_down(budget // tC, 128)))

    grid = (B, pl.cdiv(T, tT), pl.cdiv(C, tC))  # C-tiles innermost: contiguous writeback.

    out = pl.pallas_call(
        _transpose_tile_kernel,
        out_shape=jax.ShapeDtypeStruct((B, T, C), x.dtype),
        grid_spec=pl.GridSpec(
            grid=grid,
            in_specs=[
                # Input tile (tC, tT) taken at block (c, t) of batch b.
                pl.BlockSpec((pl.Squeezed(), tC, tT), lambda b, t, c: (b, c, t)),
            ],
            # Output tile (tT, tC) written at block (t, c) of batch b.
            out_specs=pl.BlockSpec((pl.Squeezed(), tT, tC), lambda b, t, c: (b, t, c)),
        ),
        compiler_params=pltpu.CompilerParams(
            dimension_semantics=("parallel", "parallel", "parallel"),
        ),
        cost_estimate=pl.CostEstimate(
            flops=0,
            transcendentals=0,
            bytes_accessed=2 * B * C * T * itemsize,  # true (unpadded) traffic
        ),
    )(x)

    return out


if __name__ == "__main__":
    key = jax.random.PRNGKey(0)

    # Primary small test matching the module's usage: B=2, C=4, T=16.
    # (C=4 takes the narrow-dim fast path — padding to 128 lanes would be
    # ~32x wasted bandwidth.)
    B, C, T = 2, 4, 16
    x = jax.random.normal(key, (B, C, T), dtype=jnp.float32)

    y = transpose_last(x)
    jax.block_until_ready(y)

    y_ref = jnp.swapaxes(x, -2, -1)
    assert y.shape == (B, T, C), y.shape
    assert y.dtype == x.dtype
    assert jnp.array_equal(y, y_ref), "mismatch vs reference transpose"

    # deconstruct_idx glue path (mirrors x = x[idx] in the PyTorch module).
    y_idx = transpose_last((jnp.zeros_like(x), x), deconstruct_idx=1)
    assert jnp.array_equal(y_idx, y_ref), "deconstruct_idx mismatch"

    # Pallas-path test: non-128-aligned C and T exercise ragged edge blocks
    # (OOB-padded reads, masked writes) with a multi-tile grid.
    k2 = jax.random.PRNGKey(1)
    x2 = jax.random.normal(k2, (2, 640, 704), dtype=jnp.float32)
    y2 = transpose_last(x2)
    jax.block_until_ready(y2)
    assert y2.shape == (2, 704, 640), y2.shape
    assert jnp.array_equal(y2, jnp.swapaxes(x2, -2, -1)), "tiled mismatch"

    print("KERNEL_OK")
</pallas_src>

<mosaic_0001>
module attributes {stable_mosaic.version = 11 : i64} {
  func.func @_transpose_tile_kernel(%arg0: i32, %arg1: i32, %arg2: i32, %arg3: memref<1x512x512xf32, #tpu.memory_space<vmem>>, %arg4: memref<1x512x512xf32, #tpu.memory_space<vmem>>) attributes {dimension_semantics = [#tpu.dimension_semantics<parallel>, #tpu.dimension_semantics<parallel>, #tpu.dimension_semantics<parallel>], iteration_bounds = array<i64: 2, 2, 2>, scalar_prefetch = 0 : i64, scratch_operands = 0 : i64, tpu.core_type = #tpu.core_type<tc>, window_params = [{transform_indices = @transform_0, window_bounds = array<i64: 1, 512, 512>}, {transform_indices = @transform_1, window_bounds = array<i64: 1, 512, 512>}]} {
    %c0 = arith.constant 0 : index
    %c0_0 = arith.constant 0 : index
    %c0_1 = arith.constant 0 : index
    %0 = vector.load %arg3[%c0, %c0_0, %c0_1] : memref<1x512x512xf32, #tpu.memory_space<vmem>>, vector<1x512x512xf32>
    %1 = vector.shape_cast %0 : vector<1x512x512xf32> to vector<512x512xf32>
    %2 = tpu.transpose %1, [1, 0] : vector<512x512xf32> -> vector<512x512xf32>
    %c0_2 = arith.constant 0 : index
    %c0_3 = arith.constant 0 : index
    %c0_4 = arith.constant 0 : index
    %3 = vector.load %arg4[%c0_2, %c0_3, %c0_4] : memref<1x512x512xf32, #tpu.memory_space<vmem>>, vector<1x512x512xf32>
    %4 = vector.shape_cast %3 : vector<1x512x512xf32> to vector<512x512xf32>
    %5 = vector.shape_cast %2 : vector<512x512xf32> to vector<1x512x512xf32>
    tpu.vector_store %arg4[%c0_2, %c0_3, %c0_4], %5 {strides = array<i32>} : memref<1x512x512xf32, #tpu.memory_space<vmem>>, vector<1x512x512xf32>,
    return
  }
  func.func @transform_0(%arg0: i32, %arg1: i32, %arg2: i32) -> (i32, i32, i32) {
    %c0_i32 = arith.constant 0 : i32
    return %arg0, %arg2, %arg1 : i32, i32, i32
  }
  func.func @transform_1(%arg0: i32, %arg1: i32, %arg2: i32) -> (i32, i32, i32) {
    %c0_i32 = arith.constant 0 : i32
    return %arg0, %arg1, %arg2 : i32, i32, i32
  }
}

</mosaic_0001>

<bundles_post_ra>
// kernel: tpu_custom_call.1
= control target key start
LH: loop header
LB: loop body
LE: loop exit
PB: predicated region body
PF: predicated region fallthrough
CT: control target
= control target key end

     0   :  { %s5531_s0 = inlined_call_operand.vmem [shape: f32[2,640,704], index: 0, kind: input, shape index: {}]   ;;  %s5532_s1 = inlined_call_operand.hbm [shape: f32[2,704,640], index: 1, kind: output, shape index: {}]  }
   0x1   :  { %5546 = sst [smem:[#allocation18_spill]] %s5531_s0 }
   0x2   :  { %5547 = sst [smem:[#allocation19_spill]] %s5532_s1 }
   0x3   :  { %6 = vsyncpa [#allocation4], 0 }
   0x4   :  { %8 = vsyncpa [#allocation4 + $0x1], 0  ;;  %s3494_s6 = smov 0   ;;  %s3496_s7 = smov 0  }
   0x5   :  { %s3498_s8 = smov 0   ;;  %s3500_s9 = smov 0  }
   0x6   :  { %s3502_s10 = smov 0   ;;  %s3504_s11 = smov 0  }
   0x7   :  { %s3506_s12 = smov 0   ;;  %s3508_s13 = smov 0  }
   0x8   :  { %s3510_s14 = smov 0   ;;  %s3512_s15 = smov 0  }
   0x9   :  { %s3514_s16 = smov 0   ;;  %s3516_s17 = smov 0  }
   0xa LB: > { %5548 = sst [smem:[#allocation6_spill]] %s3249_s6  ;;  %s2419_s18 = sadd.s32 4294967295, %s3293_s17   ;;  %s3293_s17 = sphi %s3516_s17, %s14_s17   ;;  %s3289_s16 = sphi %s3514_s16, %s5618_s16   ;;  %s3285_s15 = sphi %s3512_s15, %s5617_s15   ;;  %s3281_s14 = sphi %s3510_s14, %s5616_s14   ;;  %s3277_s13 = sphi %s3508_s13, %s5615_s13   ;;  %s3273_s12 = sphi %s3506_s12, %s5614_s12   ;;  %s3269_s11 = sphi %s3504_s11, %s5613_s11   ;;  %s3265_s10 = sphi %s3502_s10, %s5612_s10   ;;  %s3261_s9 = sphi %s3500_s9, %s5611_s9   ;;  %s3257_s8 = sphi %s3498_s8, %s5610_s8   ;;  %s3253_s7 = sphi %s3496_s7, %s5620_s7   ;;  %s3249_s6 = sphi %s3494_s6, %s5619_s6  }
   0xb   : > { %5549 = sst [smem:[#allocation7_spill]] %s3257_s8  ;;  %s26_s19 = sadd.s32 1, %s3281_s14 }
   0xc   : > { %5550 = sst [smem:[#allocation8_spill]] %s3265_s10  ;;  %p27_p0 = scmp.ge.s32.totalorder %s26_s19, 2 }
   0xd   : > { %5551 = sst [smem:[#allocation9_spill]] %s3281_s14  ;;  %s29_s20 = sadd.s32 1, %s3285_s15 }
   0xe   : > { %5552 = sst [smem:[#allocation10_spill]] %s3285_s15  ;;  %s2420_s21 = sadd.s32 4294967294, %s3293_s17  }
   0xf   : > { %5553 = sst [smem:[#allocation11_spill]] %s3289_s16  ;;  %p51_p1 = scmp.ne.s32.totalorder %s3265_s10, %s3261_s9 }
  0x10   : > { %s5622_s19 = smov (%p27_p0, %s26_s19), 0  ;;  %s5624_s20 = smov (!%p27_p0, %s29_s20), %s3285_s15 }
  0x11   : > { %5554 = sst [smem:[#allocation12_spill]] %s5622_s19  ;;  %s33_s22 = sadd.s32 1, %s3289_s16 }
  0x12   : > { %p52_p2 = scmp.eq.s32.totalorder %s3293_s17, 0  ;;  %p31_p3 = scmp.ge.s32.totalorder %s5624_s20, 2 }
  0x13   : > { %s38_s23 = ssub.s32 %s3281_s14, %s5622_s19  ;;  %p84_p5 = scmp.ne.s32.totalorder %s3257_s8, %s3253_s7 }
  0x14   : > { %p3567_p4 = por %p52_p2, %p51_p1  ;;  %s5626_s20 = smov (%p31_p3, %s5624_s20), 0 }
  0x15   : > { %5556 = sst [smem:[#allocation13_spill]] %s5626_s20  ;;  %s5628_s22 = smov (!%p31_p3, %s33_s22), %s3289_s16 }
  0x16   : > { %s40_s25 = ssub.s32 %s3285_s15, %s5626_s20  ;;  %p85_p6 = scmp.eq.s32.totalorder %s2419_s18, 7 }
  0x17   : > { %p35_p7 = scmp.ge.s32.totalorder %s5628_s22, 2  ;;  %p90_p8 = scmp.ne.s32.totalorder %s3253_s7, %s3249_s6 }
  0x18   : > { %p3580_p9 = por %p85_p6, %p84_p5  ;;  %p91_p10 = scmp.eq.s32.totalorder %s2420_s21, 7 }
  0x19   : > { %s5630_s22 = smov (%p35_p7, %s5628_s22), 0  ;;  %s44_s27 = sadd.s32 1, %s3265_s10 }
  0x1a   : > { %5558 = sst [smem:[#allocation14_spill]] %s5630_s22  ;;  %p3587_p11 = por %p91_p10, %p90_p8 }
  0x1b   : > { %s37_s29 = ssub.s32 %s3289_s16, %s5630_s22  ;;  %s74_s30 = sadd.s32 1, %s3257_s8 }
  0x1c   : > { %s5559_s28 = scalar_select %p3587_p11, 1, 0 }
  0x1d   : > { %s39_s2 = sor.u32 %s38_s23, %s37_s29  ;;  %s69_s3 = sor.u32 %s40_s25, %s37_s29 }
  0x1e   : > { %5560 = sst [smem:[#allocation15_spill]] %s5559_s28  ;;  %s41_s4 = sor.u32 %s40_s25, %s39_s2 }
  0x1f   : > { %s71_s5 = sor.u32 %s69_s3, %s38_s23  ;;  %p42_p12 = scmp.eq.s32.totalorder %s41_s4, 0 }
  0x20   : > { %p72_p13 = scmp.eq.s32.totalorder %s71_s5, 0  ;;  %p2422_p0 = scmp.ge.s32.totalorder %s3293_s17, 8 }
  0x21   : > { %s3595_s18 = scalar_select %p42_p12, %s3265_s10, %s44_s27  }
  0x22   : > { %s3598_s20 = scalar_select %p72_p13, %s3257_s8, %s74_s30  }
  0x23   : > { %5561 = sst [smem:[#allocation16_spill]] %s3595_s18  ;;  %107 = sbr.rel (%p2422_p0) target bundleno = 456 (0x1c8), region = 16 }
  0x24   : > { %5562 = sst [smem:[#allocation17_spill]] %s3598_s20 }
  0x2a   : > { %110 = sbr.rel (!%p3567_p4) target bundleno = 456 (0x1c8), region = 20  ;;  %s112_s21 = sand.u32 (%p3567_p4), 1, %s3265_s10  }
  0x2b   : > { %s2424_s25 = sshll.u32 (%p3567_p4), %s3281_s14, 6  ;;  %s2423_s23 = sshll.u32 (%p3567_p4), %s112_s21, 11 }
  0x2c   : > { %s2425_s29 = sshll.u32 (%p3567_p4), %s3285_s15, 2  ;;  %s117_s2 = ssub.s32 (%p3567_p4), 80, %s2424_s25 }
  0x2d   : > { %p118_p1 = scmp.lt.s32.totalorder (%p3567_p4), %s117_s2, 64  ;;  %s121_s27 = ssub.s32 (%p3567_p4), 6, %s2425_s29 }
  0x2e   : > { %p122_p2 = scmp.lt.s32.totalorder (%p3567_p4), %s121_s27, 4  ;;  %s2505_s30 = smul.u32 (%p3567_p4), 384, %s3281_s14 }
  0x2f   : > { %s2506_s22 = smul.u32 (%p3567_p4), 480, %s3289_s16  ;;  %s5563_s0 = sld [smem:[#allocation18_spill]] (%p3567_p4) }
  0x30   : > { %s127_s3 = sadd.s32 (%p3567_p4), %s2505_s30, %s2425_s29  ;;  %s3618_s15 = scalar_lea.vmem (%p3567_p4), [#allocation2], %s2423_s23  }
  0x31   : > { %s5632_s2 = smov (!%p118_p1, %s117_s2), 64  ;;  %s5634_s27 = smov (!%p122_p2, %s121_s27), 4 }
  0x32   : > { %s2426_s24 = sshll.u32 %s5632_s2, 7  ;;  %s3610_s5 = sshll.u32 %s5634_s27, 3 }
  0x33   : > { %s124_s4 = smul.u32 %s2426_s24, %s5634_s27  ;;  %s129_s19 = sadd.s32 %s2506_s22, %s127_s3 }
  0x34   : > { %s2429_s18 = sshll.u32 %s129_s19, 3 }
  0x35   : > { %s3616_s25 = scalar_lea.vmem %s5563_s0, %s2429_s18   ;;  %p2431_p3 = scmp.eq.s32.totalorder %s124_s4, 0 }
  0x36   : > { %p136_p4 = scmp.lt.u32.totalorder (!%p2431_p3), %s3610_s5, 8 }
  0x37   : > { %135 = sbr.rel (%p2431_p3) target bundleno = 456 (0x1c8), region = 24 }
  0x3e   : > { %139 = sbr.rel (%p136_p4) target bundleno = 356 (0x164), region = 28  ;;  %s3622_s29 = sand.u32 (!%p136_p4), 7, %s3610_s5  }
  0x3f   : > { %p315_p5 = scmp.eq.s32.totalorder (!%p136_p4), %s3622_s29, 0  ;;  %p2432_p6 = scmp.ne.s32.totalorder (!%p136_p4), %s3622_s29, 0 }
  0x45   : > { %318 = sbr.rel (%p2432_p6) target bundleno = 165 (0xa5), region = 50  ;;  %s5538_s10 = sshrl.u32 (!%p2432_p6), %s3610_s5, 3 }
  0x46   : > { %s3628_s19 = sshrl.u32 (!%p2432_p6), %s5632_s2, 4  ;;  %s3632_s22 = sshrl.u32 (!%p2432_p6), %s5538_s10, 2 }
  0x47   : > { %s3636_s18 = smul.u32 (!%p2432_p6), %s3632_s22, %s3628_s19 }
  0x49   : > { %p2433_p7 = scmp.le.s32.totalorder (!%p2432_p6), %s3636_s18, 0 }
  0x4c   : > { %2229 = sbr.rel (%p2433_p7) target bundleno = 116 (0x74), region = 182  ;;  %s5564_s23 = smov (!%p2433_p7), %s3618_s15 }
  0x4d   : > { %s5565_s27 = smov (!%p2433_p7), %s3616_s25  ;;  %s3645_s30 = smov (!%p2433_p7), 0  }
  0x4e   : > { %s3647_s24 = smov (!%p2433_p7), 0   ;;  %s3649_s3 = smov (!%p2433_p7), 0  }
  0x53 LB: >> { %v335_v0 = vld [vmem:[%s3301_s27] sm:$0xff]  ;;  %v337_v1 = vld [vmem:[%s3301_s27 + $0x8] sm:$0xff]  ;;  %v339_v2 = vld [vmem:[%s3301_s27 + $0x10] sm:$0xff]  ;;  %s463_s4 = sadd.s32 1, %s3305_s30  ;;  %s466_s10 = sadd.s32 1, %s3309_s24  ;;  %s3313_s3 = sphi %s3649_s3, %s328_s3   ;;  %s3309_s24 = sphi %s3647_s24, %s5570_s24   ;;  %s3305_s30 = sphi %s3645_s30, %s5569_s30   ;;  %s3301_s27 = sphi %s5565_s27, %s5568_s27   ;;  %s3297_s23 = sphi %s5564_s23, %s5567_s23  }
  0x54   : >> { %336 = vst [vmem:[%s3297_s23] sm:$0xff] %v335_v0  ;;  %338 = vst [vmem:[%s3297_s23 + $0x8] sm:$0xff] %v337_v1  ;;  %v341_v3 = vld [vmem:[%s3301_s27 + $0x18] sm:$0xff]  ;;  %v343_v4 = vld [vmem:[%s3301_s27 + $0x30] sm:$0xff]  ;;  %p3674_p8 = scmp.ge.s32.totalorder %s463_s4, %s3632_s22  ;;  %s328_s3 = sadd.s32 1, %s3313_s3  }
  0x55   : >> { %340 = vst [vmem:[%s3297_s23 + $0x10] sm:$0xff] %v339_v2  ;;  %v345_v5 = vld [vmem:[%s3301_s27 + $0x38] sm:$0xff]  ;;  %342 = vst [vmem:[%s3297_s23 + $0x18] sm:$0xff] %v341_v3  ;;  %v347_v6 = vld [vmem:[%s3301_s27 + $0x40] sm:$0xff]  ;;  %p327_p12 = scmp.ge.s32.totalorder %s328_s3, %s3636_s18 }
  0x56   : >> { %344 = vst [vmem:[%s3297_s23 + $0x20] sm:$0xff] %v343_v4  ;;  %346 = vst [vmem:[%s3297_s23 + $0x28] sm:$0xff] %v345_v5  ;;  %v349_v7 = vld [vmem:[%s3301_s27 + $0x48] sm:$0xff]  ;;  %v351_v8 = vld [vmem:[%s3301_s27 + $0x60] sm:$0xff]  ;;  %s5636_s4 = smov (%p3674_p8, %s463_s4), 0  ;;  %s5638_s10 = smov (!%p3674_p8, %s466_s10), %s3309_s24 }
  0x57   : >> { %348 = vst [vmem:[%s3297_s23 + $0x30] sm:$0xff] %v347_v6  ;;  %350 = vst [vmem:[%s3297_s23 + $0x38] sm:$0xff] %v349_v7  ;;  %v353_v9 = vld [vmem:[%s3301_s27 + $0x68] sm:$0xff]  ;;  %v355_v10 = vld [vmem:[%s3301_s27 + $0x70] sm:$0xff]  ;;  %p468_p10 = scmp.ge.s32.totalorder %s5638_s10, %s3628_s19  ;;  %s2434_s30 = sshll.u32 %s5636_s4, 5 }
  0x58   : >> { %352 = vst [vmem:[%s3297_s23 + $0x40] sm:$0xff] %v351_v8  ;;  %v357_v11 = vld [vmem:[%s3301_s27 + $0x78] sm:$0xff]  ;;  %354 = vst [vmem:[%s3297_s23 + $0x48] sm:$0xff] %v353_v9  ;;  %v359_v12 = vld [vmem:[%s3301_s27 + $0x90] sm:$0xff] }
  0x59   : >> { %356 = vst [vmem:[%s3297_s23 + $0x50] sm:$0xff] %v355_v10  ;;  %358 = vst [vmem:[%s3297_s23 + $0x58] sm:$0xff] %v357_v11  ;;  %v361_v13 = vld [vmem:[%s3301_s27 + $0x98] sm:$0xff]  ;;  %v363_v14 = vld [vmem:[%s3301_s27 + $0xa0] sm:$0xff]  ;;  %s5640_s10 = smov (%p468_p10, %s5638_s10), 0 }
  0x5a   : >> { %360 = vst [vmem:[%s3297_s23 + $0x60] sm:$0xff] %v359_v12  ;;  %362 = vst [vmem:[%s3297_s23 + $0x68] sm:$0xff] %v361_v13  ;;  %v365_v15 = vld [vmem:[%s3301_s27 + $0xa8] sm:$0xff]  ;;  %v367_v16 = vld [vmem:[%s3301_s27 + $0xc0] sm:$0xff]  ;;  %s470_s24 = smul.u32 768, %s5640_s10  ;;  %s2435_s21 = sshll.u32 %s5640_s10, 9 }
  0x5b   : >> { %364 = vst [vmem:[%s3297_s23 + $0x70] sm:$0xff] %v363_v14  ;;  %v369_v17 = vld [vmem:[%s3301_s27 + $0xc8] sm:$0xff]  ;;  %366 = vst [vmem:[%s3297_s23 + $0x78] sm:$0xff] %v365_v15  ;;  %v371_v18 = vld [vmem:[%s3301_s27 + $0xd0] sm:$0xff]  ;;  %s3756_s0 = sadd.s32 %s2435_s21, %s2434_s30 }
  0x5c   : >> { %368 = vst [vmem:[%s3297_s23 + $0x80] sm:$0xff] %v367_v16  ;;  %370 = vst [vmem:[%s3297_s23 + $0x88] sm:$0xff] %v369_v17  ;;  %v373_v19 = vld [vmem:[%s3301_s27 + $0xd8] sm:$0xff]  ;;  %v375_v20 = vld [vmem:[%s3301_s27 + $0xf0] sm:$0xff]  ;;  %s3766_s16 = sadd.s32 %s2434_s30, %s470_s24  ;;  %s477_s21 = scalar_lea.vmem %s3618_s15, %s3756_s0 [#allocation2]  }
  0x5d   : >> { %372 = vst [vmem:[%s3297_s23 + $0x90] sm:$0xff] %v371_v18  ;;  %374 = vst [vmem:[%s3297_s23 + $0x98] sm:$0xff] %v373_v19  ;;  %v377_v21 = vld [vmem:[%s3301_s27 + $0xf8] sm:$0xff]  ;;  %v379_v22 = vld [vmem:[%s3301_s27 + $0x100] sm:$0xff]  ;;  %s476_s14 = scalar_lea.vmem %s3616_s25, %s3766_s16   ;;  %s5569_s30 = smov %s5636_s4 }
  0x5e   : >> { %376 = vst [vmem:[%s3297_s23 + $0xa0] sm:$0xff] %v375_v20  ;;  %v381_v23 = vld [vmem:[%s3301_s27 + $0x108] sm:$0xff]  ;;  %378 = vst [vmem:[%s3297_s23 + $0xa8] sm:$0xff] %v377_v21  ;;  %v383_v24 = vld [vmem:[%s3301_s27 + $0x120] sm:$0xff]  ;;  %s5570_s24 = smov %s5640_s10 }
  0x5f   : >> { %380 = vst [vmem:[%s3297_s23 + $0xb0] sm:$0xff] %v379_v22  ;;  %382 = vst [vmem:[%s3297_s23 + $0xb8] sm:$0xff] %v381_v23  ;;  %v385_v25 = vld [vmem:[%s3301_s27 + $0x128] sm:$0xff]  ;;  %v387_v26 = vld [vmem:[%s3301_s27 + $0x130] sm:$0xff] }
  0x60   : >> { %384 = vst [vmem:[%s3297_s23 + $0xc0] sm:$0xff] %v383_v24  ;;  %386 = vst [vmem:[%s3297_s23 + $0xc8] sm:$0xff] %v385_v25  ;;  %v389_v27 = vld [vmem:[%s3301_s27 + $0x138] sm:$0xff]  ;;  %v391_v28 = vld [vmem:[%s3301_s27 + $0x150] sm:$0xff] }
  0x61   : >> { %388 = vst [vmem:[%s3297_s23 + $0xd0] sm:$0xff] %v387_v26  ;;  %v393_v29 = vld [vmem:[%s3301_s27 + $0x158] sm:$0xff]  ;;  %390 = vst [vmem:[%s3297_s23 + $0xd8] sm:$0xff] %v389_v27  ;;  %v395_v30 = vld [vmem:[%s3301_s27 + $0x160] sm:$0xff] }
  0x62   : >> { %392 = vst [vmem:[%s3297_s23 + $0xe0] sm:$0xff] %v391_v28  ;;  %394 = vst [vmem:[%s3297_s23 + $0xe8] sm:$0xff] %v393_v29  ;;  %v397_v31 = vld [vmem:[%s3301_s27 + $0x168] sm:$0xff]  ;;  %v399_v32 = vld [vmem:[%s3301_s27 + $0x180] sm:$0xff] }
  0x63   : >> { %396 = vst [vmem:[%s3297_s23 + $0xf0] sm:$0xff] %v395_v30  ;;  %398 = vst [vmem:[%s3297_s23 + $0xf8] sm:$0xff] %v397_v31  ;;  %v401_v33 = vld [vmem:[%s3301_s27 + $0x188] sm:$0xff]  ;;  %v403_v34 = vld [vmem:[%s3301_s27 + $0x190] sm:$0xff] }
  0x64   : >> { %400 = vst [vmem:[%s3297_s23 + $0x100] sm:$0xff] %v399_v32  ;;  %v405_v35 = vld [vmem:[%s3301_s27 + $0x198] sm:$0xff]  ;;  %402 = vst [vmem:[%s3297_s23 + $0x108] sm:$0xff] %v401_v33  ;;  %v407_v36 = vld [vmem:[%s3301_s27 + $0x1b0] sm:$0xff] }
  0x65   : >> { %404 = vst [vmem:[%s3297_s23 + $0x110] sm:$0xff] %v403_v34  ;;  %406 = vst [vmem:[%s3297_s23 + $0x118] sm:$0xff] %v405_v35  ;;  %v409_v37 = vld [vmem:[%s3301_s27 + $0x1b8] sm:$0xff]  ;;  %v411_v38 = vld [vmem:[%s3301_s27 + $0x1c0] sm:$0xff] }
  0x66   : >> { %408 = vst [vmem:[%s3297_s23 + $0x120] sm:$0xff] %v407_v36  ;;  %410 = vst [vmem:[%s3297_s23 + $0x128] sm:$0xff] %v409_v37  ;;  %v413_v39 = vld [vmem:[%s3301_s27 + $0x1c8] sm:$0xff]  ;;  %v415_v40 = vld [vmem:[%s3301_s27 + $0x1e0] sm:$0xff] }
  0x67   : >> { %412 = vst [vmem:[%s3297_s23 + $0x130] sm:$0xff] %v411_v38  ;;  %v417_v41 = vld [vmem:[%s3301_s27 + $0x1e8] sm:$0xff]  ;;  %414 = vst [vmem:[%s3297_s23 + $0x138] sm:$0xff] %v413_v39  ;;  %v419_v42 = vld [vmem:[%s3301_s27 + $0x1f0] sm:$0xff] }
  0x68   : >> { %416 = vst [vmem:[%s3297_s23 + $0x140] sm:$0xff] %v415_v40  ;;  %418 = vst [vmem:[%s3297_s23 + $0x148] sm:$0xff] %v417_v41  ;;  %v421_v43 = vld [vmem:[%s3301_s27 + $0x1f8] sm:$0xff]  ;;  %v423_v44 = vld [vmem:[%s3301_s27 + $0x210] sm:$0xff] }
  0x69   : >> { %420 = vst [vmem:[%s3297_s23 + $0x150] sm:$0xff] %v419_v42  ;;  %422 = vst [vmem:[%s3297_s23 + $0x158] sm:$0xff] %v421_v43  ;;  %v425_v45 = vld [vmem:[%s3301_s27 + $0x218] sm:$0xff]  ;;  %v427_v46 = vld [vmem:[%s3301_s27 + $0x220] sm:$0xff] }
  0x6a   : >> { %424 = vst [vmem:[%s3297_s23 + $0x160] sm:$0xff] %v423_v44  ;;  %v429_v47 = vld [vmem:[%s3301_s27 + $0x228] sm:$0xff]  ;;  %426 = vst [vmem:[%s3297_s23 + $0x168] sm:$0xff] %v425_v45  ;;  %v431_v48 = vld [vmem:[%s3301_s27 + $0x240] sm:$0xff] }
  0x6b   : >> { %428 = vst [vmem:[%s3297_s23 + $0x170] sm:$0xff] %v427_v46  ;;  %430 = vst [vmem:[%s3297_s23 + $0x178] sm:$0xff] %v429_v47  ;;  %v433_v49 = vld [vmem:[%s3301_s27 + $0x248] sm:$0xff]  ;;  %v435_v50 = vld [vmem:[%s3301_s27 + $0x250] sm:$0xff] }
  0x6c   : >> { %432 = vst [vmem:[%s3297_s23 + $0x180] sm:$0xff] %v431_v48  ;;  %434 = vst [vmem:[%s3297_s23 + $0x188] sm:$0xff] %v433_v49  ;;  %v437_v51 = vld [vmem:[%s3301_s27 + $0x258] sm:$0xff]  ;;  %v439_v52 = vld [vmem:[%s3301_s27 + $0x270] sm:$0xff] }
  0x6d   : >> { %436 = vst [vmem:[%s3297_s23 + $0x190] sm:$0xff] %v435_v50  ;;  %v441_v53 = vld [vmem:[%s3301_s27 + $0x278] sm:$0xff]  ;;  %438 = vst [vmem:[%s3297_s23 + $0x198] sm:$0xff] %v437_v51  ;;  %v443_v54 = vld [vmem:[%s3301_s27 + $0x280] sm:$0xff]  ;;  %330 = sbr.rel (!%p327_p12) target bundleno = 83 (0x53), region = 188 }
  0x6e   : >> { %440 = vst [vmem:[%s3297_s23 + $0x1a0] sm:$0xff] %v439_v52  ;;  %442 = vst [vmem:[%s3297_s23 + $0x1a8] sm:$0xff] %v441_v53  ;;  %v445_v55 = vld [vmem:[%s3301_s27 + $0x288] sm:$0xff]  ;;  %v447_v56 = vld [vmem:[%s3301_s27 + $0x2a0] sm:$0xff] }
  0x6f   : >> { %444 = vst [vmem:[%s3297_s23 + $0x1b0] sm:$0xff] %v443_v54  ;;  %446 = vst [vmem:[%s3297_s23 + $0x1b8] sm:$0xff] %v445_v55  ;;  %v449_v57 = vld [vmem:[%s3301_s27 + $0x2a8] sm:$0xff]  ;;  %v451_v58 = vld [vmem:[%s3301_s27 + $0x2b0] sm:$0xff] }
  0x70   : >> { %448 = vst [vmem:[%s3297_s23 + $0x1c0] sm:$0xff] %v447_v56  ;;  %v453_v59 = vld [vmem:[%s3301_s27 + $0x2b8] sm:$0xff]  ;;  %450 = vst [vmem:[%s3297_s23 + $0x1c8] sm:$0xff] %v449_v57  ;;  %v455_v60 = vld [vmem:[%s3301_s27 + $0x2d0] sm:$0xff] }
  0x71   : >> { %452 = vst [vmem:[%s3297_s23 + $0x1d0] sm:$0xff] %v451_v58  ;;  %454 = vst [vmem:[%s3297_s23 + $0x1d8] sm:$0xff] %v453_v59  ;;  %v457_v61 = vld [vmem:[%s3301_s27 + $0x2d8] sm:$0xff]  ;;  %v459_v62 = vld [vmem:[%s3301_s27 + $0x2e0] sm:$0xff] }
  0x72   : >> { %456 = vst [vmem:[%s3297_s23 + $0x1e0] sm:$0xff] %v455_v60  ;;  %458 = vst [vmem:[%s3297_s23 + $0x1e8] sm:$0xff] %v457_v61  ;;  %v461_v63 = vld [vmem:[%s3301_s27 + $0x2e8] sm:$0xff]  ;;  %s5568_s27 = smov %s476_s14 }
  0x73   : >> { %460 = vst [vmem:[%s3297_s23 + $0x1f0] sm:$0xff] %v459_v62  ;;  %462 = vst [vmem:[%s3297_s23 + $0x1f8] sm:$0xff] %v461_v63  ;;  %s5567_s23 = smov %s477_s21 }
  0x74 PF: > { %s480_s0 = sand.u32 15, %s5632_s2   ;;  %s2438_s21 = smul.u32 768, %s3628_s19 }
  0x75   : > { %s2497_s16 = sshll.u32 %s3628_s19, 9  ;;  %s3851_s14 = smul.u32 %s480_s0, %s3632_s22 }
  0x76   : > { %s3854_s4 = scalar_lea.vmem %s3616_s25, %s2438_s21   ;;  %s3857_s10 = scalar_lea.vmem %s3618_s15, %s2497_s16 [#allocation2]  }
  0x77   : > { %p2440_p13 = scmp.le.s32.totalorder %s3851_s14, 0 }
  0x78   : > { %s5571_s18 = smov (!%p2440_p13), %s3857_s10  ;;  %s5572_s23 = smov (!%p2440_p13), %s3854_s4 }
  0x79   : > { %2246 = sbr.rel (%p2440_p13) target bundleno = 140 (0x8c), region = 193  ;;  %s3866_s27 = smov (!%p2440_p13), 0  }
  0x7a   : > { %s3868_s3 = smov (!%p2440_p13), 0   ;;  %s3870_s19 = smov (!%p2440_p13), 0  }
  0x80 LB: >> { %v499_v0 = vld [vmem:[%s3321_s23] sm:$0xff]  ;;  %v501_v1 = vld [vmem:[%s3321_s23 + $0x8] sm:$0xff]  ;;  %v503_v2 = vld [vmem:[%s3321_s23 + $0x10] sm:$0xff]  ;;  %s507_s30 = sadd.s32 1, %s3325_s27  ;;  %s510_s24 = sadd.s32 1, %s3329_s3  ;;  %s3333_s19 = sphi %s3870_s19, %s492_s19   ;;  %s3329_s3 = sphi %s3868_s3, %s5574_s3   ;;  %s3325_s27 = sphi %s3866_s27, %s5573_s27   ;;  %s3321_s23 = sphi %s5572_s23, %s520_s23   ;;  %s3317_s18 = sphi %s5571_s18, %s521_s18  }
  0x81   : >> { %500 = vst [vmem:[%s3317_s18] sm:$0xff] %v499_v0  ;;  %502 = vst [vmem:[%s3317_s18 + $0x8] sm:$0xff] %v501_v1  ;;  %v505_v3 = vld [vmem:[%s3321_s23 + $0x18] sm:$0xff]  ;;  %p508_p0 = scmp.ge.s32.totalorder %s507_s30, %s3632_s22  ;;  %s492_s19 = sadd.s32 1, %s3333_s19  }
  0x82   : >> { %504 = vst [vmem:[%s3317_s18 + $0x10] sm:$0xff] %v503_v2  ;;  %506 = vst [vmem:[%s3317_s18 + $0x18] sm:$0xff] %v505_v3  ;;  %p491_p2 = scmp.ge.s32.totalorder %s492_s19, %s3851_s14 }
  0x83   : >> { %s5642_s30 = smov (%p508_p0, %s507_s30), 0  ;;  %s5644_s24 = smov (!%p508_p0, %s510_s24), %s3329_s3 }
  0x84   : >> { %p512_p1 = scmp.ge.s32.totalorder %s5644_s24, %s480_s0  ;;  %s2441_s21 = sshll.u32 %s5642_s30, 5 }
  0x85   : >> { %s5573_s27 = smov %s5642_s30  ;;  %494 = sbr.rel (!%p491_p2) target bundleno = 128 (0x80), region = 199 }
  0x86   : >> { %s5646_s24 = smov (%p512_p1, %s5644_s24), 0 }
  0x87   : >> { %s514_s16 = smul.u32 48, %s5646_s24  ;;  %s2442_s20 = sshll.u32 %s5646_s24, 5 }
  0x88   : >> { %s519_s8 = sadd.s32 %s2442_s20, %s2441_s21  ;;  %s5574_s3 = smov %s5646_s24 }
  0x89   : >> { %s516_s28 = sadd.s32 %s2441_s21, %s514_s16  ;;  %s521_s18 = scalar_lea.vmem %s3857_s10, %s519_s8 [#allocation2]  }
  0x8a   : >> { %s520_s23 = scalar_lea.vmem %s3854_s4, %s516_s28  }
  0x8c PF: > { %s5575_s20 = sshrl.u32 %s3610_s5, 3  ;;  %s2498_s28 = sshll.u32 %s3632_s22, 9 }
  0x8d   : > { %s3898_s8 = sand.u32 3, %s5575_s20   ;;  %s526_s21 = sshra.s32 %s2498_s28, 4 }
  0x8e   : > { %s3903_s16 = smul.u32 %s3898_s8, %s5632_s2  ;;  %s3906_s30 = scalar_lea.vmem %s3616_s25, %s526_s21  }
  0x8f   : > { %s3909_s24 = scalar_lea.vmem %s3618_s15, %s526_s21 [#allocation2]  }
  0x90   : > { %p2447_p3 = scmp.le.s32.totalorder %s3903_s16, 0 }
  0x91   : > { %s5576_s0 = smov (!%p2447_p3), %s3909_s24  ;;  %s5577_s14 = smov (!%p2447_p3), %s3906_s30 }
  0x92   : > { %2263 = sbr.rel (%p2447_p3) target bundleno = 165 (0xa5), region = 204  ;;  %s3918_s4 = smov (!%p2447_p3), 0  }
  0x93   : > { %s3920_s10 = smov (!%p2447_p3), 0   ;;  %s3922_s22 = smov (!%p2447_p3), 0  }
  0x99 LB: >> { %v544_v4 = vld [vmem:[%s3341_s14] sm:$0xff]  ;;  %s546_s18 = sadd.s32 1, %s3345_s4  ;;  %s549_s23 = sadd.s32 1, %s3349_s10  ;;  %s3353_s22 = sphi %s3922_s22, %s537_s22   ;;  %s3349_s10 = sphi %s3920_s10, %s5579_s10   ;;  %s3345_s4 = sphi %s3918_s4, %s5578_s4   ;;  %s3341_s14 = sphi %s5577_s14, %s559_s14   ;;  %s3337_s0 = sphi %s5576_s0, %s560_s0  }
  0x9a   : >> { %545 = vst [vmem:[%s3337_s0] sm:$0xff] %v544_v4  ;;  %p547_p4 = scmp.ge.s32.totalorder %s546_s18, %s3898_s8  ;;  %s537_s22 = sadd.s32 1, %s3353_s22  }
  0x9b   : >> { %p536_p7 = scmp.ge.s32.totalorder %s537_s22, %s3903_s16 }
  0x9c   : >> { %s5648_s18 = smov (%p547_p4, %s546_s18), 0  ;;  %s5650_s23 = smov (!%p547_p4, %s549_s23), %s3349_s10 }
  0x9d   : >> { %p551_p6 = scmp.ge.s32.totalorder %s5650_s23, %s5632_s2  ;;  %s2448_s27 = sshll.u32 %s5648_s18, 3 }
  0x9e   : >> { %s5578_s4 = smov %s5648_s18  ;;  %539 = sbr.rel (!%p536_p7) target bundleno = 153 (0x99), region = 210 }
  0x9f   : >> { %s5652_s23 = smov (%p551_p6, %s5650_s23), 0 }
  0xa0   : >> { %s553_s3 = smul.u32 48, %s5652_s23  ;;  %s2449_s19 = sshll.u32 %s5652_s23, 5 }
  0xa1   : >> { %s558_s20 = sadd.s32 %s2449_s19, %s2448_s27  ;;  %s5579_s10 = smov %s5652_s23 }
  0xa2   : >> { %s555_s28 = sadd.s32 %s2448_s27, %s553_s3  ;;  %s560_s0 = scalar_lea.vmem %s3909_s24, %s558_s20 [#allocation2]  }
  0xa3   : >> { %s559_s14 = scalar_lea.vmem %s3906_s30, %s555_s28  }
  0xa5 PF: > { %563 = sbr.rel (%p315_p5) target bundleno = 356 (0x164), region = 75  ;;  %s565_s21 = ssub.s32 (!%p315_p5), %s3610_s5, %s3622_s29 }
  0xa6   : > { %s5543_s27 = sshrl.u32 (!%p315_p5), %s3610_s5, 3  ;;  %s3950_s18 = scalar_lea.vmem (!%p315_p5), %s3616_s25, %s565_s21  }
  0xa7   : > { %s3953_s23 = scalar_lea.vmem (!%p315_p5), %s3618_s15, %s565_s21 [#allocation2]   ;;  %s3956_s22 = sshrl.u32 (!%p315_p5), %s5632_s2, 4 }
  0xa8   : > { %s3960_s8 = sshrl.u32 (!%p315_p5), %s5543_s27, 2 }
  0xa9   : > { %s3964_s16 = smul.u32 (!%p315_p5), %s3960_s8, %s3956_s22 }
  0xab   : > { %p2451_p5 = scmp.le.s32.totalorder (!%p315_p5), %s3964_s16, 0 }
  0xac   : > { %s5580_s30 = smov (!%p2451_p5), %s3618_s15  ;;  %s5581_s24 = smov (!%p2451_p5), %s3616_s25 }
  0xad   : > { %2280 = sbr.rel (%p2451_p5) target bundleno = 213 (0xd5), region = 215  ;;  %s3973_s0 = smov (!%p2451_p5), 0  }
  0xae   : > { %s3975_s14 = smov (!%p2451_p5), 0   ;;  %s3977_s4 = smov (!%p2451_p5), 0  }
  0xb4 LB: >> { %v585_v5 = vld [vmem:[%s3361_s24] sm:$0xff]  ;;  %v587_v6 = vld [vmem:[%s3361_s24 + $0x8] sm:$0xff]  ;;  %v589_v7 = vld [vmem:[%s3361_s24 + $0x10] sm:$0xff]  ;;  %s713_s10 = sadd.s32 1, %s3365_s0  ;;  %s716_s19 = sadd.s32 1, %s3369_s14  ;;  %s3373_s4 = sphi %s3977_s4, %s578_s4   ;;  %s3369_s14 = sphi %s3975_s14, %s5586_s14   ;;  %s3365_s0 = sphi %s3973_s0, %s5585_s0   ;;  %s3361_s24 = sphi %s5581_s24, %s5584_s24   ;;  %s3357_s30 = sphi %s5580_s30, %s5583_s30  }
  0xb5   : >> { %586 = vst [vmem:[%s3357_s30] sm:$0xff] %v585_v5  ;;  %588 = vst [vmem:[%s3357_s30 + $0x8] sm:$0xff] %v587_v6  ;;  %v591_v8 = vld [vmem:[%s3361_s24 + $0x18] sm:$0xff]  ;;  %v593_v9 = vld [vmem:[%s3361_s24 + $0x30] sm:$0xff]  ;;  %p4002_p8 = scmp.ge.s32.totalorder %s713_s10, %s3960_s8  ;;  %s578_s4 = sadd.s32 1, %s3373_s4  }
  0xb6   : >> { %590 = vst [vmem:[%s3357_s30 + $0x10] sm:$0xff] %v589_v7  ;;  %v595_v10 = vld [vmem:[%s3361_s24 + $0x38] sm:$0xff]  ;;  %592 = vst [vmem:[%s3357_s30 + $0x18] sm:$0xff] %v591_v8  ;;  %v597_v11 = vld [vmem:[%s3361_s24 + $0x40] sm:$0xff]  ;;  %p577_p12 = scmp.ge.s32.totalorder %s578_s4, %s3964_s16 }
  0xb7   : >> { %594 = vst [vmem:[%s3357_s30 + $0x20] sm:$0xff] %v593_v9  ;;  %596 = vst [vmem:[%s3357_s30 + $0x28] sm:$0xff] %v595_v10  ;;  %v599_v12 = vld [vmem:[%s3361_s24 + $0x48] sm:$0xff]  ;;  %v601_v13 = vld [vmem:[%s3361_s24 + $0x60] sm:$0xff]  ;;  %s5654_s10 = smov (%p4002_p8, %s713_s10), 0  ;;  %s5656_s19 = smov (!%p4002_p8, %s716_s19), %s3369_s14 }
  0xb8   : >> { %598 = vst [vmem:[%s3357_s30 + $0x30] sm:$0xff] %v597_v11  ;;  %600 = vst [vmem:[%s3357_s30 + $0x38] sm:$0xff] %v599_v12  ;;  %v603_v14 = vld [vmem:[%s3361_s24 + $0x68] sm:$0xff]  ;;  %v605_v15 = vld [vmem:[%s3361_s24 + $0x70] sm:$0xff]  ;;  %p718_p10 = scmp.ge.s32.totalorder %s5656_s19, %s3956_s22  ;;  %s2452_s20 = sshll.u32 %s5654_s10, 5 }
  0xb9   : >> { %602 = vst [vmem:[%s3357_s30 + $0x40] sm:$0xff] %v601_v13  ;;  %v607_v16 = vld [vmem:[%s3361_s24 + $0x78] sm:$0xff]  ;;  %604 = vst [vmem:[%s3357_s30 + $0x48] sm:$0xff] %v603_v14  ;;  %v609_v17 = vld [vmem:[%s3361_s24 + $0x90] sm:$0xff] }
  0xba   : >> { %606 = vst [vmem:[%s3357_s30 + $0x50] sm:$0xff] %v605_v15  ;;  %608 = vst [vmem:[%s3357_s30 + $0x58] sm:$0xff] %v607_v16  ;;  %v611_v18 = vld [vmem:[%s3361_s24 + $0x98] sm:$0xff]  ;;  %v613_v19 = vld [vmem:[%s3361_s24 + $0xa0] sm:$0xff]  ;;  %s5658_s19 = smov (%p718_p10, %s5656_s19), 0 }
  0xbb   : >> { %610 = vst [vmem:[%s3357_s30 + $0x60] sm:$0xff] %v609_v17  ;;  %612 = vst [vmem:[%s3357_s30 + $0x68] sm:$0xff] %v611_v18  ;;  %v615_v20 = vld [vmem:[%s3361_s24 + $0xa8] sm:$0xff]  ;;  %v617_v21 = vld [vmem:[%s3361_s24 + $0xc0] sm:$0xff]  ;;  %s720_s28 = smul.u32 768, %s5658_s19  ;;  %s2453_s21 = sshll.u32 %s5658_s19, 9 }
  0xbc   : >> { %614 = vst [vmem:[%s3357_s30 + $0x70] sm:$0xff] %v613_v19  ;;  %v619_v22 = vld [vmem:[%s3361_s24 + $0xc8] sm:$0xff]  ;;  %616 = vst [vmem:[%s3357_s30 + $0x78] sm:$0xff] %v615_v20  ;;  %v621_v23 = vld [vmem:[%s3361_s24 + $0xd0] sm:$0xff]  ;;  %s4084_s0 = sadd.s32 %s2453_s21, %s2452_s20 }
  0xbd   : >> { %618 = vst [vmem:[%s3357_s30 + $0x80] sm:$0xff] %v617_v21  ;;  %620 = vst [vmem:[%s3357_s30 + $0x88] sm:$0xff] %v619_v22  ;;  %v623_v24 = vld [vmem:[%s3361_s24 + $0xd8] sm:$0xff]  ;;  %v625_v25 = vld [vmem:[%s3361_s24 + $0xf0] sm:$0xff]  ;;  %s4094_s14 = sadd.s32 %s2452_s20, %s720_s28  ;;  %s727_s3 = scalar_lea.vmem %s3618_s15, %s4084_s0 [#allocation2]  }
  0xbe   : >> { %622 = vst [vmem:[%s3357_s30 + $0x90] sm:$0xff] %v621_v23  ;;  %624 = vst [vmem:[%s3357_s30 + $0x98] sm:$0xff] %v623_v24  ;;  %v627_v26 = vld [vmem:[%s3361_s24 + $0xf8] sm:$0xff]  ;;  %v629_v27 = vld [vmem:[%s3361_s24 + $0x100] sm:$0xff]  ;;  %s726_s21 = scalar_lea.vmem %s3616_s25, %s4094_s14   ;;  %s5585_s0 = smov %s5654_s10 }
  0xbf   : >> { %626 = vst [vmem:[%s3357_s30 + $0xa0] sm:$0xff] %v625_v25  ;;  %v631_v28 = vld [vmem:[%s3361_s24 + $0x108] sm:$0xff]  ;;  %628 = vst [vmem:[%s3357_s30 + $0xa8] sm:$0xff] %v627_v26  ;;  %v633_v29 = vld [vmem:[%s3361_s24 + $0x120] sm:$0xff]  ;;  %s5586_s14 = smov %s5658_s19 }
  0xc0   : >> { %630 = vst [vmem:[%s3357_s30 + $0xb0] sm:$0xff] %v629_v27  ;;  %632 = vst [vmem:[%s3357_s30 + $0xb8] sm:$0xff] %v631_v28  ;;  %v635_v30 = vld [vmem:[%s3361_s24 + $0x128] sm:$0xff]  ;;  %v637_v31 = vld [vmem:[%s3361_s24 + $0x130] sm:$0xff] }
  0xc1   : >> { %634 = vst [vmem:[%s3357_s30 + $0xc0] sm:$0xff] %v633_v29  ;;  %636 = vst [vmem:[%s3357_s30 + $0xc8] sm:$0xff] %v635_v30  ;;  %v639_v32 = vld [vmem:[%s3361_s24 + $0x138] sm:$0xff]  ;;  %v641_v33 = vld [vmem:[%s3361_s24 + $0x150] sm:$0xff] }
  0xc2   : >> { %638 = vst [vmem:[%s3357_s30 + $0xd0] sm:$0xff] %v637_v31  ;;  %v643_v34 = vld [vmem:[%s3361_s24 + $0x158] sm:$0xff]  ;;  %640 = vst [vmem:[%s3357_s30 + $0xd8] sm:$0xff] %v639_v32  ;;  %v645_v35 = vld [vmem:[%s3361_s24 + $0x160] sm:$0xff] }
  0xc3   : >> { %642 = vst [vmem:[%s3357_s30 + $0xe0] sm:$0xff] %v641_v33  ;;  %644 = vst [vmem:[%s3357_s30 + $0xe8] sm:$0xff] %v643_v34  ;;  %v647_v36 = vld [vmem:[%s3361_s24 + $0x168] sm:$0xff]  ;;  %v649_v37 = vld [vmem:[%s3361_s24 + $0x180] sm:$0xff] }
  0xc4   : >> { %646 = vst [vmem:[%s3357_s30 + $0xf0] sm:$0xff] %v645_v35  ;;  %648 = vst [vmem:[%s3357_s30 + $0xf8] sm:$0xff] %v647_v36  ;;  %v651_v38 = vld [vmem:[%s3361_s24 + $0x188] sm:$0xff]  ;;  %v653_v39 = vld [vmem:[%s3361_s24 + $0x190] sm:$0xff] }
  0xc5   : >> { %650 = vst [vmem:[%s3357_s30 + $0x100] sm:$0xff] %v649_v37  ;;  %v655_v40 = vld [vmem:[%s3361_s24 + $0x198] sm:$0xff]  ;;  %652 = vst [vmem:[%s3357_s30 + $0x108] sm:$0xff] %v651_v38  ;;  %v657_v41 = vld [vmem:[%s3361_s24 + $0x1b0] sm:$0xff] }
  0xc6   : >> { %654 = vst [vmem:[%s3357_s30 + $0x110] sm:$0xff] %v653_v39  ;;  %656 = vst [vmem:[%s3357_s30 + $0x118] sm:$0xff] %v655_v40  ;;  %v659_v42 = vld [vmem:[%s3361_s24 + $0x1b8] sm:$0xff]  ;;  %v661_v43 = vld [vmem:[%s3361_s24 + $0x1c0] sm:$0xff] }
  0xc7   : >> { %658 = vst [vmem:[%s3357_s30 + $0x120] sm:$0xff] %v657_v41  ;;  %660 = vst [vmem:[%s3357_s30 + $0x128] sm:$0xff] %v659_v42  ;;  %v663_v44 = vld [vmem:[%s3361_s24 + $0x1c8] sm:$0xff]  ;;  %v665_v45 = vld [vmem:[%s3361_s24 + $0x1e0] sm:$0xff] }
  0xc8   : >> { %662 = vst [vmem:[%s3357_s30 + $0x130] sm:$0xff] %v661_v43  ;;  %v667_v46 = vld [vmem:[%s3361_s24 + $0x1e8] sm:$0xff]  ;;  %664 = vst [vmem:[%s3357_s30 + $0x138] sm:$0xff] %v663_v44  ;;  %v669_v47 = vld [vmem:[%s3361_s24 + $0x1f0] sm:$0xff] }
  0xc9   : >> { %666 = vst [vmem:[%s3357_s30 + $0x140] sm:$0xff] %v665_v45  ;;  %668 = vst [vmem:[%s3357_s30 + $0x148] sm:$0xff] %v667_v46  ;;  %v671_v48 = vld [vmem:[%s3361_s24 + $0x1f8] sm:$0xff]  ;;  %v673_v49 = vld [vmem:[%s3361_s24 + $0x210] sm:$0xff] }
  0xca   : >> { %670 = vst [vmem:[%s3357_s30 + $0x150] sm:$0xff] %v669_v47  ;;  %672 = vst [vmem:[%s3357_s30 + $0x158] sm:$0xff] %v671_v48  ;;  %v675_v50 = vld [vmem:[%s3361_s24 + $0x218] sm:$0xff]  ;;  %v677_v51 = vld [vmem:[%s3361_s24 + $0x220] sm:$0xff] }
  0xcb   : >> { %674 = vst [vmem:[%s3357_s30 + $0x160] sm:$0xff] %v673_v49  ;;  %v679_v52 = vld [vmem:[%s3361_s24 + $0x228] sm:$0xff]  ;;  %676 = vst [vmem:[%s3357_s30 + $0x168] sm:$0xff] %v675_v50  ;;  %v681_v53 = vld [vmem:[%s3361_s24 + $0x240] sm:$0xff] }
  0xcc   : >> { %678 = vst [vmem:[%s3357_s30 + $0x170] sm:$0xff] %v677_v51  ;;  %680 = vst [vmem:[%s3357_s30 + $0x178] sm:$0xff] %v679_v52  ;;  %v683_v54 = vld [vmem:[%s3361_s24 + $0x248] sm:$0xff]  ;;  %v685_v55 = vld [vmem:[%s3361_s24 + $0x250] sm:$0xff] }
  0xcd   : >> { %682 = vst [vmem:[%s3357_s30 + $0x180] sm:$0xff] %v681_v53  ;;  %684 = vst [vmem:[%s3357_s30 + $0x188] sm:$0xff] %v683_v54  ;;  %v687_v56 = vld [vmem:[%s3361_s24 + $0x258] sm:$0xff]  ;;  %v689_v57 = vld [vmem:[%s3361_s24 + $0x270] sm:$0xff] }
  0xce   : >> { %686 = vst [vmem:[%s3357_s30 + $0x190] sm:$0xff] %v685_v55  ;;  %v691_v58 = vld [vmem:[%s3361_s24 + $0x278] sm:$0xff]  ;;  %688 = vst [vmem:[%s3357_s30 + $0x198] sm:$0xff] %v687_v56  ;;  %v693_v59 = vld [vmem:[%s3361_s24 + $0x280] sm:$0xff]  ;;  %580 = sbr.rel (!%p577_p12) target bundleno = 180 (0xb4), region = 221 }
  0xcf   : >> { %690 = vst [vmem:[%s3357_s30 + $0x1a0] sm:$0xff] %v689_v57  ;;  %692 = vst [vmem:[%s3357_s30 + $0x1a8] sm:$0xff] %v691_v58  ;;  %v695_v60 = vld [vmem:[%s3361_s24 + $0x288] sm:$0xff]  ;;  %v697_v61 = vld [vmem:[%s3361_s24 + $0x2a0] sm:$0xff] }
  0xd0   : >> { %694 = vst [vmem:[%s3357_s30 + $0x1b0] sm:$0xff] %v693_v59  ;;  %696 = vst [vmem:[%s3357_s30 + $0x1b8] sm:$0xff] %v695_v60  ;;  %v699_v62 = vld [vmem:[%s3361_s24 + $0x2a8] sm:$0xff]  ;;  %v701_v63 = vld [vmem:[%s3361_s24 + $0x2b0] sm:$0xff] }
  0xd1   : >> { %698 = vst [vmem:[%s3357_s30 + $0x1c0] sm:$0xff] %v697_v61  ;;  %v703_v0 = vld [vmem:[%s3361_s24 + $0x2b8] sm:$0xff]  ;;  %700 = vst [vmem:[%s3357_s30 + $0x1c8] sm:$0xff] %v699_v62  ;;  %v705_v1 = vld [vmem:[%s3361_s24 + $0x2d0] sm:$0xff] }
  0xd2   : >> { %702 = vst [vmem:[%s3357_s30 + $0x1d0] sm:$0xff] %v701_v63  ;;  %704 = vst [vmem:[%s3357_s30 + $0x1d8] sm:$0xff] %v703_v0  ;;  %v707_v2 = vld [vmem:[%s3361_s24 + $0x2d8] sm:$0xff]  ;;  %v709_v3 = vld [vmem:[%s3361_s24 + $0x2e0] sm:$0xff] }
  0xd3   : >> { %706 = vst [vmem:[%s3357_s30 + $0x1e0] sm:$0xff] %v705_v1  ;;  %708 = vst [vmem:[%s3357_s30 + $0x1e8] sm:$0xff] %v707_v2  ;;  %v711_v4 = vld [vmem:[%s3361_s24 + $0x2e8] sm:$0xff]  ;;  %s5584_s24 = smov %s726_s21 }
  0xd4   : >> { %710 = vst [vmem:[%s3357_s30 + $0x1f0] sm:$0xff] %v709_v3  ;;  %712 = vst [vmem:[%s3357_s30 + $0x1f8] sm:$0xff] %v711_v4  ;;  %s5583_s30 = smov %s727_s3 }
  0xd5 PF: > { %s730_s20 = sand.u32 15, %s5632_s2   ;;  %s2456_s28 = smul.u32 768, %s3956_s22 }
  0xd6   : > { %s2500_s3 = sshll.u32 %s3956_s22, 9  ;;  %s4179_s21 = smul.u32 %s730_s20, %s3960_s8 }
  0xd7   : > { %s4182_s10 = scalar_lea.vmem %s3616_s25, %s2456_s28   ;;  %s4185_s19 = scalar_lea.vmem %s3618_s15, %s2500_s3 [#allocation2]  }
  0xd8   : > { %p2458_p13 = scmp.le.s32.totalorder %s4179_s21, 0 }
  0xd9   : > { %s5587_s16 = smov (!%p2458_p13), %s4185_s19  ;;  %s5588_s30 = smov (!%p2458_p13), %s4182_s10 }
  0xda   : > { %2297 = sbr.rel (%p2458_p13) target bundleno = 237 (0xed), region = 226  ;;  %s4194_s24 = smov (!%p2458_p13), 0  }
  0xdb   : > { %s4196_s4 = smov (!%p2458_p13), 0   ;;  %s4198_s22 = smov (!%p2458_p13), 0  }
  0xe1 LB: >> { %v749_v5 = vld [vmem:[%s3381_s30] sm:$0xff]  ;;  %v751_v6 = vld [vmem:[%s3381_s30 + $0x8] sm:$0xff]  ;;  %v753_v7 = vld [vmem:[%s3381_s30 + $0x10] sm:$0xff]  ;;  %s757_s0 = sadd.s32 1, %s3385_s24  ;;  %s760_s14 = sadd.s32 1, %s3389_s4  ;;  %s3393_s22 = sphi %s4198_s22, %s742_s22   ;;  %s3389_s4 = sphi %s4196_s4, %s5590_s4   ;;  %s3385_s24 = sphi %s4194_s24, %s5589_s24   ;;  %s3381_s30 = sphi %s5588_s30, %s770_s30   ;;  %s3377_s16 = sphi %s5587_s16, %s771_s16  }
  0xe2   : >> { %750 = vst [vmem:[%s3377_s16] sm:$0xff] %v749_v5  ;;  %752 = vst [vmem:[%s3377_s16 + $0x8] sm:$0xff] %v751_v6  ;;  %v755_v8 = vld [vmem:[%s3381_s30 + $0x18] sm:$0xff]  ;;  %p758_p0 = scmp.ge.s32.totalorder %s757_s0, %s3960_s8  ;;  %s742_s22 = sadd.s32 1, %s3393_s22  }
  0xe3   : >> { %754 = vst [vmem:[%s3377_s16 + $0x10] sm:$0xff] %v753_v7  ;;  %756 = vst [vmem:[%s3377_s16 + $0x18] sm:$0xff] %v755_v8  ;;  %p741_p2 = scmp.ge.s32.totalorder %s742_s22, %s4179_s21 }
  0xe4   : >> { %s5660_s0 = smov (%p758_p0, %s757_s0), 0  ;;  %s5662_s14 = smov (!%p758_p0, %s760_s14), %s3389_s4 }
  0xe5   : >> { %p762_p1 = scmp.ge.s32.totalorder %s5662_s14, %s730_s20  ;;  %s2459_s28 = sshll.u32 %s5660_s0, 5 }
  0xe6   : >> { %s5589_s24 = smov %s5660_s0  ;;  %744 = sbr.rel (!%p741_p2) target bundleno = 225 (0xe1), region = 232 }
  0xe7   : >> { %s5664_s14 = smov (%p762_p1, %s5662_s14), 0 }
  0xe8   : >> { %s764_s3 = smul.u32 48, %s5664_s14  ;;  %s2460_s27 = sshll.u32 %s5664_s14, 5 }
  0xe9   : >> { %s769_s6 = sadd.s32 %s2460_s27, %s2459_s28  ;;  %s5590_s4 = smov %s5664_s14 }
  0xea   : >> { %s766_s1 = sadd.s32 %s2459_s28, %s764_s3  ;;  %s771_s16 = scalar_lea.vmem %s4185_s19, %s769_s6 [#allocation2]  }
  0xeb   : >> { %s770_s30 = scalar_lea.vmem %s4182_s10, %s766_s1  }
  0xed PF: > { %s5591_s27 = sshrl.u32 %s3610_s5, 3  ;;  %s2501_s6 = sshll.u32 %s3960_s8, 9 }
  0xee   : > { %s4226_s1 = sand.u32 3, %s5591_s27   ;;  %s776_s28 = sshra.s32 %s2501_s6, 4 }
  0xef   : > { %s4231_s3 = smul.u32 %s4226_s1, %s5632_s2  ;;  %s4234_s0 = scalar_lea.vmem %s3616_s25, %s776_s28  }
  0xf0   : > { %s4237_s14 = scalar_lea.vmem %s3618_s15, %s776_s28 [#allocation2]  }
  0xf1   : > { %p2465_p3 = scmp.le.s32.totalorder %s4231_s3, 0 }
  0xf2   : > { %s5592_s20 = smov (!%p2465_p3), %s4237_s14  ;;  %s5593_s21 = smov (!%p2465_p3), %s4234_s0 }
  0xf3   : > { %2314 = sbr.rel (%p2465_p3) target bundleno = 262 (0x106), region = 237  ;;  %s4246_s10 = smov (!%p2465_p3), 0  }
  0xf4   : > { %s4248_s19 = smov (!%p2465_p3), 0   ;;  %s4250_s8 = smov (!%p2465_p3), 0  }
  0xfa LB: >> { %v794_v9 = vld [vmem:[%s3401_s21] sm:$0xff]  ;;  %s796_s16 = sadd.s32 1, %s3405_s10  ;;  %s799_s30 = sadd.s32 1, %s3409_s19  ;;  %s3413_s8 = sphi %s4250_s8, %s787_s8   ;;  %s3409_s19 = sphi %s4248_s19, %s5595_s19   ;;  %s3405_s10 = sphi %s4246_s10, %s5594_s10   ;;  %s3401_s21 = sphi %s5593_s21, %s809_s21   ;;  %s3397_s20 = sphi %s5592_s20, %s810_s20  }
  0xfb   : >> { %795 = vst [vmem:[%s3397_s20] sm:$0xff] %v794_v9  ;;  %p797_p4 = scmp.ge.s32.totalorder %s796_s16, %s4226_s1  ;;  %s787_s8 = sadd.s32 1, %s3413_s8  }
  0xfc   : >> { %p786_p7 = scmp.ge.s32.totalorder %s787_s8, %s4231_s3 }
  0xfd   : >> { %s5666_s16 = smov (%p797_p4, %s796_s16), 0  ;;  %s5668_s30 = smov (!%p797_p4, %s799_s30), %s3409_s19 }
  0xfe   : >> { %p801_p6 = scmp.ge.s32.totalorder %s5668_s30, %s5632_s2  ;;  %s2466_s24 = sshll.u32 %s5666_s16, 3 }
  0xff   : >> { %s5594_s10 = smov %s5666_s16  ;;  %789 = sbr.rel (!%p786_p7) target bundleno = 250 (0xfa), region = 243 }
 0x100   : >> { %s5670_s30 = smov (%p801_p6, %s5668_s30), 0 }
 0x101   : >> { %s803_s4 = smul.u32 48, %s5670_s30  ;;  %s2467_s22 = sshll.u32 %s5670_s30, 5 }
 0x102   : >> { %s808_s27 = sadd.s32 %s2467_s22, %s2466_s24  ;;  %s5595_s19 = smov %s5670_s30 }
 0x103   : >> { %s805_s6 = sadd.s32 %s2466_s24, %s803_s4  ;;  %s810_s20 = scalar_lea.vmem %s4237_s14, %s808_s27 [#allocation2]  }
 0x104   : >> { %s809_s21 = scalar_lea.vmem %s4234_s0, %s805_s6  }
 0x106 PF: > { %s4273_s28 = sshrl.u32 %s5632_s2, 6  ;;  %s3479_s24 = smov 0  }
 0x107   : > { %s4276_s4 = sshllo.u32 %s3479_s24, %s3622_s29  ;;  %p2469_p5 = scmp.le.s32.totalorder %s4273_s28, 0 }
 0x108   : > { %s5596_s16 = smov (!%p2469_p5), %s3953_s23  ;;  %s5597_s30 = smov (!%p2469_p5), %s3950_s18 }
 0x109   : > { %2330 = sbr.rel (%p2469_p5) target bundleno = 336 (0x150), region = 248  ;;  %s4285_s22 = smov (!%p2469_p5), 0  }
 0x10a   : > { %s4287_s8 = smov (!%p2469_p5), 0  }
 0x110 LB: >> { %v822_v10 = vld [vmem:[%s3421_s30] sm:%s4276_s4]  ;;  %v824_v11 = vld [vmem:[%s3421_s30 + $0x30] sm:%s4276_s4]  ;;  %s950_s29 = sadd.s32 1, %s3425_s22  ;;  %s816_s8 = sadd.s32 1, %s3429_s8   ;;  %s3429_s8 = sphi %s4287_s8, %s816_s8   ;;  %s3425_s22 = sphi %s4285_s22, %s5600_s22   ;;  %s3421_s30 = sphi %s5597_s30, %s5599_s30   ;;  %s3417_s16 = sphi %s5596_s16, %s5598_s16  }
 0x111   : >> { %823 = vst [vmem:[%s3417_s16] sm:%s4276_s4] %v822_v10  ;;  %825 = vst [vmem:[%s3417_s16 + $0x20] sm:%s4276_s4] %v824_v11  ;;  %p951_p8 = scmp.ge.s32.totalorder %s950_s29, %s4273_s28  ;;  %p815_p10 = scmp.ge.s32.totalorder %s816_s8, %s4273_s28 }
 0x112   : >> { %v826_v12 = vld [vmem:[%s3421_s30 + $0x60] sm:%s4276_s4]  ;;  %v828_v13 = vld [vmem:[%s3421_s30 + $0x90] sm:%s4276_s4] }
 0x113   : >> { %827 = vst [vmem:[%s3417_s16 + $0x40] sm:%s4276_s4] %v826_v12  ;;  %829 = vst [vmem:[%s3417_s16 + $0x60] sm:%s4276_s4] %v828_v13  ;;  %s5672_s29 = smov (%p951_p8, %s950_s29), 0 }
 0x114   : >> { %v830_v14 = vld [vmem:[%s3421_s30 + $0xc0] sm:%s4276_s4]  ;;  %v832_v15 = vld [vmem:[%s3421_s30 + $0xf0] sm:%s4276_s4]  ;;  %s953_s1 = smul.u32 3072, %s5672_s29  ;;  %s2470_s3 = sshll.u32 %s5672_s29, 11 }
 0x115   : >> { %831 = vst [vmem:[%s3417_s16 + $0x80] sm:%s4276_s4] %v830_v14  ;;  %833 = vst [vmem:[%s3417_s16 + $0xa0] sm:%s4276_s4] %v832_v15  ;;  %s4357_s0 = scalar_lea.vmem %s3953_s23, %s2470_s3 [#allocation2]   ;;  %s5600_s22 = smov %s5672_s29 }
 0x116   : >> { %v834_v16 = vld [vmem:[%s3421_s30 + $0x120] sm:%s4276_s4]  ;;  %v836_v17 = vld [vmem:[%s3421_s30 + $0x150] sm:%s4276_s4]  ;;  %s4368_s14 = scalar_lea.vmem %s3950_s18, %s953_s1  }
 0x117   : >> { %835 = vst [vmem:[%s3417_s16 + $0xc0] sm:%s4276_s4] %v834_v16  ;;  %837 = vst [vmem:[%s3417_s16 + $0xe0] sm:%s4276_s4] %v836_v17 }
 0x118   : >> { %v838_v18 = vld [vmem:[%s3421_s30 + $0x180] sm:%s4276_s4]  ;;  %v840_v19 = vld [vmem:[%s3421_s30 + $0x1b0] sm:%s4276_s4] }
 0x119   : >> { %839 = vst [vmem:[%s3417_s16 + $0x100] sm:%s4276_s4] %v838_v18  ;;  %841 = vst [vmem:[%s3417_s16 + $0x120] sm:%s4276_s4] %v840_v19 }
 0x11a   : >> { %v842_v20 = vld [vmem:[%s3421_s30 + $0x1e0] sm:%s4276_s4]  ;;  %v844_v21 = vld [vmem:[%s3421_s30 + $0x210] sm:%s4276_s4] }
 0x11b   : >> { %843 = vst [vmem:[%s3417_s16 + $0x140] sm:%s4276_s4] %v842_v20  ;;  %845 = vst [vmem:[%s3417_s16 + $0x160] sm:%s4276_s4] %v844_v21 }
 0x11c   : >> { %v846_v22 = vld [vmem:[%s3421_s30 + $0x240] sm:%s4276_s4]  ;;  %v848_v23 = vld [vmem:[%s3421_s30 + $0x270] sm:%s4276_s4] }
 0x11d   : >> { %847 = vst [vmem:[%s3417_s16 + $0x180] sm:%s4276_s4] %v846_v22  ;;  %849 = vst [vmem:[%s3417_s16 + $0x1a0] sm:%s4276_s4] %v848_v23 }
 0x11e   : >> { %v850_v24 = vld [vmem:[%s3421_s30 + $0x2a0] sm:%s4276_s4]  ;;  %v852_v25 = vld [vmem:[%s3421_s30 + $0x2d0] sm:%s4276_s4] }
 0x11f   : >> { %851 = vst [vmem:[%s3417_s16 + $0x1c0] sm:%s4276_s4] %v850_v24  ;;  %853 = vst [vmem:[%s3417_s16 + $0x1e0] sm:%s4276_s4] %v852_v25 }
 0x120   : >> { %v854_v26 = vld [vmem:[%s3421_s30 + $0x300] sm:%s4276_s4]  ;;  %v856_v27 = vld [vmem:[%s3421_s30 + $0x330] sm:%s4276_s4] }
 0x121   : >> { %855 = vst [vmem:[%s3417_s16 + $0x200] sm:%s4276_s4] %v854_v26  ;;  %857 = vst [vmem:[%s3417_s16 + $0x220] sm:%s4276_s4] %v856_v27 }
 0x122   : >> { %v858_v28 = vld [vmem:[%s3421_s30 + $0x360] sm:%s4276_s4]  ;;  %v860_v29 = vld [vmem:[%s3421_s30 + $0x390] sm:%s4276_s4] }
 0x123   : >> { %859 = vst [vmem:[%s3417_s16 + $0x240] sm:%s4276_s4] %v858_v28  ;;  %861 = vst [vmem:[%s3417_s16 + $0x260] sm:%s4276_s4] %v860_v29 }
 0x124   : >> { %v862_v30 = vld [vmem:[%s3421_s30 + $0x3c0] sm:%s4276_s4]  ;;  %v864_v31 = vld [vmem:[%s3421_s30 + $0x3f0] sm:%s4276_s4] }
 0x125   : >> { %863 = vst [vmem:[%s3417_s16 + $0x280] sm:%s4276_s4] %v862_v30  ;;  %865 = vst [vmem:[%s3417_s16 + $0x2a0] sm:%s4276_s4] %v864_v31 }
 0x126   : >> { %v866_v32 = vld [vmem:[%s3421_s30 + $0x420] sm:%s4276_s4]  ;;  %v868_v33 = vld [vmem:[%s3421_s30 + $0x450] sm:%s4276_s4] }
 0x127   : >> { %867 = vst [vmem:[%s3417_s16 + $0x2c0] sm:%s4276_s4] %v866_v32  ;;  %869 = vst [vmem:[%s3417_s16 + $0x2e0] sm:%s4276_s4] %v868_v33 }
 0x128   : >> { %v870_v34 = vld [vmem:[%s3421_s30 + $0x480] sm:%s4276_s4]  ;;  %v872_v35 = vld [vmem:[%s3421_s30 + $0x4b0] sm:%s4276_s4] }
 0x129   : >> { %871 = vst [vmem:[%s3417_s16 + $0x300] sm:%s4276_s4] %v870_v34  ;;  %873 = vst [vmem:[%s3417_s16 + $0x320] sm:%s4276_s4] %v872_v35 }
 0x12a   : >> { %v874_v36 = vld [vmem:[%s3421_s30 + $0x4e0] sm:%s4276_s4]  ;;  %v876_v37 = vld [vmem:[%s3421_s30 + $0x510] sm:%s4276_s4] }
 0x12b   : >> { %875 = vst [vmem:[%s3417_s16 + $0x340] sm:%s4276_s4] %v874_v36  ;;  %877 = vst [vmem:[%s3417_s16 + $0x360] sm:%s4276_s4] %v876_v37 }
 0x12c   : >> { %v878_v38 = vld [vmem:[%s3421_s30 + $0x540] sm:%s4276_s4]  ;;  %v880_v39 = vld [vmem:[%s3421_s30 + $0x570] sm:%s4276_s4] }
 0x12d   : >> { %879 = vst [vmem:[%s3417_s16 + $0x380] sm:%s4276_s4] %v878_v38  ;;  %881 = vst [vmem:[%s3417_s16 + $0x3a0] sm:%s4276_s4] %v880_v39 }
 0x12e   : >> { %v882_v40 = vld [vmem:[%s3421_s30 + $0x5a0] sm:%s4276_s4]  ;;  %v884_v41 = vld [vmem:[%s3421_s30 + $0x5d0] sm:%s4276_s4] }
 0x12f   : >> { %883 = vst [vmem:[%s3417_s16 + $0x3c0] sm:%s4276_s4] %v882_v40  ;;  %885 = vst [vmem:[%s3417_s16 + $0x3e0] sm:%s4276_s4] %v884_v41 }
 0x130   : >> { %v886_v42 = vld [vmem:[%s3421_s30 + $0x600] sm:%s4276_s4]  ;;  %v888_v43 = vld [vmem:[%s3421_s30 + $0x630] sm:%s4276_s4] }
 0x131   : >> { %887 = vst [vmem:[%s3417_s16 + $0x400] sm:%s4276_s4] %v886_v42  ;;  %889 = vst [vmem:[%s3417_s16 + $0x420] sm:%s4276_s4] %v888_v43 }
 0x132   : >> { %v890_v44 = vld [vmem:[%s3421_s30 + $0x660] sm:%s4276_s4]  ;;  %v892_v45 = vld [vmem:[%s3421_s30 + $0x690] sm:%s4276_s4] }
 0x133   : >> { %891 = vst [vmem:[%s3417_s16 + $0x440] sm:%s4276_s4] %v890_v44  ;;  %893 = vst [vmem:[%s3417_s16 + $0x460] sm:%s4276_s4] %v892_v45 }
 0x134   : >> { %v894_v46 = vld [vmem:[%s3421_s30 + $0x6c0] sm:%s4276_s4]  ;;  %v896_v47 = vld [vmem:[%s3421_s30 + $0x6f0] sm:%s4276_s4] }
 0x135   : >> { %895 = vst [vmem:[%s3417_s16 + $0x480] sm:%s4276_s4] %v894_v46  ;;  %897 = vst [vmem:[%s3417_s16 + $0x4a0] sm:%s4276_s4] %v896_v47 }
 0x136   : >> { %v898_v48 = vld [vmem:[%s3421_s30 + $0x720] sm:%s4276_s4]  ;;  %v900_v49 = vld [vmem:[%s3421_s30 + $0x750] sm:%s4276_s4] }
 0x137   : >> { %899 = vst [vmem:[%s3417_s16 + $0x4c0] sm:%s4276_s4] %v898_v48  ;;  %901 = vst [vmem:[%s3417_s16 + $0x4e0] sm:%s4276_s4] %v900_v49 }
 0x138   : >> { %v902_v50 = vld [vmem:[%s3421_s30 + $0x780] sm:%s4276_s4]  ;;  %v904_v51 = vld [vmem:[%s3421_s30 + $0x7b0] sm:%s4276_s4] }
 0x139   : >> { %903 = vst [vmem:[%s3417_s16 + $0x500] sm:%s4276_s4] %v902_v50  ;;  %905 = vst [vmem:[%s3417_s16 + $0x520] sm:%s4276_s4] %v904_v51 }
 0x13a   : >> { %v906_v52 = vld [vmem:[%s3421_s30 + $0x7e0] sm:%s4276_s4]  ;;  %v908_v53 = vld [vmem:[%s3421_s30 + $0x810] sm:%s4276_s4] }
 0x13b   : >> { %907 = vst [vmem:[%s3417_s16 + $0x540] sm:%s4276_s4] %v906_v52  ;;  %909 = vst [vmem:[%s3417_s16 + $0x560] sm:%s4276_s4] %v908_v53 }
 0x13c   : >> { %v910_v54 = vld [vmem:[%s3421_s30 + $0x840] sm:%s4276_s4]  ;;  %v912_v55 = vld [vmem:[%s3421_s30 + $0x870] sm:%s4276_s4] }
 0x13d   : >> { %911 = vst [vmem:[%s3417_s16 + $0x580] sm:%s4276_s4] %v910_v54  ;;  %913 = vst [vmem:[%s3417_s16 + $0x5a0] sm:%s4276_s4] %v912_v55 }
 0x13e   : >> { %v914_v56 = vld [vmem:[%s3421_s30 + $0x8a0] sm:%s4276_s4]  ;;  %v916_v57 = vld [vmem:[%s3421_s30 + $0x8d0] sm:%s4276_s4] }
 0x13f   : >> { %915 = vst [vmem:[%s3417_s16 + $0x5c0] sm:%s4276_s4] %v914_v56  ;;  %917 = vst [vmem:[%s3417_s16 + $0x5e0] sm:%s4276_s4] %v916_v57 }
 0x140   : >> { %v918_v58 = vld [vmem:[%s3421_s30 + $0x900] sm:%s4276_s4]  ;;  %v920_v59 = vld [vmem:[%s3421_s30 + $0x930] sm:%s4276_s4] }
 0x141   : >> { %919 = vst [vmem:[%s3417_s16 + $0x600] sm:%s4276_s4] %v918_v58  ;;  %921 = vst [vmem:[%s3417_s16 + $0x620] sm:%s4276_s4] %v920_v59 }
 0x142   : >> { %v922_v60 = vld [vmem:[%s3421_s30 + $0x960] sm:%s4276_s4]  ;;  %v924_v61 = vld [vmem:[%s3421_s30 + $0x990] sm:%s4276_s4] }
 0x143   : >> { %923 = vst [vmem:[%s3417_s16 + $0x640] sm:%s4276_s4] %v922_v60  ;;  %925 = vst [vmem:[%s3417_s16 + $0x660] sm:%s4276_s4] %v924_v61 }
 0x144   : >> { %v926_v62 = vld [vmem:[%s3421_s30 + $0x9c0] sm:%s4276_s4]  ;;  %v928_v63 = vld [vmem:[%s3421_s30 + $0x9f0] sm:%s4276_s4] }
 0x145   : >> { %927 = vst [vmem:[%s3417_s16 + $0x680] sm:%s4276_s4] %v926_v62  ;;  %929 = vst [vmem:[%s3417_s16 + $0x6a0] sm:%s4276_s4] %v928_v63 }
 0x146   : >> { %v930_v0 = vld [vmem:[%s3421_s30 + $0xa20] sm:%s4276_s4]  ;;  %v932_v1 = vld [vmem:[%s3421_s30 + $0xa50] sm:%s4276_s4] }
 0x147   : >> { %931 = vst [vmem:[%s3417_s16 + $0x6c0] sm:%s4276_s4] %v930_v0  ;;  %933 = vst [vmem:[%s3417_s16 + $0x6e0] sm:%s4276_s4] %v932_v1 }
 0x148   : >> { %v934_v2 = vld [vmem:[%s3421_s30 + $0xa80] sm:%s4276_s4]  ;;  %v936_v3 = vld [vmem:[%s3421_s30 + $0xab0] sm:%s4276_s4] }
 0x149   : >> { %935 = vst [vmem:[%s3417_s16 + $0x700] sm:%s4276_s4] %v934_v2  ;;  %937 = vst [vmem:[%s3417_s16 + $0x720] sm:%s4276_s4] %v936_v3  ;;  %818 = sbr.rel (!%p815_p10) target bundleno = 272 (0x110), region = 254 }
 0x14a   : >> { %v938_v4 = vld [vmem:[%s3421_s30 + $0xae0] sm:%s4276_s4]  ;;  %v940_v5 = vld [vmem:[%s3421_s30 + $0xb10] sm:%s4276_s4] }
 0x14b   : >> { %939 = vst [vmem:[%s3417_s16 + $0x740] sm:%s4276_s4] %v938_v4  ;;  %941 = vst [vmem:[%s3417_s16 + $0x760] sm:%s4276_s4] %v940_v5 }
 0x14c   : >> { %v942_v6 = vld [vmem:[%s3421_s30 + $0xb40] sm:%s4276_s4]  ;;  %v944_v7 = vld [vmem:[%s3421_s30 + $0xb70] sm:%s4276_s4] }
 0x14d   : >> { %943 = vst [vmem:[%s3417_s16 + $0x780] sm:%s4276_s4] %v942_v6  ;;  %945 = vst [vmem:[%s3417_s16 + $0x7a0] sm:%s4276_s4] %v944_v7 }
 0x14e   : >> { %v946_v8 = vld [vmem:[%s3421_s30 + $0xba0] sm:%s4276_s4]  ;;  %v948_v9 = vld [vmem:[%s3421_s30 + $0xbd0] sm:%s4276_s4]  ;;  %s5599_s30 = smov %s4368_s14 }
 0x14f   : >> { %947 = vst [vmem:[%s3417_s16 + $0x7c0] sm:%s4276_s4] %v946_v8  ;;  %949 = vst [vmem:[%s3417_s16 + $0x7e0] sm:%s4276_s4] %v948_v9  ;;  %s5598_s16 = smov %s4357_s0 }
 0x150 PF: > { %s4580_s20 = sand.u32 63, %s5632_s2   ;;  %s2472_s21 = smul.u32 3072, %s4273_s28 }
 0x151   : > { %s2503_s10 = sshll.u32 %s4273_s28, 11  ;;  %p2474_p12 = scmp.le.s32.totalorder %s4580_s20, 0 }
 0x152   : > { %s961_s19 = scalar_lea.vmem %s3950_s18, %s2472_s21   ;;  %s963_s27 = scalar_lea.vmem %s3953_s23, %s2503_s10 [#allocation2]  }
 0x153   : > { %2344 = sbr.rel (%p2474_p12) target bundleno = 356 (0x164), region = 259  ;;  %s3431_s6 = smov (!%p2474_p12), %s963_s27  }
 0x154   : > { %s3435_s24 = smov (!%p2474_p12), %s961_s19   ;;  %s3439_s29 = smov (!%p2474_p12), 0  }
 0x155   : > { %s3443_s8 = smov (!%p2474_p12), 0  }
 0x15a LB: >> { %v973_v10 = vld [vmem:[%s3437_s24] sm:%s4276_s4]  ;;  %s975_s28 = sadd.s32 1, %s3441_s29  ;;  %s967_s8 = sadd.s32 1, %s3445_s8   ;;  %s3445_s8 = sphi %s3443_s8, %s967_s8   ;;  %s3441_s29 = sphi %s3439_s29, %s3440_s29   ;;  %s3437_s24 = sphi %s3435_s24, %s980_s24   ;;  %s3433_s6 = sphi %s3431_s6, %s981_s6  }
 0x15b   : >> { %974 = vst [vmem:[%s3433_s6] sm:%s4276_s4] %v973_v10  ;;  %p976_p13 = scmp.ge.s32.totalorder %s975_s28, %s4580_s20  ;;  %p966_p0 = scmp.ge.s32.totalorder %s967_s8, %s4580_s20 }
 0x15d   : >> { %s5674_s28 = smov (%p976_p13, %s975_s28), 0  ;;  %969 = sbr.rel (!%p966_p0) target bundleno = 346 (0x15a), region = 265 }
 0x15e   : >> { %s978_s18 = smul.u32 48, %s5674_s28  ;;  %s2475_s23 = sshll.u32 %s5674_s28, 5 }
 0x15f   : >> { %s981_s6 = scalar_lea.vmem %s963_s27, %s2475_s23 [#allocation2]   ;;  %s3440_s29 = smov %s5674_s28  }
 0x160   : >> { %s980_s24 = scalar_lea.vmem %s961_s19, %s978_s18  }
 0x164 PF: > { %p2476_p1 = scmp.ge.u32.totalorder %s3610_s5, 8 }
 0x165   : > { %s4593_s16 = sshrl.u32 (!%p2476_p1), %s5632_s2, 6  ;;  %s3480_s30 = smov (!%p2476_p1), 0  }
 0x166   : > { %142 = sbr.rel (%p2476_p1) target bundleno = 456 (0x1c8), region = 32  ;;  %s4596_s22 = sshllo.u32 (!%p2476_p1), %s3480_s30, %s3610_s5 }
 0x167   : > { %p2477_p2 = scmp.le.s32.totalorder (!%p2476_p1), %s4593_s16, 0 }
 0x16d   : > { %2358 = sbr.rel (%p2477_p2) target bundleno = 436 (0x1b4), region = 270  ;;  %s5601_s1 = smov (!%p2477_p2), %s3618_s15 }
 0x16e   : > { %s5602_s4 = smov (!%p2477_p2), %s3616_s25  ;;  %s4605_s3 = smov (!%p2477_p2), 0  }
 0x16f   : > { %s4607_s0 = smov (!%p2477_p2), 0  }
 0x174 LB: >> { %v154_v11 = vld [vmem:[%s3453_s4] sm:%s4596_s22]  ;;  %v156_v12 = vld [vmem:[%s3453_s4 + $0x30] sm:%s4596_s22]  ;;  %s282_s5 = sadd.s32 1, %s3457_s3  ;;  %s148_s0 = sadd.s32 1, %s3461_s0   ;;  %s3461_s0 = sphi %s4607_s0, %s148_s0   ;;  %s3457_s3 = sphi %s4605_s3, %s5605_s3   ;;  %s3453_s4 = sphi %s5602_s4, %s5604_s4   ;;  %s3449_s1 = sphi %s5601_s1, %s5603_s1  }
 0x175   : >> { %155 = vst [vmem:[%s3449_s1] sm:%s4596_s22] %v154_v11  ;;  %157 = vst [vmem:[%s3449_s1 + $0x20] sm:%s4596_s22] %v156_v12  ;;  %p283_p3 = scmp.ge.s32.totalorder %s282_s5, %s4593_s16  ;;  %p147_p4 = scmp.ge.s32.totalorder %s148_s0, %s4593_s16 }
 0x176   : >> { %v158_v13 = vld [vmem:[%s3453_s4 + $0x60] sm:%s4596_s22]  ;;  %v160_v14 = vld [vmem:[%s3453_s4 + $0x90] sm:%s4596_s22] }
 0x177   : >> { %159 = vst [vmem:[%s3449_s1 + $0x40] sm:%s4596_s22] %v158_v13  ;;  %161 = vst [vmem:[%s3449_s1 + $0x60] sm:%s4596_s22] %v160_v14  ;;  %s5676_s5 = smov (%p283_p3, %s282_s5), 0 }
 0x178   : >> { %v162_v15 = vld [vmem:[%s3453_s4 + $0xc0] sm:%s4596_s22]  ;;  %v164_v16 = vld [vmem:[%s3453_s4 + $0xf0] sm:%s4596_s22]  ;;  %s285_s14 = smul.u32 3072, %s5676_s5  ;;  %s2478_s20 = sshll.u32 %s5676_s5, 11 }
 0x179   : >> { %163 = vst [vmem:[%s3449_s1 + $0x80] sm:%s4596_s22] %v162_v15  ;;  %165 = vst [vmem:[%s3449_s1 + $0xa0] sm:%s4596_s22] %v164_v16  ;;  %s4677_s21 = scalar_lea.vmem %s3618_s15, %s2478_s20 [#allocation2]   ;;  %s5605_s3 = smov %s5676_s5 }
 0x17a   : >> { %v166_v17 = vld [vmem:[%s3453_s4 + $0x120] sm:%s4596_s22]  ;;  %v168_v18 = vld [vmem:[%s3453_s4 + $0x150] sm:%s4596_s22]  ;;  %s4688_s10 = scalar_lea.vmem %s3616_s25, %s285_s14  }
 0x17b   : >> { %167 = vst [vmem:[%s3449_s1 + $0xc0] sm:%s4596_s22] %v166_v17  ;;  %169 = vst [vmem:[%s3449_s1 + $0xe0] sm:%s4596_s22] %v168_v18 }
 0x17c   : >> { %v170_v19 = vld [vmem:[%s3453_s4 + $0x180] sm:%s4596_s22]  ;;  %v172_v20 = vld [vmem:[%s3453_s4 + $0x1b0] sm:%s4596_s22] }
 0x17d   : >> { %171 = vst [vmem:[%s3449_s1 + $0x100] sm:%s4596_s22] %v170_v19  ;;  %173 = vst [vmem:[%s3449_s1 + $0x120] sm:%s4596_s22] %v172_v20 }
 0x17e   : >> { %v174_v21 = vld [vmem:[%s3453_s4 + $0x1e0] sm:%s4596_s22]  ;;  %v176_v22 = vld [vmem:[%s3453_s4 + $0x210] sm:%s4596_s22] }
 0x17f   : >> { %175 = vst [vmem:[%s3449_s1 + $0x140] sm:%s4596_s22] %v174_v21  ;;  %177 = vst [vmem:[%s3449_s1 + $0x160] sm:%s4596_s22] %v176_v22 }
 0x180   : >> { %v178_v23 = vld [vmem:[%s3453_s4 + $0x240] sm:%s4596_s22]  ;;  %v180_v24 = vld [vmem:[%s3453_s4 + $0x270] sm:%s4596_s22] }
 0x181   : >> { %179 = vst [vmem:[%s3449_s1 + $0x180] sm:%s4596_s22] %v178_v23  ;;  %181 = vst [vmem:[%s3449_s1 + $0x1a0] sm:%s4596_s22] %v180_v24 }
 0x182   : >> { %v182_v25 = vld [vmem:[%s3453_s4 + $0x2a0] sm:%s4596_s22]  ;;  %v184_v26 = vld [vmem:[%s3453_s4 + $0x2d0] sm:%s4596_s22] }
 0x183   : >> { %183 = vst [vmem:[%s3449_s1 + $0x1c0] sm:%s4596_s22] %v182_v25  ;;  %185 = vst [vmem:[%s3449_s1 + $0x1e0] sm:%s4596_s22] %v184_v26 }
 0x184   : >> { %v186_v27 = vld [vmem:[%s3453_s4 + $0x300] sm:%s4596_s22]  ;;  %v188_v28 = vld [vmem:[%s3453_s4 + $0x330] sm:%s4596_s22] }
 0x185   : >> { %187 = vst [vmem:[%s3449_s1 + $0x200] sm:%s4596_s22] %v186_v27  ;;  %189 = vst [vmem:[%s3449_s1 + $0x220] sm:%s4596_s22] %v188_v28 }
 0x186   : >> { %v190_v29 = vld [vmem:[%s3453_s4 + $0x360] sm:%s4596_s22]  ;;  %v192_v30 = vld [vmem:[%s3453_s4 + $0x390] sm:%s4596_s22] }
 0x187   : >> { %191 = vst [vmem:[%s3449_s1 + $0x240] sm:%s4596_s22] %v190_v29  ;;  %193 = vst [vmem:[%s3449_s1 + $0x260] sm:%s4596_s22] %v192_v30 }
 0x188   : >> { %v194_v31 = vld [vmem:[%s3453_s4 + $0x3c0] sm:%s4596_s22]  ;;  %v196_v32 = vld [vmem:[%s3453_s4 + $0x3f0] sm:%s4596_s22] }
 0x189   : >> { %195 = vst [vmem:[%s3449_s1 + $0x280] sm:%s4596_s22] %v194_v31  ;;  %197 = vst [vmem:[%s3449_s1 + $0x2a0] sm:%s4596_s22] %v196_v32 }
 0x18a   : >> { %v198_v33 = vld [vmem:[%s3453_s4 + $0x420] sm:%s4596_s22]  ;;  %v200_v34 = vld [vmem:[%s3453_s4 + $0x450] sm:%s4596_s22] }
 0x18b   : >> { %199 = vst [vmem:[%s3449_s1 + $0x2c0] sm:%s4596_s22] %v198_v33  ;;  %201 = vst [vmem:[%s3449_s1 + $0x2e0] sm:%s4596_s22] %v200_v34 }
 0x18c   : >> { %v202_v35 = vld [vmem:[%s3453_s4 + $0x480] sm:%s4596_s22]  ;;  %v204_v36 = vld [vmem:[%s3453_s4 + $0x4b0] sm:%s4596_s22] }
 0x18d   : >> { %203 = vst [vmem:[%s3449_s1 + $0x300] sm:%s4596_s22] %v202_v35  ;;  %205 = vst [vmem:[%s3449_s1 + $0x320] sm:%s4596_s22] %v204_v36 }
 0x18e   : >> { %v206_v37 = vld [vmem:[%s3453_s4 + $0x4e0] sm:%s4596_s22]  ;;  %v208_v38 = vld [vmem:[%s3453_s4 + $0x510] sm:%s4596_s22] }
 0x18f   : >> { %207 = vst [vmem:[%s3449_s1 + $0x340] sm:%s4596_s22] %v206_v37  ;;  %209 = vst [vmem:[%s3449_s1 + $0x360] sm:%s4596_s22] %v208_v38 }
 0x190   : >> { %v210_v39 = vld [vmem:[%s3453_s4 + $0x540] sm:%s4596_s22]  ;;  %v212_v40 = vld [vmem:[%s3453_s4 + $0x570] sm:%s4596_s22] }
 0x191   : >> { %211 = vst [vmem:[%s3449_s1 + $0x380] sm:%s4596_s22] %v210_v39  ;;  %213 = vst [vmem:[%s3449_s1 + $0x3a0] sm:%s4596_s22] %v212_v40 }
 0x192   : >> { %v214_v41 = vld [vmem:[%s3453_s4 + $0x5a0] sm:%s4596_s22]  ;;  %v216_v42 = vld [vmem:[%s3453_s4 + $0x5d0] sm:%s4596_s22] }
 0x193   : >> { %215 = vst [vmem:[%s3449_s1 + $0x3c0] sm:%s4596_s22] %v214_v41  ;;  %217 = vst [vmem:[%s3449_s1 + $0x3e0] sm:%s4596_s22] %v216_v42 }
 0x194   : >> { %v218_v43 = vld [vmem:[%s3453_s4 + $0x600] sm:%s4596_s22]  ;;  %v220_v44 = vld [vmem:[%s3453_s4 + $0x630] sm:%s4596_s22] }
 0x195   : >> { %219 = vst [vmem:[%s3449_s1 + $0x400] sm:%s4596_s22] %v218_v43  ;;  %221 = vst [vmem:[%s3449_s1 + $0x420] sm:%s4596_s22] %v220_v44 }
 0x196   : >> { %v222_v45 = vld [vmem:[%s3453_s4 + $0x660] sm:%s4596_s22]  ;;  %v224_v46 = vld [vmem:[%s3453_s4 + $0x690] sm:%s4596_s22] }
 0x197   : >> { %223 = vst [vmem:[%s3449_s1 + $0x440] sm:%s4596_s22] %v222_v45  ;;  %225 = vst [vmem:[%s3449_s1 + $0x460] sm:%s4596_s22] %v224_v46 }
 0x198   : >> { %v226_v47 = vld [vmem:[%s3453_s4 + $0x6c0] sm:%s4596_s22]  ;;  %v228_v48 = vld [vmem:[%s3453_s4 + $0x6f0] sm:%s4596_s22] }
 0x199   : >> { %227 = vst [vmem:[%s3449_s1 + $0x480] sm:%s4596_s22] %v226_v47  ;;  %229 = vst [vmem:[%s3449_s1 + $0x4a0] sm:%s4596_s22] %v228_v48 }
 0x19a   : >> { %v230_v49 = vld [vmem:[%s3453_s4 + $0x720] sm:%s4596_s22]  ;;  %v232_v50 = vld [vmem:[%s3453_s4 + $0x750] sm:%s4596_s22] }
 0x19b   : >> { %231 = vst [vmem:[%s3449_s1 + $0x4c0] sm:%s4596_s22] %v230_v49  ;;  %233 = vst [vmem:[%s3449_s1 + $0x4e0] sm:%s4596_s22] %v232_v50 }
 0x19c   : >> { %v234_v51 = vld [vmem:[%s3453_s4 + $0x780] sm:%s4596_s22]  ;;  %v236_v52 = vld [vmem:[%s3453_s4 + $0x7b0] sm:%s4596_s22] }
 0x19d   : >> { %235 = vst [vmem:[%s3449_s1 + $0x500] sm:%s4596_s22] %v234_v51  ;;  %237 = vst [vmem:[%s3449_s1 + $0x520] sm:%s4596_s22] %v236_v52 }
 0x19e   : >> { %v238_v53 = vld [vmem:[%s3453_s4 + $0x7e0] sm:%s4596_s22]  ;;  %v240_v54 = vld [vmem:[%s3453_s4 + $0x810] sm:%s4596_s22] }
 0x19f   : >> { %239 = vst [vmem:[%s3449_s1 + $0x540] sm:%s4596_s22] %v238_v53  ;;  %241 = vst [vmem:[%s3449_s1 + $0x560] sm:%s4596_s22] %v240_v54 }
 0x1a0   : >> { %v242_v55 = vld [vmem:[%s3453_s4 + $0x840] sm:%s4596_s22]  ;;  %v244_v56 = vld [vmem:[%s3453_s4 + $0x870] sm:%s4596_s22] }
 0x1a1   : >> { %243 = vst [vmem:[%s3449_s1 + $0x580] sm:%s4596_s22] %v242_v55  ;;  %245 = vst [vmem:[%s3449_s1 + $0x5a0] sm:%s4596_s22] %v244_v56 }
 0x1a2   : >> { %v246_v57 = vld [vmem:[%s3453_s4 + $0x8a0] sm:%s4596_s22]  ;;  %v248_v58 = vld [vmem:[%s3453_s4 + $0x8d0] sm:%s4596_s22] }
 0x1a3   : >> { %247 = vst [vmem:[%s3449_s1 + $0x5c0] sm:%s4596_s22] %v246_v57  ;;  %249 = vst [vmem:[%s3449_s1 + $0x5e0] sm:%s4596_s22] %v248_v58 }
 0x1a4   : >> { %v250_v59 = vld [vmem:[%s3453_s4 + $0x900] sm:%s4596_s22]  ;;  %v252_v60 = vld [vmem:[%s3453_s4 + $0x930] sm:%s4596_s22] }
 0x1a5   : >> { %251 = vst [vmem:[%s3449_s1 + $0x600] sm:%s4596_s22] %v250_v59  ;;  %253 = vst [vmem:[%s3449_s1 + $0x620] sm:%s4596_s22] %v252_v60 }
 0x1a6   : >> { %v254_v61 = vld [vmem:[%s3453_s4 + $0x960] sm:%s4596_s22]  ;;  %v256_v62 = vld [vmem:[%s3453_s4 + $0x990] sm:%s4596_s22] }
 0x1a7   : >> { %255 = vst [vmem:[%s3449_s1 + $0x640] sm:%s4596_s22] %v254_v61  ;;  %257 = vst [vmem:[%s3449_s1 + $0x660] sm:%s4596_s22] %v256_v62 }
 0x1a8   : >> { %v258_v63 = vld [vmem:[%s3453_s4 + $0x9c0] sm:%s4596_s22]  ;;  %v260_v0 = vld [vmem:[%s3453_s4 + $0x9f0] sm:%s4596_s22] }
 0x1a9   : >> { %259 = vst [vmem:[%s3449_s1 + $0x680] sm:%s4596_s22] %v258_v63  ;;  %261 = vst [vmem:[%s3449_s1 + $0x6a0] sm:%s4596_s22] %v260_v0 }
 0x1aa   : >> { %v262_v1 = vld [vmem:[%s3453_s4 + $0xa20] sm:%s4596_s22]  ;;  %v264_v2 = vld [vmem:[%s3453_s4 + $0xa50] sm:%s4596_s22] }
 0x1ab   : >> { %263 = vst [vmem:[%s3449_s1 + $0x6c0] sm:%s4596_s22] %v262_v1  ;;  %265 = vst [vmem:[%s3449_s1 + $0x6e0] sm:%s4596_s22] %v264_v2 }
 0x1ac   : >> { %v266_v3 = vld [vmem:[%s3453_s4 + $0xa80] sm:%s4596_s22]  ;;  %v268_v4 = vld [vmem:[%s3453_s4 + $0xab0] sm:%s4596_s22] }
 0x1ad   : >> { %267 = vst [vmem:[%s3449_s1 + $0x700] sm:%s4596_s22] %v266_v3  ;;  %269 = vst [vmem:[%s3449_s1 + $0x720] sm:%s4596_s22] %v268_v4  ;;  %150 = sbr.rel (!%p147_p4) target bundleno = 372 (0x174), region = 276 }
 0x1ae   : >> { %v270_v5 = vld [vmem:[%s3453_s4 + $0xae0] sm:%s4596_s22]  ;;  %v272_v6 = vld [vmem:[%s3453_s4 + $0xb10] sm:%s4596_s22] }
 0x1af   : >> { %271 = vst [vmem:[%s3449_s1 + $0x740] sm:%s4596_s22] %v270_v5  ;;  %273 = vst [vmem:[%s3449_s1 + $0x760] sm:%s4596_s22] %v272_v6 }
 0x1b0   : >> { %v274_v7 = vld [vmem:[%s3453_s4 + $0xb40] sm:%s4596_s22]  ;;  %v276_v8 = vld [vmem:[%s3453_s4 + $0xb70] sm:%s4596_s22] }
 0x1b1   : >> { %275 = vst [vmem:[%s3449_s1 + $0x780] sm:%s4596_s22] %v274_v7  ;;  %277 = vst [vmem:[%s3449_s1 + $0x7a0] sm:%s4596_s22] %v276_v8 }
 0x1b2   : >> { %v278_v9 = vld [vmem:[%s3453_s4 + $0xba0] sm:%s4596_s22]  ;;  %v280_v10 = vld [vmem:[%s3453_s4 + $0xbd0] sm:%s4596_s22]  ;;  %s5604_s4 = smov %s4688_s10 }
 0x1b3   : >> { %279 = vst [vmem:[%s3449_s1 + $0x7c0] sm:%s4596_s22] %v278_v9  ;;  %281 = vst [vmem:[%s3449_s1 + $0x7e0] sm:%s4596_s22] %v280_v10  ;;  %s5603_s1 = smov %s4677_s21 }
 0x1b4 PF: > { %s4900_s19 = sand.u32 63, %s5632_s2   ;;  %s2480_s27 = smul.u32 3072, %s4593_s16 }
 0x1b5   : > { %s2504_s6 = sshll.u32 %s4593_s16, 11  ;;  %p2482_p6 = scmp.le.s32.totalorder %s4900_s19, 0 }
 0x1b6   : > { %s293_s24 = scalar_lea.vmem %s3616_s25, %s2480_s27   ;;  %s295_s29 = scalar_lea.vmem %s3618_s15, %s2504_s6 [#allocation2]  }
 0x1b7   : > { %2372 = sbr.rel (%p2482_p6) target bundleno = 456 (0x1c8), region = 281  ;;  %s3463_s8 = smov (!%p2482_p6), %s295_s29  }
 0x1b8   : > { %s3467_s28 = smov (!%p2482_p6), %s293_s24   ;;  %s3471_s18 = smov (!%p2482_p6), 0  }
 0x1b9   : > { %s3475_s23 = smov (!%p2482_p6), 0  }
 0x1be LB: >> { %v305_v11 = vld [vmem:[%s3469_s28] sm:%s4596_s22]  ;;  %s307_s2 = sadd.s32 1, %s3473_s18  ;;  %s299_s23 = sadd.s32 1, %s3477_s23   ;;  %s3477_s23 = sphi %s3475_s23, %s299_s23   ;;  %s3473_s18 = sphi %s3471_s18, %s3472_s18   ;;  %s3469_s28 = sphi %s3467_s28, %s312_s28   ;;  %s3465_s8 = sphi %s3463_s8, %s313_s8  }
 0x1bf   : >> { %306 = vst [vmem:[%s3465_s8] sm:%s4596_s22] %v305_v11  ;;  %p308_p7 = scmp.ge.s32.totalorder %s307_s2, %s4900_s19  ;;  %p298_p5 = scmp.ge.s32.totalorder %s299_s23, %s4900_s19 }
 0x1c1   : >> { %s5678_s2 = smov (%p308_p7, %s307_s2), 0  ;;  %301 = sbr.rel (!%p298_p5) target bundleno = 446 (0x1be), region = 287 }
 0x1c2   : >> { %s310_s15 = smul.u32 48, %s5678_s2  ;;  %s2483_s25 = sshll.u32 %s5678_s2, 5 }
 0x1c3   : >> { %s313_s8 = scalar_lea.vmem %s295_s29, %s2483_s25 [#allocation2]   ;;  %s3472_s18 = smov %s5678_s2  }
 0x1c4   : >> { %s312_s28 = scalar_lea.vmem %s293_s24, %s310_s15  }
 0x1c8 PF: > { %p2484_p8 = scmp.ge.s32.totalorder %s3293_s17, 1  ;;  %p984_p10 = scmp.lt.s32.totalorder %s3293_s17, 9 }
 0x1ca   : > { %p985_p12 = pnand %p2484_p8, %p984_p10 }
 0x1cb   : > { %s991_s16 = sand.u32 (!%p985_p12), 1, %s3261_s9   ;;  %s1007_s9 = sand.u32 (!%p985_p12), 1, %s3253_s7  }
 0x1cc   : > { %988 = sbr.rel (%p985_p12) target bundleno = 1135 (0x46f), region = 114  ;;  %s2485_s30 = sshll.u32 (!%p985_p12), %s991_s16, 11 }
 0x1cd   : > { %s4914_s1 = scalar_lea.vmem (!%p985_p12), [#allocation2], %s2485_s30  ;;  %s2486_s22 = sshll.u32 (!%p985_p12), %s1007_s9, 11 }
 0x1ce   : > { %v1031_v12 = vld [vmem:[%s4914_s1 + $0x8] sm:$0xff] (!%p985_p12)  ;;  %v1030_v13 = vld [vmem:[%s4914_s1] sm:$0xff] (!%p985_p12)  ;;  %v1033_v44 = vld [vmem:[%s4914_s1 + $0x18] sm:$0xff] (!%p985_p12)  ;;  %s4985_s4 = scalar_lea.vmem (!%p985_p12), [#allocation3], %s2486_s22  ;;  %s5435_s3 = scalar_lea.sflag (!%p985_p12), [#allocation4], %s1007_s9 }
 0x1cf   : > { %1318 = vxpose.xlu1.b32.start [1/16] (!%p985_p12), %v1031_v12, 128  ;;  %1286 = vxpose.xlu0.b32.start [1/16] (!%p985_p12), %v1030_v13, 128  ;;  %v1035_v14 = vld [vmem:[%s4914_s1 + $0x28] sm:$0xff] (!%p985_p12)  ;;  %v1034_v15 = vld [vmem:[%s4914_s1 + $0x20] sm:$0xff] (!%p985_p12)  ;;  %v1032_v45 = vld [vmem:[%s4914_s1 + $0x10] sm:$0xff] (!%p985_p12) }
 0x1d0   : > { %v1039_v16 = vld [vmem:[%s4914_s1 + $0x48] sm:$0xff] (!%p985_p12)  ;;  %v1038_v17 = vld [vmem:[%s4914_s1 + $0x40] sm:$0xff] (!%p985_p12)  ;;  %v1037_v46 = vld [vmem:[%s4914_s1 + $0x38] sm:$0xff] (!%p985_p12) }
 0x1d1   : > { %v1043_v18 = vld [vmem:[%s4914_s1 + $0x68] sm:$0xff] (!%p985_p12)  ;;  %v1042_v19 = vld [vmem:[%s4914_s1 + $0x60] sm:$0xff] (!%p985_p12)  ;;  %v1036_v47 = vld [vmem:[%s4914_s1 + $0x30] sm:$0xff] (!%p985_p12) }
 0x1d2   : > { %v1047_v20 = vld [vmem:[%s4914_s1 + $0x88] sm:$0xff] (!%p985_p12)  ;;  %v1046_v21 = vld [vmem:[%s4914_s1 + $0x80] sm:$0xff] (!%p985_p12)  ;;  %v1041_v48 = vld [vmem:[%s4914_s1 + $0x58] sm:$0xff] (!%p985_p12) }
 0x1d3   : > { %1319 = vxpose.xlu1.b32.cont [2/16] %v1035_v14, 128  ;;  %1287 = vxpose.xlu0.b32.cont [2/16] %v1034_v15, 128  ;;  %v1051_v22 = vld [vmem:[%s4914_s1 + $0xa8] sm:$0xff]  ;;  %v1050_v23 = vld [vmem:[%s4914_s1 + $0xa0] sm:$0xff]  ;;  %v1040_v49 = vld [vmem:[%s4914_s1 + $0x50] sm:$0xff]  ;;  %s2488_s0 = sshll.u32 (%p3580_p9), %s3273_s12, 6  ;;  %s2489_s5 = sshll.u32 (%p3580_p9), %s3269_s11, 2 }
 0x1d4   : > { %v1055_v24 = vld [vmem:[%s4914_s1 + $0xc8] sm:$0xff]  ;;  %v1054_v25 = vld [vmem:[%s4914_s1 + $0xc0] sm:$0xff]  ;;  %v1045_v50 = vld [vmem:[%s4914_s1 + $0x78] sm:$0xff]  ;;  %s2064_s14 = ssub.s32 (%p3580_p9), 88, %s2488_s0  ;;  %s2068_s20 = ssub.s32 (%p3580_p9), 5, %s2489_s5 }
 0x1d5   : > { %v1059_v26 = vld [vmem:[%s4914_s1 + $0xe8] sm:$0xff]  ;;  %v1058_v27 = vld [vmem:[%s4914_s1 + $0xe0] sm:$0xff]  ;;  %v1044_v51 = vld [vmem:[%s4914_s1 + $0x70] sm:$0xff]  ;;  %p2065_p13 = scmp.lt.s32.totalorder (%p3580_p9), %s2064_s14, 64  ;;  %p2069_p0 = scmp.lt.s32.totalorder (%p3580_p9), %s2068_s20, 4 }
 0x1d6   : > { %v1063_v28 = vld [vmem:[%s4914_s1 + $0x108] sm:$0xff]  ;;  %v1062_v29 = vld [vmem:[%s4914_s1 + $0x100] sm:$0xff]  ;;  %v1049_v52 = vld [vmem:[%s4914_s1 + $0x98] sm:$0xff] }
 0x1d7   : > { %1320 = vxpose.xlu1.b32.cont [3/16] %v1039_v16, 128  ;;  %1288 = vxpose.xlu0.b32.cont [3/16] %v1038_v17, 128  ;;  %v1067_v30 = vld [vmem:[%s4914_s1 + $0x128] sm:$0xff]  ;;  %v1066_v31 = vld [vmem:[%s4914_s1 + $0x120] sm:$0xff]  ;;  %v1048_v53 = vld [vmem:[%s4914_s1 + $0x90] sm:$0xff] }
 0x1d8   : > { %v1071_v32 = vld [vmem:[%s4914_s1 + $0x148] sm:$0xff]  ;;  %v1070_v33 = vld [vmem:[%s4914_s1 + $0x140] sm:$0xff]  ;;  %v1053_v54 = vld [vmem:[%s4914_s1 + $0xb8] sm:$0xff] }
 0x1d9   : > { %v1075_v34 = vld [vmem:[%s4914_s1 + $0x168] sm:$0xff]  ;;  %v1074_v35 = vld [vmem:[%s4914_s1 + $0x160] sm:$0xff]  ;;  %v1052_v55 = vld [vmem:[%s4914_s1 + $0xb0] sm:$0xff] }
 0x1da   : > { %v1079_v36 = vld [vmem:[%s4914_s1 + $0x188] sm:$0xff]  ;;  %v1078_v37 = vld [vmem:[%s4914_s1 + $0x180] sm:$0xff]  ;;  %v1057_v56 = vld [vmem:[%s4914_s1 + $0xd8] sm:$0xff] }
 0x1db   : > { %1321 = vxpose.xlu1.b32.cont [4/16] %v1043_v18, 128  ;;  %1289 = vxpose.xlu0.b32.cont [4/16] %v1042_v19, 128  ;;  %v1083_v38 = vld [vmem:[%s4914_s1 + $0x1a8] sm:$0xff]  ;;  %v1082_v39 = vld [vmem:[%s4914_s1 + $0x1a0] sm:$0xff]  ;;  %v1056_v57 = vld [vmem:[%s4914_s1 + $0xd0] sm:$0xff] }
 0x1dc   : > { %v1087_v40 = vld [vmem:[%s4914_s1 + $0x1c8] sm:$0xff]  ;;  %v1086_v41 = vld [vmem:[%s4914_s1 + $0x1c0] sm:$0xff]  ;;  %v1061_v58 = vld [vmem:[%s4914_s1 + $0xf8] sm:$0xff] }
 0x1dd   : > { %v1091_v42 = vld [vmem:[%s4914_s1 + $0x1e8] sm:$0xff]  ;;  %v1090_v43 = vld [vmem:[%s4914_s1 + $0x1e0] sm:$0xff]  ;;  %v1060_v59 = vld [vmem:[%s4914_s1 + $0xf0] sm:$0xff] }
 0x1de   : > { %v1065_v60 = vld [vmem:[%s4914_s1 + $0x118] sm:$0xff]  ;;  %v1064_v61 = vld [vmem:[%s4914_s1 + $0x110] sm:$0xff]  ;;  %v1095_v12 = vld [vmem:[%s4914_s1 + $0x208] sm:$0xff] }
 0x1df   : > { %1322 = vxpose.xlu1.b32.cont [5/16] %v1047_v20, 128  ;;  %1290 = vxpose.xlu0.b32.cont [5/16] %v1046_v21, 128  ;;  %v1069_v62 = vld [vmem:[%s4914_s1 + $0x138] sm:$0xff]  ;;  %v1068_v63 = vld [vmem:[%s4914_s1 + $0x130] sm:$0xff]  ;;  %v1094_v13 = vld [vmem:[%s4914_s1 + $0x200] sm:$0xff] }
 0x1e0   : > { %v1073_v0 = vld [vmem:[%s4914_s1 + $0x158] sm:$0xff]  ;;  %v1072_v1 = vld [vmem:[%s4914_s1 + $0x150] sm:$0xff]  ;;  %v1099_v16 = vld [vmem:[%s4914_s1 + $0x228] sm:$0xff] }
 0x1e1   : > { %v1077_v2 = vld [vmem:[%s4914_s1 + $0x178] sm:$0xff]  ;;  %v1076_v3 = vld [vmem:[%s4914_s1 + $0x170] sm:$0xff]  ;;  %v1098_v17 = vld [vmem:[%s4914_s1 + $0x220] sm:$0xff] }
 0x1e2   : > { %v1081_v4 = vld [vmem:[%s4914_s1 + $0x198] sm:$0xff]  ;;  %v1080_v5 = vld [vmem:[%s4914_s1 + $0x190] sm:$0xff]  ;;  %v1103_v20 = vld [vmem:[%s4914_s1 + $0x248] sm:$0xff] }
 0x1e3   : > { %1323 = vxpose.xlu1.b32.cont [6/16] %v1051_v22, 128  ;;  %1291 = vxpose.xlu0.b32.cont [6/16] %v1050_v23, 128  ;;  %v1085_v6 = vld [vmem:[%s4914_s1 + $0x1b8] sm:$0xff]  ;;  %v1084_v7 = vld [vmem:[%s4914_s1 + $0x1b0] sm:$0xff]  ;;  %v1102_v21 = vld [vmem:[%s4914_s1 + $0x240] sm:$0xff] }
 0x1e4   : > { %v1089_v8 = vld [vmem:[%s4914_s1 + $0x1d8] sm:$0xff]  ;;  %v1088_v9 = vld [vmem:[%s4914_s1 + $0x1d0] sm:$0xff] }
 0x1e5   : > { %v1093_v10 = vld [vmem:[%s4914_s1 + $0x1f8] sm:$0xff]  ;;  %v1092_v11 = vld [vmem:[%s4914_s1 + $0x1f0] sm:$0xff] }
 0x1e7   : > { %1324 = vxpose.xlu1.b32.cont [7/16] %v1055_v24, 128  ;;  %1292 = vxpose.xlu0.b32.cont [7/16] %v1054_v25, 128  ;;  %v1107_v24 = vld [vmem:[%s4914_s1 + $0x268] sm:$0xff]  ;;  %v1106_v25 = vld [vmem:[%s4914_s1 + $0x260] sm:$0xff] }
 0x1eb   : > { %1325 = vxpose.xlu1.b32.cont [8/16] %v1059_v26, 128  ;;  %1293 = vxpose.xlu0.b32.cont [8/16] %v1058_v27, 128 }
 0x1ef   : > { %1326 = vxpose.xlu1.b32.cont [9/16] %v1063_v28, 128  ;;  %1294 = vxpose.xlu0.b32.cont [9/16] %v1062_v29, 128  ;;  %v1111_v28 = vld [vmem:[%s4914_s1 + $0x288] sm:$0xff]  ;;  %v1110_v29 = vld [vmem:[%s4914_s1 + $0x280] sm:$0xff] }
 0x1f3   : > { %1327 = vxpose.xlu1.b32.cont [10/16] %v1067_v30, 128  ;;  %1295 = vxpose.xlu0.b32.cont [10/16] %v1066_v31, 128 }
 0x1f7   : > { %1328 = vxpose.xlu1.b32.cont [11/16] %v1071_v32, 128  ;;  %1296 = vxpose.xlu0.b32.cont [11/16] %v1070_v33, 128  ;;  %v1115_v32 = vld [vmem:[%s4914_s1 + $0x2a8] sm:$0xff]  ;;  %v1114_v33 = vld [vmem:[%s4914_s1 + $0x2a0] sm:$0xff] }
 0x1fb   : > { %1329 = vxpose.xlu1.b32.cont [12/16] %v1075_v34, 128  ;;  %1297 = vxpose.xlu0.b32.cont [12/16] %v1074_v35, 128 }
 0x1ff   : > { %1330 = vxpose.xlu1.b32.cont [13/16] %v1079_v36, 128  ;;  %1298 = vxpose.xlu0.b32.cont [13/16] %v1078_v37, 128  ;;  %v1119_v36 = vld [vmem:[%s4914_s1 + $0x2c8] sm:$0xff]  ;;  %v1118_v37 = vld [vmem:[%s4914_s1 + $0x2c0] sm:$0xff] }
 0x203   : > { %1331 = vxpose.xlu1.b32.cont [14/16] %v1083_v38, 128  ;;  %1299 = vxpose.xlu0.b32.cont [14/16] %v1082_v39, 128 }
 0x207   : > { %1332 = vxpose.xlu1.b32.cont [15/16] %v1087_v40, 128  ;;  %1300 = vxpose.xlu0.b32.cont [15/16] %v1086_v41, 128  ;;  %v1123_v40 = vld [vmem:[%s4914_s1 + $0x2e8] sm:$0xff]  ;;  %v1122_v41 = vld [vmem:[%s4914_s1 + $0x2e0] sm:$0xff] }
 0x20b   : > { %1333 = vxpose.xlu1.b32.end [16/16] %v1091_v42, 128  ;;  %1301 = vxpose.xlu0.b32.end [16/16] %v1090_v43, 128 }
 0x20f   : > { %1382 = vxpose.xlu1.b32.start [1/16] %v1033_v44, 128  ;;  %1350 = vxpose.xlu0.b32.start [1/16] %v1032_v45, 128  ;;  %v1127_v44 = vld [vmem:[%s4914_s1 + $0x308] sm:$0xff]  ;;  %v1126_v45 = vld [vmem:[%s4914_s1 + $0x300] sm:$0xff] }
 0x213   : > { %1383 = vxpose.xlu1.b32.cont [2/16] %v1037_v46, 128  ;;  %1351 = vxpose.xlu0.b32.cont [2/16] %v1036_v47, 128 }
 0x217   : > { %1384 = vxpose.xlu1.b32.cont [3/16] %v1041_v48, 128  ;;  %1352 = vxpose.xlu0.b32.cont [3/16] %v1040_v49, 128  ;;  %v1131_v48 = vld [vmem:[%s4914_s1 + $0x328] sm:$0xff]  ;;  %v1130_v49 = vld [vmem:[%s4914_s1 + $0x320] sm:$0xff] }
 0x21b   : > { %1385 = vxpose.xlu1.b32.cont [4/16] %v1045_v50, 128  ;;  %1353 = vxpose.xlu0.b32.cont [4/16] %v1044_v51, 128 }
 0x21f   : > { %1386 = vxpose.xlu1.b32.cont [5/16] %v1049_v52, 128  ;;  %1354 = vxpose.xlu0.b32.cont [5/16] %v1048_v53, 128  ;;  %v1135_v52 = vld [vmem:[%s4914_s1 + $0x348] sm:$0xff]  ;;  %v1134_v53 = vld [vmem:[%s4914_s1 + $0x340] sm:$0xff] }
 0x223   : > { %1387 = vxpose.xlu1.b32.cont [6/16] %v1053_v54, 128  ;;  %1355 = vxpose.xlu0.b32.cont [6/16] %v1052_v55, 128 }
 0x227   : > { %1388 = vxpose.xlu1.b32.cont [7/16] %v1057_v56, 128  ;;  %1356 = vxpose.xlu0.b32.cont [7/16] %v1056_v57, 128  ;;  %v1139_v56 = vld [vmem:[%s4914_s1 + $0x368] sm:$0xff]  ;;  %v1138_v57 = vld [vmem:[%s4914_s1 + $0x360] sm:$0xff] }
 0x22b   : > { %1389 = vxpose.xlu1.b32.cont [8/16] %v1061_v58, 128  ;;  %1357 = vxpose.xlu0.b32.cont [8/16] %v1060_v59, 128 }
 0x22f   : > { %1390 = vxpose.xlu1.b32.cont [9/16] %v1065_v60, 128  ;;  %1358 = vxpose.xlu0.b32.cont [9/16] %v1064_v61, 128  ;;  %v1143_v60 = vld [vmem:[%s4914_s1 + $0x388] sm:$0xff]  ;;  %v1142_v61 = vld [vmem:[%s4914_s1 + $0x380] sm:$0xff] }
 0x233   : > { %1391 = vxpose.xlu1.b32.cont [10/16] %v1069_v62, 128  ;;  %1359 = vxpose.xlu0.b32.cont [10/16] %v1068_v63, 128 }
 0x237   : > { %1392 = vxpose.xlu1.b32.cont [11/16] %v1073_v0, 128  ;;  %1360 = vxpose.xlu0.b32.cont [11/16] %v1072_v1, 128  ;;  %v1147_v0 = vld [vmem:[%s4914_s1 + $0x3a8] sm:$0xff]  ;;  %v1146_v1 = vld [vmem:[%s4914_s1 + $0x3a0] sm:$0xff] }
 0x23b   : > { %1393 = vxpose.xlu1.b32.cont [12/16] %v1077_v2, 128  ;;  %1361 = vxpose.xlu0.b32.cont [12/16] %v1076_v3, 128 }
 0x23f   : > { %1394 = vxpose.xlu1.b32.cont [13/16] %v1081_v4, 128  ;;  %1362 = vxpose.xlu0.b32.cont [13/16] %v1080_v5, 128  ;;  %v1151_v4 = vld [vmem:[%s4914_s1 + $0x3c8] sm:$0xff]  ;;  %v1150_v5 = vld [vmem:[%s4914_s1 + $0x3c0] sm:$0xff] }
 0x243   : > { %1395 = vxpose.xlu1.b32.cont [14/16] %v1085_v6, 128  ;;  %1363 = vxpose.xlu0.b32.cont [14/16] %v1084_v7, 128 }
 0x247   : > { %1396 = vxpose.xlu1.b32.cont [15/16] %v1089_v8, 128  ;;  %1364 = vxpose.xlu0.b32.cont [15/16] %v1088_v9, 128  ;;  %v1155_v8 = vld [vmem:[%s4914_s1 + $0x3e8] sm:$0xff]  ;;  %v1154_v9 = vld [vmem:[%s4914_s1 + $0x3e0] sm:$0xff] }
 0x24b   : > { %1397 = vxpose.xlu1.b32.end [16/16] %v1093_v10, 128  ;;  %1365 = vxpose.xlu0.b32.end [16/16] %v1092_v11, 128 }
 0x24f   : > { %1446 = vxpose.xlu1.b32.start [1/16] %v1095_v12, 128  ;;  %v1334_v14 = vpop.trf.xlu1  ;;  %1414 = vxpose.xlu0.b32.start [1/16] %v1094_v13, 128  ;;  %v1302_v15 = vpop.trf.xlu0  ;;  %v1097_v12 = vld [vmem:[%s4914_s1 + $0x218] sm:$0xff]  ;;  %v1096_v13 = vld [vmem:[%s4914_s1 + $0x210] sm:$0xff] }
 0x250   : > { %1862 = vst [vmem:[%s4985_s4 + $0x200] sm:$0xff] %v1334_v14  ;;  %1798 = vst [vmem:[%s4985_s4] sm:$0xff] %v1302_v15 }
 0x253   : > { %1447 = vxpose.xlu1.b32.cont [2/16] %v1099_v16, 128  ;;  %v1335_v18 = vpop.trf.xlu1  ;;  %1415 = vxpose.xlu0.b32.cont [2/16] %v1098_v17, 128  ;;  %v1303_v19 = vpop.trf.xlu0  ;;  %v1101_v16 = vld [vmem:[%s4914_s1 + $0x238] sm:$0xff]  ;;  %v1100_v17 = vld [vmem:[%s4914_s1 + $0x230] sm:$0xff] }
 0x254   : > { %1866 = vst [vmem:[%s4985_s4 + $0x220] sm:$0xff] %v1335_v18  ;;  %1802 = vst [vmem:[%s4985_s4 + $0x20] sm:$0xff] %v1303_v19 }
 0x257   : > { %1448 = vxpose.xlu1.b32.cont [3/16] %v1103_v20, 128  ;;  %v1336_v22 = vpop.trf.xlu1  ;;  %1416 = vxpose.xlu0.b32.cont [3/16] %v1102_v21, 128  ;;  %v1304_v23 = vpop.trf.xlu0  ;;  %v1105_v20 = vld [vmem:[%s4914_s1 + $0x258] sm:$0xff]  ;;  %v1104_v21 = vld [vmem:[%s4914_s1 + $0x250] sm:$0xff] }
 0x258   : > { %1870 = vst [vmem:[%s4985_s4 + $0x240] sm:$0xff] %v1336_v22  ;;  %1806 = vst [vmem:[%s4985_s4 + $0x40] sm:$0xff] %v1304_v23 }
 0x25b   : > { %1449 = vxpose.xlu1.b32.cont [4/16] %v1107_v24, 128  ;;  %v1337_v26 = vpop.trf.xlu1  ;;  %1417 = vxpose.xlu0.b32.cont [4/16] %v1106_v25, 128  ;;  %v1305_v27 = vpop.trf.xlu0  ;;  %v1109_v24 = vld [vmem:[%s4914_s1 + $0x278] sm:$0xff]  ;;  %v1108_v25 = vld [vmem:[%s4914_s1 + $0x270] sm:$0xff] }
 0x25c   : > { %1874 = vst [vmem:[%s4985_s4 + $0x260] sm:$0xff] %v1337_v26  ;;  %1810 = vst [vmem:[%s4985_s4 + $0x60] sm:$0xff] %v1305_v27 }
 0x25f   : > { %1450 = vxpose.xlu1.b32.cont [5/16] %v1111_v28, 128  ;;  %v1338_v30 = vpop.trf.xlu1  ;;  %1418 = vxpose.xlu0.b32.cont [5/16] %v1110_v29, 128  ;;  %v1306_v31 = vpop.trf.xlu0  ;;  %v1113_v28 = vld [vmem:[%s4914_s1 + $0x298] sm:$0xff]  ;;  %v1112_v29 = vld [vmem:[%s4914_s1 + $0x290] sm:$0xff] }
 0x260   : > { %1878 = vst [vmem:[%s4985_s4 + $0x280] sm:$0xff] %v1338_v30  ;;  %1814 = vst [vmem:[%s4985_s4 + $0x80] sm:$0xff] %v1306_v31 }
 0x263   : > { %1451 = vxpose.xlu1.b32.cont [6/16] %v1115_v32, 128  ;;  %v1339_v34 = vpop.trf.xlu1  ;;  %1419 = vxpose.xlu0.b32.cont [6/16] %v1114_v33, 128  ;;  %v1307_v35 = vpop.trf.xlu0  ;;  %v1117_v32 = vld [vmem:[%s4914_s1 + $0x2b8] sm:$0xff]  ;;  %v1116_v33 = vld [vmem:[%s4914_s1 + $0x2b0] sm:$0xff] }
 0x264   : > { %1882 = vst [vmem:[%s4985_s4 + $0x2a0] sm:$0xff] %v1339_v34  ;;  %1818 = vst [vmem:[%s4985_s4 + $0xa0] sm:$0xff] %v1307_v35 }
 0x267   : > { %1452 = vxpose.xlu1.b32.cont [7/16] %v1119_v36, 128  ;;  %v1340_v38 = vpop.trf.xlu1  ;;  %1420 = vxpose.xlu0.b32.cont [7/16] %v1118_v37, 128  ;;  %v1308_v39 = vpop.trf.xlu0  ;;  %v1121_v36 = vld [vmem:[%s4914_s1 + $0x2d8] sm:$0xff]  ;;  %v1120_v37 = vld [vmem:[%s4914_s1 + $0x2d0] sm:$0xff] }
 0x268   : > { %1886 = vst [vmem:[%s4985_s4 + $0x2c0] sm:$0xff] %v1340_v38  ;;  %1822 = vst [vmem:[%s4985_s4 + $0xc0] sm:$0xff] %v1308_v39 }
 0x26b   : > { %1453 = vxpose.xlu1.b32.cont [8/16] %v1123_v40, 128  ;;  %v1341_v42 = vpop.trf.xlu1  ;;  %1421 = vxpose.xlu0.b32.cont [8/16] %v1122_v41, 128  ;;  %v1309_v43 = vpop.trf.xlu0  ;;  %v1125_v40 = vld [vmem:[%s4914_s1 + $0x2f8] sm:$0xff]  ;;  %v1124_v41 = vld [vmem:[%s4914_s1 + $0x2f0] sm:$0xff] }
 0x26c   : > { %1890 = vst [vmem:[%s4985_s4 + $0x2e0] sm:$0xff] %v1341_v42  ;;  %1826 = vst [vmem:[%s4985_s4 + $0xe0] sm:$0xff] %v1309_v43 }
 0x26f   : > { %1454 = vxpose.xlu1.b32.cont [9/16] %v1127_v44, 128  ;;  %v1342_v46 = vpop.trf.xlu1  ;;  %1422 = vxpose.xlu0.b32.cont [9/16] %v1126_v45, 128  ;;  %v1310_v47 = vpop.trf.xlu0  ;;  %v1129_v44 = vld [vmem:[%s4914_s1 + $0x318] sm:$0xff]  ;;  %v1128_v45 = vld [vmem:[%s4914_s1 + $0x310] sm:$0xff] }
 0x270   : > { %1894 = vst [vmem:[%s4985_s4 + $0x300] sm:$0xff] %v1342_v46  ;;  %1830 = vst [vmem:[%s4985_s4 + $0x100] sm:$0xff] %v1310_v47 }
 0x273   : > { %1455 = vxpose.xlu1.b32.cont [10/16] %v1131_v48, 128  ;;  %v1343_v50 = vpop.trf.xlu1  ;;  %1423 = vxpose.xlu0.b32.cont [10/16] %v1130_v49, 128  ;;  %v1311_v51 = vpop.trf.xlu0  ;;  %v1133_v48 = vld [vmem:[%s4914_s1 + $0x338] sm:$0xff]  ;;  %v1132_v49 = vld [vmem:[%s4914_s1 + $0x330] sm:$0xff] }
 0x274   : > { %1898 = vst [vmem:[%s4985_s4 + $0x320] sm:$0xff] %v1343_v50  ;;  %1834 = vst [vmem:[%s4985_s4 + $0x120] sm:$0xff] %v1311_v51 }
 0x277   : > { %1456 = vxpose.xlu1.b32.cont [11/16] %v1135_v52, 128  ;;  %v1344_v54 = vpop.trf.xlu1  ;;  %1424 = vxpose.xlu0.b32.cont [11/16] %v1134_v53, 128  ;;  %v1312_v55 = vpop.trf.xlu0  ;;  %v1137_v52 = vld [vmem:[%s4914_s1 + $0x358] sm:$0xff]  ;;  %v1136_v53 = vld [vmem:[%s4914_s1 + $0x350] sm:$0xff] }
 0x278   : > { %1902 = vst [vmem:[%s4985_s4 + $0x340] sm:$0xff] %v1344_v54  ;;  %1838 = vst [vmem:[%s4985_s4 + $0x140] sm:$0xff] %v1312_v55 }
 0x27b   : > { %1457 = vxpose.xlu1.b32.cont [12/16] %v1139_v56, 128  ;;  %v1345_v58 = vpop.trf.xlu1  ;;  %1425 = vxpose.xlu0.b32.cont [12/16] %v1138_v57, 128  ;;  %v1313_v59 = vpop.trf.xlu0  ;;  %v1141_v56 = vld [vmem:[%s4914_s1 + $0x378] sm:$0xff]  ;;  %v1140_v57 = vld [vmem:[%s4914_s1 + $0x370] sm:$0xff] }
 0x27c   : > { %1906 = vst [vmem:[%s4985_s4 + $0x360] sm:$0xff] %v1345_v58  ;;  %1842 = vst [vmem:[%s4985_s4 + $0x160] sm:$0xff] %v1313_v59 }
 0x27f   : > { %1458 = vxpose.xlu1.b32.cont [13/16] %v1143_v60, 128  ;;  %v1346_v62 = vpop.trf.xlu1  ;;  %1426 = vxpose.xlu0.b32.cont [13/16] %v1142_v61, 128  ;;  %v1314_v63 = vpop.trf.xlu0  ;;  %v1145_v60 = vld [vmem:[%s4914_s1 + $0x398] sm:$0xff]  ;;  %v1144_v61 = vld [vmem:[%s4914_s1 + $0x390] sm:$0xff] }
 0x280   : > { %1910 = vst [vmem:[%s4985_s4 + $0x380] sm:$0xff] %v1346_v62  ;;  %1846 = vst [vmem:[%s4985_s4 + $0x180] sm:$0xff] %v1314_v63 }
 0x283   : > { %1459 = vxpose.xlu1.b32.cont [14/16] %v1147_v0, 128  ;;  %v1347_v2 = vpop.trf.xlu1  ;;  %1427 = vxpose.xlu0.b32.cont [14/16] %v1146_v1, 128  ;;  %v1315_v3 = vpop.trf.xlu0  ;;  %v1149_v0 = vld [vmem:[%s4914_s1 + $0x3b8] sm:$0xff]  ;;  %v1148_v1 = vld [vmem:[%s4914_s1 + $0x3b0] sm:$0xff] }
 0x284   : > { %1914 = vst [vmem:[%s4985_s4 + $0x3a0] sm:$0xff] %v1347_v2  ;;  %1850 = vst [vmem:[%s4985_s4 + $0x1a0] sm:$0xff] %v1315_v3 }
 0x287   : > { %1460 = vxpose.xlu1.b32.cont [15/16] %v1151_v4, 128  ;;  %v1348_v6 = vpop.trf.xlu1  ;;  %1428 = vxpose.xlu0.b32.cont [15/16] %v1150_v5, 128  ;;  %v1316_v7 = vpop.trf.xlu0  ;;  %v1153_v4 = vld [vmem:[%s4914_s1 + $0x3d8] sm:$0xff]  ;;  %v1152_v5 = vld [vmem:[%s4914_s1 + $0x3d0] sm:$0xff] }
 0x288   : > { %1918 = vst [vmem:[%s4985_s4 + $0x3c0] sm:$0xff] %v1348_v6  ;;  %1854 = vst [vmem:[%s4985_s4 + $0x1c0] sm:$0xff] %v1316_v7 }
 0x28b   : > { %1461 = vxpose.xlu1.b32.end [16/16] %v1155_v8, 128  ;;  %v1349_v10 = vpop.trf.xlu1  ;;  %1429 = vxpose.xlu0.b32.end [16/16] %v1154_v9, 128  ;;  %v1317_v11 = vpop.trf.xlu0  ;;  %v1157_v8 = vld [vmem:[%s4914_s1 + $0x3f8] sm:$0xff]  ;;  %v1156_v9 = vld [vmem:[%s4914_s1 + $0x3f0] sm:$0xff] }
 0x28c   : > { %1922 = vst [vmem:[%s4985_s4 + $0x3e0] sm:$0xff] %v1349_v10  ;;  %1858 = vst [vmem:[%s4985_s4 + $0x1e0] sm:$0xff] %v1317_v11 }
 0x28f   : > { %1510 = vxpose.xlu1.b32.start [1/16] %v1097_v12, 128  ;;  %v1398_v14 = vpop.trf.xlu1  ;;  %1478 = vxpose.xlu0.b32.start [1/16] %v1096_v13, 128  ;;  %v1366_v15 = vpop.trf.xlu0  ;;  %v1159_v12 = vld [vmem:[%s4914_s1 + $0x408] sm:$0xff]  ;;  %v1158_v13 = vld [vmem:[%s4914_s1 + $0x400] sm:$0xff] }
 0x290   : > { %1990 = vst [vmem:[%s4985_s4 + $0x600] sm:$0xff] %v1398_v14  ;;  %1926 = vst [vmem:[%s4985_s4 + $0x400] sm:$0xff] %v1366_v15 }
 0x293   : > { %1511 = vxpose.xlu1.b32.cont [2/16] %v1101_v16, 128  ;;  %v1399_v18 = vpop.trf.xlu1  ;;  %1479 = vxpose.xlu0.b32.cont [2/16] %v1100_v17, 128  ;;  %v1367_v19 = vpop.trf.xlu0  ;;  %v1163_v16 = vld [vmem:[%s4914_s1 + $0x428] sm:$0xff]  ;;  %v1162_v17 = vld [vmem:[%s4914_s1 + $0x420] sm:$0xff] }
 0x294   : > { %1994 = vst [vmem:[%s4985_s4 + $0x620] sm:$0xff] %v1399_v18  ;;  %1930 = vst [vmem:[%s4985_s4 + $0x420] sm:$0xff] %v1367_v19 }
 0x297   : > { %1512 = vxpose.xlu1.b32.cont [3/16] %v1105_v20, 128  ;;  %v1400_v22 = vpop.trf.xlu1  ;;  %1480 = vxpose.xlu0.b32.cont [3/16] %v1104_v21, 128  ;;  %v1368_v23 = vpop.trf.xlu0  ;;  %v1167_v20 = vld [vmem:[%s4914_s1 + $0x448] sm:$0xff]  ;;  %v1166_v21 = vld [vmem:[%s4914_s1 + $0x440] sm:$0xff] }
 0x298   : > { %1998 = vst [vmem:[%s4985_s4 + $0x640] sm:$0xff] %v1400_v22  ;;  %1934 = vst [vmem:[%s4985_s4 + $0x440] sm:$0xff] %v1368_v23 }
 0x29b   : > { %1513 = vxpose.xlu1.b32.cont [4/16] %v1109_v24, 128  ;;  %v1401_v26 = vpop.trf.xlu1  ;;  %1481 = vxpose.xlu0.b32.cont [4/16] %v1108_v25, 128  ;;  %v1369_v27 = vpop.trf.xlu0  ;;  %v1171_v24 = vld [vmem:[%s4914_s1 + $0x468] sm:$0xff]  ;;  %v1170_v25 = vld [vmem:[%s4914_s1 + $0x460] sm:$0xff] }
 0x29c   : > { %2002 = vst [vmem:[%s4985_s4 + $0x660] sm:$0xff] %v1401_v26  ;;  %1938 = vst [vmem:[%s4985_s4 + $0x460] sm:$0xff] %v1369_v27 }
 0x29f   : > { %1514 = vxpose.xlu1.b32.cont [5/16] %v1113_v28, 128  ;;  %v1402_v30 = vpop.trf.xlu1  ;;  %1482 = vxpose.xlu0.b32.cont [5/16] %v1112_v29, 128  ;;  %v1370_v31 = vpop.trf.xlu0  ;;  %v1175_v28 = vld [vmem:[%s4914_s1 + $0x488] sm:$0xff]  ;;  %v1174_v29 = vld [vmem:[%s4914_s1 + $0x480] sm:$0xff] }
 0x2a0   : > { %2006 = vst [vmem:[%s4985_s4 + $0x680] sm:$0xff] %v1402_v30  ;;  %1942 = vst [vmem:[%s4985_s4 + $0x480] sm:$0xff] %v1370_v31 }
 0x2a3   : > { %1515 = vxpose.xlu1.b32.cont [6/16] %v1117_v32, 128  ;;  %v1403_v34 = vpop.trf.xlu1  ;;  %1483 = vxpose.xlu0.b32.cont [6/16] %v1116_v33, 128  ;;  %v1371_v35 = vpop.trf.xlu0  ;;  %v1179_v32 = vld [vmem:[%s4914_s1 + $0x4a8] sm:$0xff]  ;;  %v1178_v33 = vld [vmem:[%s4914_s1 + $0x4a0] sm:$0xff] }
 0x2a4   : > { %2010 = vst [vmem:[%s4985_s4 + $0x6a0] sm:$0xff] %v1403_v34  ;;  %1946 = vst [vmem:[%s4985_s4 + $0x4a0] sm:$0xff] %v1371_v35 }
 0x2a7   : > { %1516 = vxpose.xlu1.b32.cont [7/16] %v1121_v36, 128  ;;  %v1404_v38 = vpop.trf.xlu1  ;;  %1484 = vxpose.xlu0.b32.cont [7/16] %v1120_v37, 128  ;;  %v1372_v39 = vpop.trf.xlu0  ;;  %v1183_v36 = vld [vmem:[%s4914_s1 + $0x4c8] sm:$0xff]  ;;  %v1182_v37 = vld [vmem:[%s4914_s1 + $0x4c0] sm:$0xff] }
 0x2a8   : > { %2014 = vst [vmem:[%s4985_s4 + $0x6c0] sm:$0xff] %v1404_v38  ;;  %1950 = vst [vmem:[%s4985_s4 + $0x4c0] sm:$0xff] %v1372_v39 }
 0x2ab   : > { %1517 = vxpose.xlu1.b32.cont [8/16] %v1125_v40, 128  ;;  %v1405_v42 = vpop.trf.xlu1  ;;  %1485 = vxpose.xlu0.b32.cont [8/16] %v1124_v41, 128  ;;  %v1373_v43 = vpop.trf.xlu0  ;;  %v1187_v40 = vld [vmem:[%s4914_s1 + $0x4e8] sm:$0xff]  ;;  %v1186_v41 = vld [vmem:[%s4914_s1 + $0x4e0] sm:$0xff] }
 0x2ac   : > { %2018 = vst [vmem:[%s4985_s4 + $0x6e0] sm:$0xff] %v1405_v42  ;;  %1954 = vst [vmem:[%s4985_s4 + $0x4e0] sm:$0xff] %v1373_v43 }
 0x2af   : > { %1518 = vxpose.xlu1.b32.cont [9/16] %v1129_v44, 128  ;;  %v1406_v46 = vpop.trf.xlu1  ;;  %1486 = vxpose.xlu0.b32.cont [9/16] %v1128_v45, 128  ;;  %v1374_v47 = vpop.trf.xlu0  ;;  %v1191_v44 = vld [vmem:[%s4914_s1 + $0x508] sm:$0xff]  ;;  %v1190_v45 = vld [vmem:[%s4914_s1 + $0x500] sm:$0xff] }
 0x2b0   : > { %2022 = vst [vmem:[%s4985_s4 + $0x700] sm:$0xff] %v1406_v46  ;;  %1958 = vst [vmem:[%s4985_s4 + $0x500] sm:$0xff] %v1374_v47 }
 0x2b3   : > { %1519 = vxpose.xlu1.b32.cont [10/16] %v1133_v48, 128  ;;  %v1407_v50 = vpop.trf.xlu1  ;;  %1487 = vxpose.xlu0.b32.cont [10/16] %v1132_v49, 128  ;;  %v1375_v51 = vpop.trf.xlu0  ;;  %v1195_v48 = vld [vmem:[%s4914_s1 + $0x528] sm:$0xff]  ;;  %v1194_v49 = vld [vmem:[%s4914_s1 + $0x520] sm:$0xff] }
 0x2b4   : > { %2026 = vst [vmem:[%s4985_s4 + $0x720] sm:$0xff] %v1407_v50  ;;  %1962 = vst [vmem:[%s4985_s4 + $0x520] sm:$0xff] %v1375_v51 }
 0x2b7   : > { %1520 = vxpose.xlu1.b32.cont [11/16] %v1137_v52, 128  ;;  %v1408_v54 = vpop.trf.xlu1  ;;  %1488 = vxpose.xlu0.b32.cont [11/16] %v1136_v53, 128  ;;  %v1376_v55 = vpop.trf.xlu0  ;;  %v1199_v52 = vld [vmem:[%s4914_s1 + $0x548] sm:$0xff]  ;;  %v1198_v53 = vld [vmem:[%s4914_s1 + $0x540] sm:$0xff] }
 0x2b8   : > { %2030 = vst [vmem:[%s4985_s4 + $0x740] sm:$0xff] %v1408_v54  ;;  %1966 = vst [vmem:[%s4985_s4 + $0x540] sm:$0xff] %v1376_v55 }
 0x2bb   : > { %1521 = vxpose.xlu1.b32.cont [12/16] %v1141_v56, 128  ;;  %v1409_v58 = vpop.trf.xlu1  ;;  %1489 = vxpose.xlu0.b32.cont [12/16] %v1140_v57, 128  ;;  %v1377_v59 = vpop.trf.xlu0  ;;  %v1203_v56 = vld [vmem:[%s4914_s1 + $0x568] sm:$0xff]  ;;  %v1202_v57 = vld [vmem:[%s4914_s1 + $0x560] sm:$0xff] }
 0x2bc   : > { %2034 = vst [vmem:[%s4985_s4 + $0x760] sm:$0xff] %v1409_v58  ;;  %1970 = vst [vmem:[%s4985_s4 + $0x560] sm:$0xff] %v1377_v59 }
 0x2bf   : > { %1522 = vxpose.xlu1.b32.cont [13/16] %v1145_v60, 128  ;;  %v1410_v62 = vpop.trf.xlu1  ;;  %1490 = vxpose.xlu0.b32.cont [13/16] %v1144_v61, 128  ;;  %v1378_v63 = vpop.trf.xlu0  ;;  %v1207_v60 = vld [vmem:[%s4914_s1 + $0x588] sm:$0xff]  ;;  %v1206_v61 = vld [vmem:[%s4914_s1 + $0x580] sm:$0xff] }
 0x2c0   : > { %2038 = vst [vmem:[%s4985_s4 + $0x780] sm:$0xff] %v1410_v62  ;;  %1974 = vst [vmem:[%s4985_s4 + $0x580] sm:$0xff] %v1378_v63 }
 0x2c3   : > { %1523 = vxpose.xlu1.b32.cont [14/16] %v1149_v0, 128  ;;  %v1411_v2 = vpop.trf.xlu1  ;;  %1491 = vxpose.xlu0.b32.cont [14/16] %v1148_v1, 128  ;;  %v1379_v3 = vpop.trf.xlu0  ;;  %v1211_v0 = vld [vmem:[%s4914_s1 + $0x5a8] sm:$0xff]  ;;  %v1210_v1 = vld [vmem:[%s4914_s1 + $0x5a0] sm:$0xff] }
 0x2c4   : > { %2042 = vst [vmem:[%s4985_s4 + $0x7a0] sm:$0xff] %v1411_v2  ;;  %1978 = vst [vmem:[%s4985_s4 + $0x5a0] sm:$0xff] %v1379_v3 }
 0x2c7   : > { %1524 = vxpose.xlu1.b32.cont [15/16] %v1153_v4, 128  ;;  %v1412_v6 = vpop.trf.xlu1  ;;  %1492 = vxpose.xlu0.b32.cont [15/16] %v1152_v5, 128  ;;  %v1380_v7 = vpop.trf.xlu0  ;;  %v1215_v4 = vld [vmem:[%s4914_s1 + $0x5c8] sm:$0xff]  ;;  %v1214_v5 = vld [vmem:[%s4914_s1 + $0x5c0] sm:$0xff] }
 0x2c8   : > { %2046 = vst [vmem:[%s4985_s4 + $0x7c0] sm:$0xff] %v1412_v6  ;;  %1982 = vst [vmem:[%s4985_s4 + $0x5c0] sm:$0xff] %v1380_v7 }
 0x2cb   : > { %1525 = vxpose.xlu1.b32.end [16/16] %v1157_v8, 128  ;;  %v1413_v10 = vpop.trf.xlu1  ;;  %1493 = vxpose.xlu0.b32.end [16/16] %v1156_v9, 128  ;;  %v1381_v11 = vpop.trf.xlu0  ;;  %v1219_v8 = vld [vmem:[%s4914_s1 + $0x5e8] sm:$0xff]  ;;  %v1218_v9 = vld [vmem:[%s4914_s1 + $0x5e0] sm:$0xff] }
 0x2cc   : > { %2050 = vst [vmem:[%s4985_s4 + $0x7e0] sm:$0xff] %v1413_v10  ;;  %1986 = vst [vmem:[%s4985_s4 + $0x5e0] sm:$0xff] %v1381_v11 }
 0x2cf   : > { %1574 = vxpose.xlu1.b32.start [1/16] %v1159_v12, 128  ;;  %v1462_v14 = vpop.trf.xlu1  ;;  %1542 = vxpose.xlu0.b32.start [1/16] %v1158_v13, 128  ;;  %v1430_v15 = vpop.trf.xlu0  ;;  %v1161_v12 = vld [vmem:[%s4914_s1 + $0x418] sm:$0xff]  ;;  %v1160_v13 = vld [vmem:[%s4914_s1 + $0x410] sm:$0xff] }
 0x2d0   : > { %1863 = vst [vmem:[%s4985_s4 + $0x208] sm:$0xff] %v1462_v14  ;;  %1799 = vst [vmem:[%s4985_s4 + $0x8] sm:$0xff] %v1430_v15 }
 0x2d3   : > { %1575 = vxpose.xlu1.b32.cont [2/16] %v1163_v16, 128  ;;  %v1463_v18 = vpop.trf.xlu1  ;;  %1543 = vxpose.xlu0.b32.cont [2/16] %v1162_v17, 128  ;;  %v1431_v19 = vpop.trf.xlu0  ;;  %v1165_v16 = vld [vmem:[%s4914_s1 + $0x438] sm:$0xff]  ;;  %v1164_v17 = vld [vmem:[%s4914_s1 + $0x430] sm:$0xff] }
 0x2d4   : > { %1867 = vst [vmem:[%s4985_s4 + $0x228] sm:$0xff] %v1463_v18  ;;  %1803 = vst [vmem:[%s4985_s4 + $0x28] sm:$0xff] %v1431_v19 }
 0x2d7   : > { %1576 = vxpose.xlu1.b32.cont [3/16] %v1167_v20, 128  ;;  %v1464_v22 = vpop.trf.xlu1  ;;  %1544 = vxpose.xlu0.b32.cont [3/16] %v1166_v21, 128  ;;  %v1432_v23 = vpop.trf.xlu0  ;;  %v1169_v20 = vld [vmem:[%s4914_s1 + $0x458] sm:$0xff]  ;;  %v1168_v21 = vld [vmem:[%s4914_s1 + $0x450] sm:$0xff] }
 0x2d8   : > { %1871 = vst [vmem:[%s4985_s4 + $0x248] sm:$0xff] %v1464_v22  ;;  %1807 = vst [vmem:[%s4985_s4 + $0x48] sm:$0xff] %v1432_v23 }
 0x2db   : > { %1577 = vxpose.xlu1.b32.cont [4/16] %v1171_v24, 128  ;;  %v1465_v26 = vpop.trf.xlu1  ;;  %1545 = vxpose.xlu0.b32.cont [4/16] %v1170_v25, 128  ;;  %v1433_v27 = vpop.trf.xlu0  ;;  %v1173_v24 = vld [vmem:[%s4914_s1 + $0x478] sm:$0xff]  ;;  %v1172_v25 = vld [vmem:[%s4914_s1 + $0x470] sm:$0xff] }
 0x2dc   : > { %1875 = vst [vmem:[%s4985_s4 + $0x268] sm:$0xff] %v1465_v26  ;;  %1811 = vst [vmem:[%s4985_s4 + $0x68] sm:$0xff] %v1433_v27 }
 0x2df   : > { %1578 = vxpose.xlu1.b32.cont [5/16] %v1175_v28, 128  ;;  %v1466_v30 = vpop.trf.xlu1  ;;  %1546 = vxpose.xlu0.b32.cont [5/16] %v1174_v29, 128  ;;  %v1434_v31 = vpop.trf.xlu0  ;;  %v1177_v28 = vld [vmem:[%s4914_s1 + $0x498] sm:$0xff]  ;;  %v1176_v29 = vld [vmem:[%s4914_s1 + $0x490] sm:$0xff] }
 0x2e0   : > { %1879 = vst [vmem:[%s4985_s4 + $0x288] sm:$0xff] %v1466_v30  ;;  %1815 = vst [vmem:[%s4985_s4 + $0x88] sm:$0xff] %v1434_v31 }
 0x2e3   : > { %1579 = vxpose.xlu1.b32.cont [6/16] %v1179_v32, 128  ;;  %v1467_v34 = vpop.trf.xlu1  ;;  %1547 = vxpose.xlu0.b32.cont [6/16] %v1178_v33, 128  ;;  %v1435_v35 = vpop.trf.xlu0  ;;  %v1181_v32 = vld [vmem:[%s4914_s1 + $0x4b8] sm:$0xff]  ;;  %v1180_v33 = vld [vmem:[%s4914_s1 + $0x4b0] sm:$0xff] }
 0x2e4   : > { %1883 = vst [vmem:[%s4985_s4 + $0x2a8] sm:$0xff] %v1467_v34  ;;  %1819 = vst [vmem:[%s4985_s4 + $0xa8] sm:$0xff] %v1435_v35 }
 0x2e7   : > { %1580 = vxpose.xlu1.b32.cont [7/16] %v1183_v36, 128  ;;  %v1468_v38 = vpop.trf.xlu1  ;;  %1548 = vxpose.xlu0.b32.cont [7/16] %v1182_v37, 128  ;;  %v1436_v39 = vpop.trf.xlu0  ;;  %v1185_v36 = vld [vmem:[%s4914_s1 + $0x4d8] sm:$0xff]  ;;  %v1184_v37 = vld [vmem:[%s4914_s1 + $0x4d0] sm:$0xff] }
 0x2e8   : > { %1887 = vst [vmem:[%s4985_s4 + $0x2c8] sm:$0xff] %v1468_v38  ;;  %1823 = vst [vmem:[%s4985_s4 + $0xc8] sm:$0xff] %v1436_v39 }
 0x2eb   : > { %1581 = vxpose.xlu1.b32.cont [8/16] %v1187_v40, 128  ;;  %v1469_v42 = vpop.trf.xlu1  ;;  %1549 = vxpose.xlu0.b32.cont [8/16] %v1186_v41, 128  ;;  %v1437_v43 = vpop.trf.xlu0  ;;  %v1189_v40 = vld [vmem:[%s4914_s1 + $0x4f8] sm:$0xff]  ;;  %v1188_v41 = vld [vmem:[%s4914_s1 + $0x4f0] sm:$0xff] }
 0x2ec   : > { %1891 = vst [vmem:[%s4985_s4 + $0x2e8] sm:$0xff] %v1469_v42  ;;  %1827 = vst [vmem:[%s4985_s4 + $0xe8] sm:$0xff] %v1437_v43 }
 0x2ef   : > { %1582 = vxpose.xlu1.b32.cont [9/16] %v1191_v44, 128  ;;  %v1470_v46 = vpop.trf.xlu1  ;;  %1550 = vxpose.xlu0.b32.cont [9/16] %v1190_v45, 128  ;;  %v1438_v47 = vpop.trf.xlu0  ;;  %v1193_v44 = vld [vmem:[%s4914_s1 + $0x518] sm:$0xff]  ;;  %v1192_v45 = vld [vmem:[%s4914_s1 + $0x510] sm:$0xff] }
 0x2f0   : > { %1895 = vst [vmem:[%s4985_s4 + $0x308] sm:$0xff] %v1470_v46  ;;  %1831 = vst [vmem:[%s4985_s4 + $0x108] sm:$0xff] %v1438_v47 }
 0x2f3   : > { %1583 = vxpose.xlu1.b32.cont [10/16] %v1195_v48, 128  ;;  %v1471_v50 = vpop.trf.xlu1  ;;  %1551 = vxpose.xlu0.b32.cont [10/16] %v1194_v49, 128  ;;  %v1439_v51 = vpop.trf.xlu0  ;;  %v1197_v48 = vld [vmem:[%s4914_s1 + $0x538] sm:$0xff]  ;;  %v1196_v49 = vld [vmem:[%s4914_s1 + $0x530] sm:$0xff] }
 0x2f4   : > { %1899 = vst [vmem:[%s4985_s4 + $0x328] sm:$0xff] %v1471_v50  ;;  %1835 = vst [vmem:[%s4985_s4 + $0x128] sm:$0xff] %v1439_v51 }
 0x2f7   : > { %1584 = vxpose.xlu1.b32.cont [11/16] %v1199_v52, 128  ;;  %v1472_v54 = vpop.trf.xlu1  ;;  %1552 = vxpose.xlu0.b32.cont [11/16] %v1198_v53, 128  ;;  %v1440_v55 = vpop.trf.xlu0  ;;  %v1201_v52 = vld [vmem:[%s4914_s1 + $0x558] sm:$0xff]  ;;  %v1200_v53 = vld [vmem:[%s4914_s1 + $0x550] sm:$0xff] }
 0x2f8   : > { %1903 = vst [vmem:[%s4985_s4 + $0x348] sm:$0xff] %v1472_v54  ;;  %1839 = vst [vmem:[%s4985_s4 + $0x148] sm:$0xff] %v1440_v55 }
 0x2fb   : > { %1585 = vxpose.xlu1.b32.cont [12/16] %v1203_v56, 128  ;;  %v1473_v58 = vpop.trf.xlu1  ;;  %1553 = vxpose.xlu0.b32.cont [12/16] %v1202_v57, 128  ;;  %v1441_v59 = vpop.trf.xlu0  ;;  %v1205_v56 = vld [vmem:[%s4914_s1 + $0x578] sm:$0xff]  ;;  %v1204_v57 = vld [vmem:[%s4914_s1 + $0x570] sm:$0xff] }
 0x2fc   : > { %1907 = vst [vmem:[%s4985_s4 + $0x368] sm:$0xff] %v1473_v58  ;;  %1843 = vst [vmem:[%s4985_s4 + $0x168] sm:$0xff] %v1441_v59 }
 0x2ff   : > { %1586 = vxpose.xlu1.b32.cont [13/16] %v1207_v60, 128  ;;  %v1474_v62 = vpop.trf.xlu1  ;;  %1554 = vxpose.xlu0.b32.cont [13/16] %v1206_v61, 128  ;;  %v1442_v63 = vpop.trf.xlu0  ;;  %v1209_v60 = vld [vmem:[%s4914_s1 + $0x598] sm:$0xff]  ;;  %v1208_v61 = vld [vmem:[%s4914_s1 + $0x590] sm:$0xff] }
 0x300   : > { %1911 = vst [vmem:[%s4985_s4 + $0x388] sm:$0xff] %v1474_v62  ;;  %1847 = vst [vmem:[%s4985_s4 + $0x188] sm:$0xff] %v1442_v63 }
 0x303   : > { %1587 = vxpose.xlu1.b32.cont [14/16] %v1211_v0, 128  ;;  %v1475_v2 = vpop.trf.xlu1  ;;  %1555 = vxpose.xlu0.b32.cont [14/16] %v1210_v1, 128  ;;  %v1443_v3 = vpop.trf.xlu0  ;;  %v1213_v0 = vld [vmem:[%s4914_s1 + $0x5b8] sm:$0xff]  ;;  %v1212_v1 = vld [vmem:[%s4914_s1 + $0x5b0] sm:$0xff] }
 0x304   : > { %1915 = vst [vmem:[%s4985_s4 + $0x3a8] sm:$0xff] %v1475_v2  ;;  %1851 = vst [vmem:[%s4985_s4 + $0x1a8] sm:$0xff] %v1443_v3 }
 0x307   : > { %1588 = vxpose.xlu1.b32.cont [15/16] %v1215_v4, 128  ;;  %v1476_v6 = vpop.trf.xlu1  ;;  %1556 = vxpose.xlu0.b32.cont [15/16] %v1214_v5, 128  ;;  %v1444_v7 = vpop.trf.xlu0  ;;  %v1217_v4 = vld [vmem:[%s4914_s1 + $0x5d8] sm:$0xff]  ;;  %v1216_v5 = vld [vmem:[%s4914_s1 + $0x5d0] sm:$0xff] }
 0x308   : > { %1919 = vst [vmem:[%s4985_s4 + $0x3c8] sm:$0xff] %v1476_v6  ;;  %1855 = vst [vmem:[%s4985_s4 + $0x1c8] sm:$0xff] %v1444_v7 }
 0x30b   : > { %1589 = vxpose.xlu1.b32.end [16/16] %v1219_v8, 128  ;;  %v1477_v10 = vpop.trf.xlu1  ;;  %1557 = vxpose.xlu0.b32.end [16/16] %v1218_v9, 128  ;;  %v1445_v11 = vpop.trf.xlu0  ;;  %v1221_v8 = vld [vmem:[%s4914_s1 + $0x5f8] sm:$0xff]  ;;  %v1220_v9 = vld [vmem:[%s4914_s1 + $0x5f0] sm:$0xff] }
 0x30c   : > { %1923 = vst [vmem:[%s4985_s4 + $0x3e8] sm:$0xff] %v1477_v10  ;;  %1859 = vst [vmem:[%s4985_s4 + $0x1e8] sm:$0xff] %v1445_v11 }
 0x30f   : > { %1638 = vxpose.xlu1.b32.start [1/16] %v1161_v12, 128  ;;  %v1526_v14 = vpop.trf.xlu1  ;;  %1606 = vxpose.xlu0.b32.start [1/16] %v1160_v13, 128  ;;  %v1494_v15 = vpop.trf.xlu0  ;;  %v1223_v12 = vld [vmem:[%s4914_s1 + $0x608] sm:$0xff]  ;;  %v1222_v13 = vld [vmem:[%s4914_s1 + $0x600] sm:$0xff] }
 0x310   : > { %1991 = vst [vmem:[%s4985_s4 + $0x608] sm:$0xff] %v1526_v14  ;;  %1927 = vst [vmem:[%s4985_s4 + $0x408] sm:$0xff] %v1494_v15 }
 0x313   : > { %1639 = vxpose.xlu1.b32.cont [2/16] %v1165_v16, 128  ;;  %v1527_v18 = vpop.trf.xlu1  ;;  %1607 = vxpose.xlu0.b32.cont [2/16] %v1164_v17, 128  ;;  %v1495_v19 = vpop.trf.xlu0  ;;  %v1227_v16 = vld [vmem:[%s4914_s1 + $0x628] sm:$0xff]  ;;  %v1226_v17 = vld [vmem:[%s4914_s1 + $0x620] sm:$0xff] }
 0x314   : > { %1995 = vst [vmem:[%s4985_s4 + $0x628] sm:$0xff] %v1527_v18  ;;  %1931 = vst [vmem:[%s4985_s4 + $0x428] sm:$0xff] %v1495_v19 }
 0x317   : > { %1640 = vxpose.xlu1.b32.cont [3/16] %v1169_v20, 128  ;;  %v1528_v22 = vpop.trf.xlu1  ;;  %1608 = vxpose.xlu0.b32.cont [3/16] %v1168_v21, 128  ;;  %v1496_v23 = vpop.trf.xlu0  ;;  %v1231_v20 = vld [vmem:[%s4914_s1 + $0x648] sm:$0xff]  ;;  %v1230_v21 = vld [vmem:[%s4914_s1 + $0x640] sm:$0xff] }
 0x318   : > { %1999 = vst [vmem:[%s4985_s4 + $0x648] sm:$0xff] %v1528_v22  ;;  %1935 = vst [vmem:[%s4985_s4 + $0x448] sm:$0xff] %v1496_v23 }
 0x31b   : > { %1641 = vxpose.xlu1.b32.cont [4/16] %v1173_v24, 128  ;;  %v1529_v26 = vpop.trf.xlu1  ;;  %1609 = vxpose.xlu0.b32.cont [4/16] %v1172_v25, 128  ;;  %v1497_v27 = vpop.trf.xlu0  ;;  %v1235_v24 = vld [vmem:[%s4914_s1 + $0x668] sm:$0xff]  ;;  %v1234_v25 = vld [vmem:[%s4914_s1 + $0x660] sm:$0xff] }
 0x31c   : > { %2003 = vst [vmem:[%s4985_s4 + $0x668] sm:$0xff] %v1529_v26  ;;  %1939 = vst [vmem:[%s4985_s4 + $0x468] sm:$0xff] %v1497_v27 }
 0x31f   : > { %1642 = vxpose.xlu1.b32.cont [5/16] %v1177_v28, 128  ;;  %v1530_v30 = vpop.trf.xlu1  ;;  %1610 = vxpose.xlu0.b32.cont [5/16] %v1176_v29, 128  ;;  %v1498_v31 = vpop.trf.xlu0  ;;  %v1239_v28 = vld [vmem:[%s4914_s1 + $0x688] sm:$0xff]  ;;  %v1238_v29 = vld [vmem:[%s4914_s1 + $0x680] sm:$0xff] }
 0x320   : > { %2007 = vst [vmem:[%s4985_s4 + $0x688] sm:$0xff] %v1530_v30  ;;  %1943 = vst [vmem:[%s4985_s4 + $0x488] sm:$0xff] %v1498_v31 }
 0x323   : > { %1643 = vxpose.xlu1.b32.cont [6/16] %v1181_v32, 128  ;;  %v1531_v34 = vpop.trf.xlu1  ;;  %1611 = vxpose.xlu0.b32.cont [6/16] %v1180_v33, 128  ;;  %v1499_v35 = vpop.trf.xlu0  ;;  %v1243_v32 = vld [vmem:[%s4914_s1 + $0x6a8] sm:$0xff]  ;;  %v1242_v33 = vld [vmem:[%s4914_s1 + $0x6a0] sm:$0xff] }
 0x324   : > { %2011 = vst [vmem:[%s4985_s4 + $0x6a8] sm:$0xff] %v1531_v34  ;;  %1947 = vst [vmem:[%s4985_s4 + $0x4a8] sm:$0xff] %v1499_v35 }
 0x327   : > { %1644 = vxpose.xlu1.b32.cont [7/16] %v1185_v36, 128  ;;  %v1532_v38 = vpop.trf.xlu1  ;;  %1612 = vxpose.xlu0.b32.cont [7/16] %v1184_v37, 128  ;;  %v1500_v39 = vpop.trf.xlu0  ;;  %v1247_v36 = vld [vmem:[%s4914_s1 + $0x6c8] sm:$0xff]  ;;  %v1246_v37 = vld [vmem:[%s4914_s1 + $0x6c0] sm:$0xff] }
 0x328   : > { %2015 = vst [vmem:[%s4985_s4 + $0x6c8] sm:$0xff] %v1532_v38  ;;  %1951 = vst [vmem:[%s4985_s4 + $0x4c8] sm:$0xff] %v1500_v39 }
 0x32b   : > { %1645 = vxpose.xlu1.b32.cont [8/16] %v1189_v40, 128  ;;  %v1533_v42 = vpop.trf.xlu1  ;;  %1613 = vxpose.xlu0.b32.cont [8/16] %v1188_v41, 128  ;;  %v1501_v43 = vpop.trf.xlu0  ;;  %v1251_v40 = vld [vmem:[%s4914_s1 + $0x6e8] sm:$0xff]  ;;  %v1250_v41 = vld [vmem:[%s4914_s1 + $0x6e0] sm:$0xff] }
 0x32c   : > { %2019 = vst [vmem:[%s4985_s4 + $0x6e8] sm:$0xff] %v1533_v42  ;;  %1955 = vst [vmem:[%s4985_s4 + $0x4e8] sm:$0xff] %v1501_v43 }
 0x32f   : > { %1646 = vxpose.xlu1.b32.cont [9/16] %v1193_v44, 128  ;;  %v1534_v46 = vpop.trf.xlu1  ;;  %1614 = vxpose.xlu0.b32.cont [9/16] %v1192_v45, 128  ;;  %v1502_v47 = vpop.trf.xlu0  ;;  %v1255_v44 = vld [vmem:[%s4914_s1 + $0x708] sm:$0xff]  ;;  %v1254_v45 = vld [vmem:[%s4914_s1 + $0x700] sm:$0xff] }
 0x330   : > { %2023 = vst [vmem:[%s4985_s4 + $0x708] sm:$0xff] %v1534_v46  ;;  %1959 = vst [vmem:[%s4985_s4 + $0x508] sm:$0xff] %v1502_v47 }
 0x333   : > { %1647 = vxpose.xlu1.b32.cont [10/16] %v1197_v48, 128  ;;  %v1535_v50 = vpop.trf.xlu1  ;;  %1615 = vxpose.xlu0.b32.cont [10/16] %v1196_v49, 128  ;;  %v1503_v51 = vpop.trf.xlu0  ;;  %v1259_v48 = vld [vmem:[%s4914_s1 + $0x728] sm:$0xff]  ;;  %v1258_v49 = vld [vmem:[%s4914_s1 + $0x720] sm:$0xff] }
 0x334   : > { %2027 = vst [vmem:[%s4985_s4 + $0x728] sm:$0xff] %v1535_v50  ;;  %1963 = vst [vmem:[%s4985_s4 + $0x528] sm:$0xff] %v1503_v51 }
 0x337   : > { %1648 = vxpose.xlu1.b32.cont [11/16] %v1201_v52, 128  ;;  %v1536_v54 = vpop.trf.xlu1  ;;  %1616 = vxpose.xlu0.b32.cont [11/16] %v1200_v53, 128  ;;  %v1504_v55 = vpop.trf.xlu0  ;;  %v1263_v52 = vld [vmem:[%s4914_s1 + $0x748] sm:$0xff]  ;;  %v1262_v53 = vld [vmem:[%s4914_s1 + $0x740] sm:$0xff] }
 0x338   : > { %2031 = vst [vmem:[%s4985_s4 + $0x748] sm:$0xff] %v1536_v54  ;;  %1967 = vst [vmem:[%s4985_s4 + $0x548] sm:$0xff] %v1504_v55 }
 0x33b   : > { %1649 = vxpose.xlu1.b32.cont [12/16] %v1205_v56, 128  ;;  %v1537_v58 = vpop.trf.xlu1  ;;  %1617 = vxpose.xlu0.b32.cont [12/16] %v1204_v57, 128  ;;  %v1505_v59 = vpop.trf.xlu0  ;;  %v1267_v56 = vld [vmem:[%s4914_s1 + $0x768] sm:$0xff]  ;;  %v1266_v57 = vld [vmem:[%s4914_s1 + $0x760] sm:$0xff] }
 0x33c   : > { %2035 = vst [vmem:[%s4985_s4 + $0x768] sm:$0xff] %v1537_v58  ;;  %1971 = vst [vmem:[%s4985_s4 + $0x568] sm:$0xff] %v1505_v59 }
 0x33f   : > { %1650 = vxpose.xlu1.b32.cont [13/16] %v1209_v60, 128  ;;  %v1538_v62 = vpop.trf.xlu1  ;;  %1618 = vxpose.xlu0.b32.cont [13/16] %v1208_v61, 128  ;;  %v1506_v63 = vpop.trf.xlu0  ;;  %v1271_v60 = vld [vmem:[%s4914_s1 + $0x788] sm:$0xff]  ;;  %v1270_v61 = vld [vmem:[%s4914_s1 + $0x780] sm:$0xff] }
 0x340   : > { %2039 = vst [vmem:[%s4985_s4 + $0x788] sm:$0xff] %v1538_v62  ;;  %1975 = vst [vmem:[%s4985_s4 + $0x588] sm:$0xff] %v1506_v63 }
 0x343   : > { %1651 = vxpose.xlu1.b32.cont [14/16] %v1213_v0, 128  ;;  %v1539_v2 = vpop.trf.xlu1  ;;  %1619 = vxpose.xlu0.b32.cont [14/16] %v1212_v1, 128  ;;  %v1507_v3 = vpop.trf.xlu0  ;;  %v1275_v0 = vld [vmem:[%s4914_s1 + $0x7a8] sm:$0xff]  ;;  %v1274_v1 = vld [vmem:[%s4914_s1 + $0x7a0] sm:$0xff] }
 0x344   : > { %2043 = vst [vmem:[%s4985_s4 + $0x7a8] sm:$0xff] %v1539_v2  ;;  %1979 = vst [vmem:[%s4985_s4 + $0x5a8] sm:$0xff] %v1507_v3 }
 0x347   : > { %1652 = vxpose.xlu1.b32.cont [15/16] %v1217_v4, 128  ;;  %v1540_v6 = vpop.trf.xlu1  ;;  %1620 = vxpose.xlu0.b32.cont [15/16] %v1216_v5, 128  ;;  %v1508_v7 = vpop.trf.xlu0  ;;  %v1279_v4 = vld [vmem:[%s4914_s1 + $0x7c8] sm:$0xff]  ;;  %v1278_v5 = vld [vmem:[%s4914_s1 + $0x7c0] sm:$0xff] }
 0x348   : > { %2047 = vst [vmem:[%s4985_s4 + $0x7c8] sm:$0xff] %v1540_v6  ;;  %1983 = vst [vmem:[%s4985_s4 + $0x5c8] sm:$0xff] %v1508_v7 }
 0x34b   : > { %1653 = vxpose.xlu1.b32.end [16/16] %v1221_v8, 128  ;;  %v1541_v10 = vpop.trf.xlu1  ;;  %1621 = vxpose.xlu0.b32.end [16/16] %v1220_v9, 128  ;;  %v1509_v11 = vpop.trf.xlu0  ;;  %v1283_v8 = vld [vmem:[%s4914_s1 + $0x7e8] sm:$0xff]  ;;  %v1282_v9 = vld [vmem:[%s4914_s1 + $0x7e0] sm:$0xff] }
 0x34c   : > { %2051 = vst [vmem:[%s4985_s4 + $0x7e8] sm:$0xff] %v1541_v10  ;;  %1987 = vst [vmem:[%s4985_s4 + $0x5e8] sm:$0xff] %v1509_v11 }
 0x34f   : > { %1702 = vxpose.xlu1.b32.start [1/16] %v1223_v12, 128  ;;  %v1590_v14 = vpop.trf.xlu1  ;;  %1670 = vxpose.xlu0.b32.start [1/16] %v1222_v13, 128  ;;  %v1558_v15 = vpop.trf.xlu0  ;;  %v1225_v12 = vld [vmem:[%s4914_s1 + $0x618] sm:$0xff]  ;;  %v1224_v13 = vld [vmem:[%s4914_s1 + $0x610] sm:$0xff] }
 0x350   : > { %1864 = vst [vmem:[%s4985_s4 + $0x210] sm:$0xff] %v1590_v14  ;;  %1800 = vst [vmem:[%s4985_s4 + $0x10] sm:$0xff] %v1558_v15 }
 0x353   : > { %1703 = vxpose.xlu1.b32.cont [2/16] %v1227_v16, 128  ;;  %v1591_v18 = vpop.trf.xlu1  ;;  %1671 = vxpose.xlu0.b32.cont [2/16] %v1226_v17, 128  ;;  %v1559_v19 = vpop.trf.xlu0  ;;  %v1229_v16 = vld [vmem:[%s4914_s1 + $0x638] sm:$0xff]  ;;  %v1228_v17 = vld [vmem:[%s4914_s1 + $0x630] sm:$0xff] }
 0x354   : > { %1868 = vst [vmem:[%s4985_s4 + $0x230] sm:$0xff] %v1591_v18  ;;  %1804 = vst [vmem:[%s4985_s4 + $0x30] sm:$0xff] %v1559_v19 }
 0x357   : > { %1704 = vxpose.xlu1.b32.cont [3/16] %v1231_v20, 128  ;;  %v1592_v22 = vpop.trf.xlu1  ;;  %1672 = vxpose.xlu0.b32.cont [3/16] %v1230_v21, 128  ;;  %v1560_v23 = vpop.trf.xlu0  ;;  %v1233_v20 = vld [vmem:[%s4914_s1 + $0x658] sm:$0xff]  ;;  %v1232_v21 = vld [vmem:[%s4914_s1 + $0x650] sm:$0xff] }
 0x358   : > { %1872 = vst [vmem:[%s4985_s4 + $0x250] sm:$0xff] %v1592_v22  ;;  %1808 = vst [vmem:[%s4985_s4 + $0x50] sm:$0xff] %v1560_v23 }
 0x35b   : > { %1705 = vxpose.xlu1.b32.cont [4/16] %v1235_v24, 128  ;;  %v1593_v26 = vpop.trf.xlu1  ;;  %1673 = vxpose.xlu0.b32.cont [4/16] %v1234_v25, 128  ;;  %v1561_v27 = vpop.trf.xlu0  ;;  %v1237_v24 = vld [vmem:[%s4914_s1 + $0x678] sm:$0xff]  ;;  %v1236_v25 = vld [vmem:[%s4914_s1 + $0x670] sm:$0xff] }
 0x35c   : > { %1876 = vst [vmem:[%s4985_s4 + $0x270] sm:$0xff] %v1593_v26  ;;  %1812 = vst [vmem:[%s4985_s4 + $0x70] sm:$0xff] %v1561_v27 }
 0x35f   : > { %1706 = vxpose.xlu1.b32.cont [5/16] %v1239_v28, 128  ;;  %v1594_v30 = vpop.trf.xlu1  ;;  %1674 = vxpose.xlu0.b32.cont [5/16] %v1238_v29, 128  ;;  %v1562_v31 = vpop.trf.xlu0  ;;  %v1241_v28 = vld [vmem:[%s4914_s1 + $0x698] sm:$0xff]  ;;  %v1240_v29 = vld [vmem:[%s4914_s1 + $0x690] sm:$0xff] }
 0x360   : > { %1880 = vst [vmem:[%s4985_s4 + $0x290] sm:$0xff] %v1594_v30  ;;  %1816 = vst [vmem:[%s4985_s4 + $0x90] sm:$0xff] %v1562_v31 }
 0x363   : > { %1707 = vxpose.xlu1.b32.cont [6/16] %v1243_v32, 128  ;;  %v1595_v34 = vpop.trf.xlu1  ;;  %1675 = vxpose.xlu0.b32.cont [6/16] %v1242_v33, 128  ;;  %v1563_v35 = vpop.trf.xlu0  ;;  %v1245_v32 = vld [vmem:[%s4914_s1 + $0x6b8] sm:$0xff]  ;;  %v1244_v33 = vld [vmem:[%s4914_s1 + $0x6b0] sm:$0xff] }
 0x364   : > { %1884 = vst [vmem:[%s4985_s4 + $0x2b0] sm:$0xff] %v1595_v34  ;;  %1820 = vst [vmem:[%s4985_s4 + $0xb0] sm:$0xff] %v1563_v35 }
 0x367   : > { %1708 = vxpose.xlu1.b32.cont [7/16] %v1247_v36, 128  ;;  %v1596_v38 = vpop.trf.xlu1  ;;  %1676 = vxpose.xlu0.b32.cont [7/16] %v1246_v37, 128  ;;  %v1564_v39 = vpop.trf.xlu0  ;;  %v1249_v36 = vld [vmem:[%s4914_s1 + $0x6d8] sm:$0xff]  ;;  %v1248_v37 = vld [vmem:[%s4914_s1 + $0x6d0] sm:$0xff] }
 0x368   : > { %1888 = vst [vmem:[%s4985_s4 + $0x2d0] sm:$0xff] %v1596_v38  ;;  %1824 = vst [vmem:[%s4985_s4 + $0xd0] sm:$0xff] %v1564_v39 }
 0x36b   : > { %1709 = vxpose.xlu1.b32.cont [8/16] %v1251_v40, 128  ;;  %v1597_v42 = vpop.trf.xlu1  ;;  %1677 = vxpose.xlu0.b32.cont [8/16] %v1250_v41, 128  ;;  %v1565_v43 = vpop.trf.xlu0  ;;  %v1253_v40 = vld [vmem:[%s4914_s1 + $0x6f8] sm:$0xff]  ;;  %v1252_v41 = vld [vmem:[%s4914_s1 + $0x6f0] sm:$0xff] }
 0x36c   : > { %1892 = vst [vmem:[%s4985_s4 + $0x2f0] sm:$0xff] %v1597_v42  ;;  %1828 = vst [vmem:[%s4985_s4 + $0xf0] sm:$0xff] %v1565_v43 }
 0x36f   : > { %1710 = vxpose.xlu1.b32.cont [9/16] %v1255_v44, 128  ;;  %v1598_v46 = vpop.trf.xlu1  ;;  %1678 = vxpose.xlu0.b32.cont [9/16] %v1254_v45, 128  ;;  %v1566_v47 = vpop.trf.xlu0  ;;  %v1257_v44 = vld [vmem:[%s4914_s1 + $0x718] sm:$0xff]  ;;  %v1256_v45 = vld [vmem:[%s4914_s1 + $0x710] sm:$0xff] }
 0x370   : > { %1896 = vst [vmem:[%s4985_s4 + $0x310] sm:$0xff] %v1598_v46  ;;  %1832 = vst [vmem:[%s4985_s4 + $0x110] sm:$0xff] %v1566_v47 }
 0x373   : > { %1711 = vxpose.xlu1.b32.cont [10/16] %v1259_v48, 128  ;;  %v1599_v50 = vpop.trf.xlu1  ;;  %1679 = vxpose.xlu0.b32.cont [10/16] %v1258_v49, 128  ;;  %v1567_v51 = vpop.trf.xlu0  ;;  %v1261_v48 = vld [vmem:[%s4914_s1 + $0x738] sm:$0xff]  ;;  %v1260_v49 = vld [vmem:[%s4914_s1 + $0x730] sm:$0xff] }
 0x374   : > { %1900 = vst [vmem:[%s4985_s4 + $0x330] sm:$0xff] %v1599_v50  ;;  %1836 = vst [vmem:[%s4985_s4 + $0x130] sm:$0xff] %v1567_v51 }
 0x377   : > { %1712 = vxpose.xlu1.b32.cont [11/16] %v1263_v52, 128  ;;  %v1600_v54 = vpop.trf.xlu1  ;;  %1680 = vxpose.xlu0.b32.cont [11/16] %v1262_v53, 128  ;;  %v1568_v55 = vpop.trf.xlu0  ;;  %v1265_v52 = vld [vmem:[%s4914_s1 + $0x758] sm:$0xff]  ;;  %v1264_v53 = vld [vmem:[%s4914_s1 + $0x750] sm:$0xff] }
 0x378   : > { %1904 = vst [vmem:[%s4985_s4 + $0x350] sm:$0xff] %v1600_v54  ;;  %1840 = vst [vmem:[%s4985_s4 + $0x150] sm:$0xff] %v1568_v55 }
 0x37b   : > { %1713 = vxpose.xlu1.b32.cont [12/16] %v1267_v56, 128  ;;  %v1601_v58 = vpop.trf.xlu1  ;;  %1681 = vxpose.xlu0.b32.cont [12/16] %v1266_v57, 128  ;;  %v1569_v59 = vpop.trf.xlu0  ;;  %v1269_v56 = vld [vmem:[%s4914_s1 + $0x778] sm:$0xff]  ;;  %v1268_v57 = vld [vmem:[%s4914_s1 + $0x770] sm:$0xff] }
 0x37c   : > { %1908 = vst [vmem:[%s4985_s4 + $0x370] sm:$0xff] %v1601_v58  ;;  %1844 = vst [vmem:[%s4985_s4 + $0x170] sm:$0xff] %v1569_v59 }
 0x37f   : > { %1714 = vxpose.xlu1.b32.cont [13/16] %v1271_v60, 128  ;;  %v1602_v62 = vpop.trf.xlu1  ;;  %1682 = vxpose.xlu0.b32.cont [13/16] %v1270_v61, 128  ;;  %v1570_v63 = vpop.trf.xlu0  ;;  %v1273_v60 = vld [vmem:[%s4914_s1 + $0x798] sm:$0xff]  ;;  %v1272_v61 = vld [vmem:[%s4914_s1 + $0x790] sm:$0xff] }
 0x380   : > { %1912 = vst [vmem:[%s4985_s4 + $0x390] sm:$0xff] %v1602_v62  ;;  %1848 = vst [vmem:[%s4985_s4 + $0x190] sm:$0xff] %v1570_v63 }
 0x383   : > { %1715 = vxpose.xlu1.b32.cont [14/16] %v1275_v0, 128  ;;  %v1603_v2 = vpop.trf.xlu1  ;;  %1683 = vxpose.xlu0.b32.cont [14/16] %v1274_v1, 128  ;;  %v1571_v3 = vpop.trf.xlu0  ;;  %v1277_v0 = vld [vmem:[%s4914_s1 + $0x7b8] sm:$0xff]  ;;  %v1276_v1 = vld [vmem:[%s4914_s1 + $0x7b0] sm:$0xff] }
 0x384   : > { %1916 = vst [vmem:[%s4985_s4 + $0x3b0] sm:$0xff] %v1603_v2  ;;  %1852 = vst [vmem:[%s4985_s4 + $0x1b0] sm:$0xff] %v1571_v3 }
 0x387   : > { %1716 = vxpose.xlu1.b32.cont [15/16] %v1279_v4, 128  ;;  %v1604_v6 = vpop.trf.xlu1  ;;  %1684 = vxpose.xlu0.b32.cont [15/16] %v1278_v5, 128  ;;  %v1572_v7 = vpop.trf.xlu0  ;;  %v1281_v4 = vld [vmem:[%s4914_s1 + $0x7d8] sm:$0xff]  ;;  %v1280_v5 = vld [vmem:[%s4914_s1 + $0x7d0] sm:$0xff] }
 0x388   : > { %1920 = vst [vmem:[%s4985_s4 + $0x3d0] sm:$0xff] %v1604_v6  ;;  %1856 = vst [vmem:[%s4985_s4 + $0x1d0] sm:$0xff] %v1572_v7 }
 0x38b   : > { %1717 = vxpose.xlu1.b32.end [16/16] %v1283_v8, 128  ;;  %v1605_v10 = vpop.trf.xlu1  ;;  %1685 = vxpose.xlu0.b32.end [16/16] %v1282_v9, 128  ;;  %v1573_v11 = vpop.trf.xlu0  ;;  %v1285_v8 = vld [vmem:[%s4914_s1 + $0x7f8] sm:$0xff]  ;;  %v1284_v9 = vld [vmem:[%s4914_s1 + $0x7f0] sm:$0xff] }
 0x38c   : > { %1924 = vst [vmem:[%s4985_s4 + $0x3f0] sm:$0xff] %v1605_v10  ;;  %1860 = vst [vmem:[%s4985_s4 + $0x1f0] sm:$0xff] %v1573_v11 }
 0x38f   : > { %1766 = vxpose.xlu1.b32.start [1/16] %v1225_v12, 128  ;;  %v1654_v14 = vpop.trf.xlu1  ;;  %1734 = vxpose.xlu0.b32.start [1/16] %v1224_v13, 128  ;;  %v1622_v15 = vpop.trf.xlu0 }
 0x390   : > { %1992 = vst [vmem:[%s4985_s4 + $0x610] sm:$0xff] %v1654_v14  ;;  %1928 = vst [vmem:[%s4985_s4 + $0x410] sm:$0xff] %v1622_v15 }
 0x393   : > { %1767 = vxpose.xlu1.b32.cont [2/16] %v1229_v16, 128  ;;  %v1655_v18 = vpop.trf.xlu1  ;;  %1735 = vxpose.xlu0.b32.cont [2/16] %v1228_v17, 128  ;;  %v1623_v19 = vpop.trf.xlu0 }
 0x394   : > { %1996 = vst [vmem:[%s4985_s4 + $0x630] sm:$0xff] %v1655_v18  ;;  %1932 = vst [vmem:[%s4985_s4 + $0x430] sm:$0xff] %v1623_v19 }
 0x397   : > { %1768 = vxpose.xlu1.b32.cont [3/16] %v1233_v20, 128  ;;  %v1656_v22 = vpop.trf.xlu1  ;;  %1736 = vxpose.xlu0.b32.cont [3/16] %v1232_v21, 128  ;;  %v1624_v23 = vpop.trf.xlu0 }
 0x398   : > { %2000 = vst [vmem:[%s4985_s4 + $0x650] sm:$0xff] %v1656_v22  ;;  %1936 = vst [vmem:[%s4985_s4 + $0x450] sm:$0xff] %v1624_v23 }
 0x39b   : > { %1769 = vxpose.xlu1.b32.cont [4/16] %v1237_v24, 128  ;;  %v1657_v26 = vpop.trf.xlu1  ;;  %1737 = vxpose.xlu0.b32.cont [4/16] %v1236_v25, 128  ;;  %v1625_v27 = vpop.trf.xlu0 }
 0x39c   : > { %2004 = vst [vmem:[%s4985_s4 + $0x670] sm:$0xff] %v1657_v26  ;;  %1940 = vst [vmem:[%s4985_s4 + $0x470] sm:$0xff] %v1625_v27 }
 0x39f   : > { %1770 = vxpose.xlu1.b32.cont [5/16] %v1241_v28, 128  ;;  %v1658_v30 = vpop.trf.xlu1  ;;  %1738 = vxpose.xlu0.b32.cont [5/16] %v1240_v29, 128  ;;  %v1626_v31 = vpop.trf.xlu0 }
 0x3a0   : > { %2008 = vst [vmem:[%s4985_s4 + $0x690] sm:$0xff] %v1658_v30  ;;  %1944 = vst [vmem:[%s4985_s4 + $0x490] sm:$0xff] %v1626_v31 }
 0x3a3   : > { %1771 = vxpose.xlu1.b32.cont [6/16] %v1245_v32, 128  ;;  %v1659_v34 = vpop.trf.xlu1  ;;  %1739 = vxpose.xlu0.b32.cont [6/16] %v1244_v33, 128  ;;  %v1627_v35 = vpop.trf.xlu0 }
 0x3a4   : > { %2012 = vst [vmem:[%s4985_s4 + $0x6b0] sm:$0xff] %v1659_v34  ;;  %1948 = vst [vmem:[%s4985_s4 + $0x4b0] sm:$0xff] %v1627_v35 }
 0x3a7   : > { %1772 = vxpose.xlu1.b32.cont [7/16] %v1249_v36, 128  ;;  %v1660_v38 = vpop.trf.xlu1  ;;  %1740 = vxpose.xlu0.b32.cont [7/16] %v1248_v37, 128  ;;  %v1628_v39 = vpop.trf.xlu0 }
 0x3a8   : > { %2016 = vst [vmem:[%s4985_s4 + $0x6d0] sm:$0xff] %v1660_v38  ;;  %1952 = vst [vmem:[%s4985_s4 + $0x4d0] sm:$0xff] %v1628_v39 }
 0x3ab   : > { %1773 = vxpose.xlu1.b32.cont [8/16] %v1253_v40, 128  ;;  %v1661_v42 = vpop.trf.xlu1  ;;  %1741 = vxpose.xlu0.b32.cont [8/16] %v1252_v41, 128  ;;  %v1629_v43 = vpop.trf.xlu0 }
 0x3ac   : > { %2020 = vst [vmem:[%s4985_s4 + $0x6f0] sm:$0xff] %v1661_v42  ;;  %1956 = vst [vmem:[%s4985_s4 + $0x4f0] sm:$0xff] %v1629_v43 }
 0x3af   : > { %1774 = vxpose.xlu1.b32.cont [9/16] %v1257_v44, 128  ;;  %v1662_v46 = vpop.trf.xlu1  ;;  %1742 = vxpose.xlu0.b32.cont [9/16] %v1256_v45, 128  ;;  %v1630_v47 = vpop.trf.xlu0 }
 0x3b0   : > { %2024 = vst [vmem:[%s4985_s4 + $0x710] sm:$0xff] %v1662_v46  ;;  %1960 = vst [vmem:[%s4985_s4 + $0x510] sm:$0xff] %v1630_v47 }
 0x3b3   : > { %1775 = vxpose.xlu1.b32.cont [10/16] %v1261_v48, 128  ;;  %v1663_v50 = vpop.trf.xlu1  ;;  %1743 = vxpose.xlu0.b32.cont [10/16] %v1260_v49, 128  ;;  %v1631_v51 = vpop.trf.xlu0 }
 0x3b4   : > { %2028 = vst [vmem:[%s4985_s4 + $0x730] sm:$0xff] %v1663_v50  ;;  %1964 = vst [vmem:[%s4985_s4 + $0x530] sm:$0xff] %v1631_v51 }
 0x3b7   : > { %1776 = vxpose.xlu1.b32.cont [11/16] %v1265_v52, 128  ;;  %v1664_v54 = vpop.trf.xlu1  ;;  %1744 = vxpose.xlu0.b32.cont [11/16] %v1264_v53, 128  ;;  %v1632_v55 = vpop.trf.xlu0 }
 0x3b8   : > { %2032 = vst [vmem:[%s4985_s4 + $0x750] sm:$0xff] %v1664_v54  ;;  %1968 = vst [vmem:[%s4985_s4 + $0x550] sm:$0xff] %v1632_v55 }
 0x3bb   : > { %1777 = vxpose.xlu1.b32.cont [12/16] %v1269_v56, 128  ;;  %v1665_v58 = vpop.trf.xlu1  ;;  %1745 = vxpose.xlu0.b32.cont [12/16] %v1268_v57, 128  ;;  %v1633_v59 = vpop.trf.xlu0 }
 0x3bc   : > { %2036 = vst [vmem:[%s4985_s4 + $0x770] sm:$0xff] %v1665_v58  ;;  %1972 = vst [vmem:[%s4985_s4 + $0x570] sm:$0xff] %v1633_v59 }
 0x3bf   : > { %1778 = vxpose.xlu1.b32.cont [13/16] %v1273_v60, 128  ;;  %v1666_v62 = vpop.trf.xlu1  ;;  %1746 = vxpose.xlu0.b32.cont [13/16] %v1272_v61, 128  ;;  %v1634_v63 = vpop.trf.xlu0 }
 0x3c0   : > { %2040 = vst [vmem:[%s4985_s4 + $0x790] sm:$0xff] %v1666_v62  ;;  %1976 = vst [vmem:[%s4985_s4 + $0x590] sm:$0xff] %v1634_v63 }
 0x3c3   : > { %1779 = vxpose.xlu1.b32.cont [14/16] %v1277_v0, 128  ;;  %v1667_v2 = vpop.trf.xlu1  ;;  %1747 = vxpose.xlu0.b32.cont [14/16] %v1276_v1, 128  ;;  %v1635_v3 = vpop.trf.xlu0 }
 0x3c4   : > { %2044 = vst [vmem:[%s4985_s4 + $0x7b0] sm:$0xff] %v1667_v2  ;;  %1980 = vst [vmem:[%s4985_s4 + $0x5b0] sm:$0xff] %v1635_v3 }
 0x3c7   : > { %1780 = vxpose.xlu1.b32.cont [15/16] %v1281_v4, 128  ;;  %v1668_v6 = vpop.trf.xlu1  ;;  %1748 = vxpose.xlu0.b32.cont [15/16] %v1280_v5, 128  ;;  %v1636_v7 = vpop.trf.xlu0 }
 0x3c8   : > { %2048 = vst [vmem:[%s4985_s4 + $0x7d0] sm:$0xff] %v1668_v6  ;;  %1984 = vst [vmem:[%s4985_s4 + $0x5d0] sm:$0xff] %v1636_v7 }
 0x3cb   : > { %1781 = vxpose.xlu1.b32.end [16/16] %v1285_v8, 128  ;;  %v1669_v10 = vpop.trf.xlu1  ;;  %1749 = vxpose.xlu0.b32.end [16/16] %v1284_v9, 128  ;;  %v1637_v11 = vpop.trf.xlu0 }
 0x3cc   : > { %2052 = vst [vmem:[%s4985_s4 + $0x7f0] sm:$0xff] %v1669_v10  ;;  %1988 = vst [vmem:[%s4985_s4 + $0x5f0] sm:$0xff] %v1637_v11 }
 0x3cf   : > { %v1718_v12 = vpop.trf.xlu1  ;;  %v1686_v13 = vpop.trf.xlu0 }
 0x3d0   : > { %1865 = vst [vmem:[%s4985_s4 + $0x218] sm:$0xff] %v1718_v12  ;;  %1801 = vst [vmem:[%s4985_s4 + $0x18] sm:$0xff] %v1686_v13 }
 0x3d3   : > { %v1719_v14 = vpop.trf.xlu1  ;;  %v1687_v15 = vpop.trf.xlu0 }
 0x3d4   : > { %1869 = vst [vmem:[%s4985_s4 + $0x238] sm:$0xff] %v1719_v14  ;;  %1805 = vst [vmem:[%s4985_s4 + $0x38] sm:$0xff] %v1687_v15 }
 0x3d7   : > { %v1720_v16 = vpop.trf.xlu1  ;;  %v1688_v17 = vpop.trf.xlu0 }
 0x3d8   : > { %1873 = vst [vmem:[%s4985_s4 + $0x258] sm:$0xff] %v1720_v16  ;;  %1809 = vst [vmem:[%s4985_s4 + $0x58] sm:$0xff] %v1688_v17 }
 0x3db   : > { %v1721_v18 = vpop.trf.xlu1  ;;  %v1689_v19 = vpop.trf.xlu0 }
 0x3dc   : > { %1877 = vst [vmem:[%s4985_s4 + $0x278] sm:$0xff] %v1721_v18  ;;  %1813 = vst [vmem:[%s4985_s4 + $0x78] sm:$0xff] %v1689_v19 }
 0x3df   : > { %v1722_v20 = vpop.trf.xlu1  ;;  %v1690_v21 = vpop.trf.xlu0 }
 0x3e0   : > { %1881 = vst [vmem:[%s4985_s4 + $0x298] sm:$0xff] %v1722_v20  ;;  %1817 = vst [vmem:[%s4985_s4 + $0x98] sm:$0xff] %v1690_v21 }
 0x3e3   : > { %v1723_v22 = vpop.trf.xlu1  ;;  %v1691_v23 = vpop.trf.xlu0 }
 0x3e4   : > { %1885 = vst [vmem:[%s4985_s4 + $0x2b8] sm:$0xff] %v1723_v22  ;;  %1821 = vst [vmem:[%s4985_s4 + $0xb8] sm:$0xff] %v1691_v23 }
 0x3e7   : > { %v1724_v24 = vpop.trf.xlu1  ;;  %v1692_v25 = vpop.trf.xlu0 }
 0x3e8   : > { %1889 = vst [vmem:[%s4985_s4 + $0x2d8] sm:$0xff] %v1724_v24  ;;  %1825 = vst [vmem:[%s4985_s4 + $0xd8] sm:$0xff] %v1692_v25 }
 0x3eb   : > { %v1725_v26 = vpop.trf.xlu1  ;;  %v1693_v27 = vpop.trf.xlu0 }
 0x3ec   : > { %1893 = vst [vmem:[%s4985_s4 + $0x2f8] sm:$0xff] %v1725_v26  ;;  %1829 = vst [vmem:[%s4985_s4 + $0xf8] sm:$0xff] %v1693_v27 }
 0x3ef   : > { %v1726_v28 = vpop.trf.xlu1  ;;  %v1694_v29 = vpop.trf.xlu0 }
 0x3f0   : > { %1897 = vst [vmem:[%s4985_s4 + $0x318] sm:$0xff] %v1726_v28  ;;  %1833 = vst [vmem:[%s4985_s4 + $0x118] sm:$0xff] %v1694_v29 }
 0x3f3   : > { %v1727_v30 = vpop.trf.xlu1  ;;  %v1695_v31 = vpop.trf.xlu0 }
 0x3f4   : > { %1901 = vst [vmem:[%s4985_s4 + $0x338] sm:$0xff] %v1727_v30  ;;  %1837 = vst [vmem:[%s4985_s4 + $0x138] sm:$0xff] %v1695_v31 }
 0x3f7   : > { %v1728_v32 = vpop.trf.xlu1  ;;  %v1696_v33 = vpop.trf.xlu0 }
 0x3f8   : > { %1905 = vst [vmem:[%s4985_s4 + $0x358] sm:$0xff] %v1728_v32  ;;  %1841 = vst [vmem:[%s4985_s4 + $0x158] sm:$0xff] %v1696_v33 }
 0x3fb   : > { %v1729_v34 = vpop.trf.xlu1  ;;  %v1697_v35 = vpop.trf.xlu0 }
 0x3fc   : > { %1909 = vst [vmem:[%s4985_s4 + $0x378] sm:$0xff] %v1729_v34  ;;  %1845 = vst [vmem:[%s4985_s4 + $0x178] sm:$0xff] %v1697_v35 }
 0x3ff   : > { %v1730_v36 = vpop.trf.xlu1  ;;  %v1698_v37 = vpop.trf.xlu0 }
 0x400   : > { %1913 = vst [vmem:[%s4985_s4 + $0x398] sm:$0xff] %v1730_v36  ;;  %1849 = vst [vmem:[%s4985_s4 + $0x198] sm:$0xff] %v1698_v37 }
 0x403   : > { %v1731_v38 = vpop.trf.xlu1  ;;  %v1699_v39 = vpop.trf.xlu0 }
 0x404   : > { %1917 = vst [vmem:[%s4985_s4 + $0x3b8] sm:$0xff] %v1731_v38  ;;  %1853 = vst [vmem:[%s4985_s4 + $0x1b8] sm:$0xff] %v1699_v39 }
 0x407   : > { %v1732_v40 = vpop.trf.xlu1  ;;  %v1700_v41 = vpop.trf.xlu0 }
 0x408   : > { %1921 = vst [vmem:[%s4985_s4 + $0x3d8] sm:$0xff] %v1732_v40  ;;  %1857 = vst [vmem:[%s4985_s4 + $0x1d8] sm:$0xff] %v1700_v41 }
 0x40b   : > { %v1733_v42 = vpop.trf.xlu1  ;;  %v1701_v43 = vpop.trf.xlu0 }
 0x40c   : > { %1925 = vst [vmem:[%s4985_s4 + $0x3f8] sm:$0xff] %v1733_v42  ;;  %1861 = vst [vmem:[%s4985_s4 + $0x1f8] sm:$0xff] %v1701_v43 }
 0x40f   : > { %v1782_v44 = vpop.trf.xlu1  ;;  %v1750_v45 = vpop.trf.xlu0 }
 0x410   : > { %1993 = vst [vmem:[%s4985_s4 + $0x618] sm:$0xff] %v1782_v44  ;;  %1929 = vst [vmem:[%s4985_s4 + $0x418] sm:$0xff] %v1750_v45 }
 0x413   : > { %v1783_v46 = vpop.trf.xlu1  ;;  %v1751_v47 = vpop.trf.xlu0 }
 0x414   : > { %1997 = vst [vmem:[%s4985_s4 + $0x638] sm:$0xff] %v1783_v46  ;;  %1933 = vst [vmem:[%s4985_s4 + $0x438] sm:$0xff] %v1751_v47 }
 0x417   : > { %v1784_v48 = vpop.trf.xlu1  ;;  %v1752_v49 = vpop.trf.xlu0 }
 0x418   : > { %2001 = vst [vmem:[%s4985_s4 + $0x658] sm:$0xff] %v1784_v48  ;;  %1937 = vst [vmem:[%s4985_s4 + $0x458] sm:$0xff] %v1752_v49 }
 0x41b   : > { %v1785_v50 = vpop.trf.xlu1  ;;  %v1753_v51 = vpop.trf.xlu0 }
 0x41c   : > { %2005 = vst [vmem:[%s4985_s4 + $0x678] sm:$0xff] %v1785_v50  ;;  %1941 = vst [vmem:[%s4985_s4 + $0x478] sm:$0xff] %v1753_v51 }
 0x41f   : > { %v1786_v52 = vpop.trf.xlu1  ;;  %v1754_v53 = vpop.trf.xlu0 }
 0x420   : > { %2009 = vst [vmem:[%s4985_s4 + $0x698] sm:$0xff] %v1786_v52  ;;  %1945 = vst [vmem:[%s4985_s4 + $0x498] sm:$0xff] %v1754_v53 }
 0x423   : > { %v1787_v54 = vpop.trf.xlu1  ;;  %v1755_v55 = vpop.trf.xlu0 }
 0x424   : > { %2013 = vst [vmem:[%s4985_s4 + $0x6b8] sm:$0xff] %v1787_v54  ;;  %1949 = vst [vmem:[%s4985_s4 + $0x4b8] sm:$0xff] %v1755_v55 }
 0x427   : > { %v1788_v56 = vpop.trf.xlu1  ;;  %v1756_v57 = vpop.trf.xlu0 }
 0x428   : > { %2017 = vst [vmem:[%s4985_s4 + $0x6d8] sm:$0xff] %v1788_v56  ;;  %1953 = vst [vmem:[%s4985_s4 + $0x4d8] sm:$0xff] %v1756_v57 }
 0x42b   : > { %v1789_v58 = vpop.trf.xlu1  ;;  %v1757_v59 = vpop.trf.xlu0 }
 0x42c   : > { %2021 = vst [vmem:[%s4985_s4 + $0x6f8] sm:$0xff] %v1789_v58  ;;  %1957 = vst [vmem:[%s4985_s4 + $0x4f8] sm:$0xff] %v1757_v59 }
 0x42f   : > { %v1790_v60 = vpop.trf.xlu1  ;;  %v1758_v61 = vpop.trf.xlu0 }
 0x430   : > { %2025 = vst [vmem:[%s4985_s4 + $0x718] sm:$0xff] %v1790_v60  ;;  %1961 = vst [vmem:[%s4985_s4 + $0x518] sm:$0xff] %v1758_v61 }
 0x433   : > { %v1791_v62 = vpop.trf.xlu1  ;;  %v1759_v63 = vpop.trf.xlu0 }
 0x434   : > { %2029 = vst [vmem:[%s4985_s4 + $0x738] sm:$0xff] %v1791_v62  ;;  %1965 = vst [vmem:[%s4985_s4 + $0x538] sm:$0xff] %v1759_v63 }
 0x437   : > { %v1792_v0 = vpop.trf.xlu1  ;;  %v1760_v1 = vpop.trf.xlu0 }
 0x438   : > { %2033 = vst [vmem:[%s4985_s4 + $0x758] sm:$0xff] %v1792_v0  ;;  %1969 = vst [vmem:[%s4985_s4 + $0x558] sm:$0xff] %v1760_v1 }
 0x43b   : > { %v1793_v2 = vpop.trf.xlu1  ;;  %v1761_v3 = vpop.trf.xlu0 }
 0x43c   : > { %2037 = vst [vmem:[%s4985_s4 + $0x778] sm:$0xff] %v1793_v2  ;;  %1973 = vst [vmem:[%s4985_s4 + $0x578] sm:$0xff] %v1761_v3 }
 0x43f   : > { %v1794_v4 = vpop.trf.xlu1  ;;  %v1762_v5 = vpop.trf.xlu0 }
 0x440   : > { %2041 = vst [vmem:[%s4985_s4 + $0x798] sm:$0xff] %v1794_v4  ;;  %1977 = vst [vmem:[%s4985_s4 + $0x598] sm:$0xff] %v1762_v5 }
 0x443   : > { %v1795_v6 = vpop.trf.xlu1  ;;  %v1763_v7 = vpop.trf.xlu0 }
 0x444   : > { %2045 = vst [vmem:[%s4985_s4 + $0x7b8] sm:$0xff] %v1795_v6  ;;  %1981 = vst [vmem:[%s4985_s4 + $0x5b8] sm:$0xff] %v1763_v7 }
 0x446   : > { %2061 = sbr.rel (!%p3580_p9) target bundleno = 1135 (0x46f), region = 122 }
 0x447   : > { %v1796_v8 = vpop.trf.xlu1  ;;  %v1764_v9 = vpop.trf.xlu0 }
 0x448   : > { %2049 = vst [vmem:[%s4985_s4 + $0x7d8] sm:$0xff] %v1796_v8  ;;  %1985 = vst [vmem:[%s4985_s4 + $0x5d8] sm:$0xff] %v1764_v9 }
 0x44b   : > { %v1797_v10 = vpop.trf.xlu1  ;;  %v1765_v11 = vpop.trf.xlu0 }
 0x44c   : > { %2053 = vst [vmem:[%s4985_s4 + $0x7f8] sm:$0xff] %v1797_v10  ;;  %1989 = vst [vmem:[%s4985_s4 + $0x5f8] sm:$0xff] %v1765_v11 }
 0x44d   : > { %s5680_s14 = smov (!%p2065_p13, %s2064_s14), 64  ;;  %s5682_s20 = smov (!%p2069_p0, %s2068_s20), 4 }
 0x44e   : > { %s2490_s21 = sshll.u32 %s5680_s14, 7 }
 0x44f   : > { %s5444_s10 = smul.u32 %s2490_s21, %s5682_s20 }
 0x451   : > { %s2073_s19 = ssub.s32 32768, %s5444_s10 }
 0x452   : > { %2074 = vsyncadd %s5435_s3, %s2073_s19  ;;  %p2491_p9 = scmp.ne.s32.totalorder %s5444_s10, 0  ;;  %s2507_s11 = smul.u32 320, %s3273_s12 }
 0x453   : > { %s2508_s26 = smul.u32 440, %s3277_s13  ;;  %s2494_s27 = sshll.u32 %s5682_s20, 3 }
 0x454   : > { %s2077_s6 = sadd.s32 %s2507_s11, %s2489_s5  ;;  %s2083_s24 = smul.u32 %s2494_s27, %s5680_s14 }
 0x455   : > { %s2079_s29 = sadd.s32 %s2508_s26, %s2077_s6  ;;  %s2084_s8 = sshll.u32 %s4985_s4, 4  ;;  %s5455_s8 = int_to_ptr.vmem [resolvable:$true] %s2084_s8 }
 0x456   : > { %s2493_s28 = sshll.u32 %s2079_s29, 7  ;;  %s5606_s2 = sld [smem:[#allocation19_spill]] }
 0x457   : > { %s5462_s25 = sshll.u32 %s2083_s24, 4  ;;  %s3481_s13 = smov [#allocation3]  }
 0x458   : > { %s2983_s12 = scalar_lea.vmem %s5455_s8, %s5462_s25  ;;  %s2987_s16 = sshll.u32 %s3481_s13, 4  ;;  %s2988_s16 = int_to_ptr.vmem [resolvable:$false] %s2987_s16 }
 0x459   : > { %p2984_p1 = scmp.ne.s32.totalorder %s5455_s8, %s2983_s12  ;;  %s2989_s30 = scalar_lea.vmem %s2988_s16, 65536 }
 0x45a   : > { %p2990_p4 = scmp.lt.s32.totalorder %s5455_s8, %s2988_s16  ;;  %p2991_p6 = scmp.lt.s32.totalorder %s2989_s30, %s2983_s12 }
 0x45b   : > { %p2985_p2 = pnand %p2984_p1, %p2491_p9 }
 0x45c   : > { %s5460_s15 = scalar_lea.hbm %s5606_s2, %s2493_s28  ;;  %p2992_p7 = por %p2991_p6, %p2990_p4 }
 0x45d   : > { %p2986_p3 = pneg %p2985_p2 }
 0x45f   : > { %p2993_p5 = pnand %p2992_p7, %p2986_p3 }
 0x461   : > { %2996 = shalt.err (!%p2993_p5)
}
 0x462   : > { %s2997_s1 = scalar_lea.hbm %s5460_s15, %s5462_s25  ;;  %s3001_s4 = scalar_lea.hbm %s5606_s2, 112640 }
 0x463   : > { %p2998_p8 = scmp.ne.s32.totalorder %s5460_s15, %s2997_s1  ;;  %p3002_p13 = scmp.lt.u32.totalorder %s5460_s15, %s5606_s2 }
 0x464   : > { %p3003_p0 = scmp.lt.u32.totalorder %s3001_s4, %s2997_s1  ;;  %p3005_p2 = scmp.lt.u32.totalorder %s2997_s1, %s5460_s15 }
 0x465   : > { %p2999_p10 = pnand %p2998_p8, %p2491_p9 }
 0x466   : > { %p3004_p1 = por %p3003_p0, %p3002_p13 }
 0x467   : > { %p3000_p12 = pneg %p2999_p10 }
 0x468   : > { %p3006_p3 = por %p3005_p2, %p3004_p1 }
 0x46a   : > { %p3007_p4 = pnand %p3006_p3, %p3000_p12 }
 0x46c   : > { %3010 = shalt.err (!%p3007_p4)
}
 0x46d   : > { %s3482_s14 = smov 512   ;;  %s3483_s21 = smov 640  }
 0x46e   : > { %2090 = dma.vmem_to_hbm [thread:$0]  (%p2491_p9), %s5455_s8, %s5462_s25, %s5460_s15, %s5435_s3, %s3482_s14, %s3483_s21, %s2494_s27  }
 0x46f PF: > { %s5607_s19 = sld [smem:[#allocation6_spill]]  ;;  %p2514_p6 = scmp.ge.s32.totalorder %s3293_s17, 2 }
 0x471   : > { %p2511_p7 = pnand %p2514_p6, %p3587_p11 }
 0x475   : > { %s2099_s26 = sand.u32 1, %s5607_s19  }
 0x476   : > { %s2100_s6 = scalar_lea.sflag [#allocation4], %s2099_s26 }
 0x477   : > { %3244 = dma.done.wait (!%p2511_p7), %s2100_s6, 32768  }
 0x478   : > { %3246 = vsyncadd (!%p2511_p7), %s2100_s6, 4294934528  ;;  %s14_s17 = sadd.s32 1, %s3293_s17   ;;  %s5609_s24 = sld [smem:[#allocation7_spill]] }
 0x479   : > { %p11_p5 = scmp.ge.s32.totalorder %s14_s17, 10   ;;  %s5610_s8 = sld [smem:[#allocation17_spill]] }
 0x47a   : > { %s5611_s9 = sld [smem:[#allocation8_spill]]  ;;  %s5612_s10 = sld [smem:[#allocation16_spill]] }
 0x47b   : > { %s5613_s11 = sld [smem:[#allocation9_spill]]  ;;  %s5614_s12 = sld [smem:[#allocation10_spill]] }
 0x47c   : > { %s5615_s13 = sld [smem:[#allocation11_spill]]  ;;  %s5616_s14 = sld [smem:[#allocation12_spill]] }
 0x47d   : > { %s5617_s15 = sld [smem:[#allocation13_spill]]  ;;  %s5618_s16 = sld [smem:[#allocation14_spill]] }
 0x47e   : > { %s5619_s6 = smov %s3253_s7  ;;  %s5620_s7 = smov %s5609_s24 }
 0x47f   :  { %13 = sbr.rel (!%p11_p5) target bundleno = 10 (0xa), region = 298 }
 0x486   :  { %2105 = vsyncpa [#allocation4], 1 }
 0x487   :  { %2107 = vsyncpa [#allocation4 + $0x1], 1 }

</bundles_post_ra>
